<compile_context>
chip_gen: v7x
topology: tpu7x:2x2x1
jax: 0.10.0
libtpu: 0.0.40
codegen_flags: <defaults>
</compile_context>

<pallas_src>
import jax
import jax.numpy as jnp
import numpy as np
from jax import lax
from jax.experimental import pallas as pl
from jax.experimental.pallas import tpu as pltpu

# ---- Attention config (small shapes consistent with the module) ----
B = 2                   # batch
N = 16                  # sequence length
DIM = 32                # model dim
HEADS = 4
DIM_HEAD = 16
INNER = HEADS * DIM_HEAD          # 64
MAX_POS_EMB = 32                  # constructor arg (default 512, shrunk for toy run)
SCALE = DIM_HEAD ** (-0.5)
DIMP = 128                        # lane-dense padded output width (multiple of 128)


def attention_kernel(x_ref, wq_ref, wkv_ref, rel_ref, wo_ref, bo_ref, o_ref):
    """One batch element per grid step; heads statically unrolled.

    Layouts (all trailing dims >= 64 and full-array blocks):
      x_ref   : (1, N, DIM)
      wq_ref  : (DIM, INNER)        = (32, 64)
      wkv_ref : (DIM, 2*INNER)      = (32, 128)   [k columns | v columns]
      rel_ref : (N, N, DIM_HEAD)    rel_pos_emb(dist), gathered once in prep
      wo_ref  : (INNER, DIMP)       = (64, 128)   zero-padded beyond DIM
      bo_ref  : (1, DIMP)
      o_ref   : (1, N, DIMP)        lane-dense output slab (sliced to DIM outside)
    """
    x = x_ref[0].astype(jnp.float32)                       # (N, DIM)
    rel = rel_ref[...].astype(jnp.float32)                 # (N, N, DIM_HEAD)

    # ---- fused projections: two wide MXU matmuls, scale folded into q once ----
    q = jnp.dot(x, wq_ref[...], preferred_element_type=jnp.float32) * SCALE   # (N, 64)
    kv = jnp.dot(x, wkv_ref[...], preferred_element_type=jnp.float32)         # (N, 128)

    heads_out = []
    for h in range(HEADS):                                 # static unroll (keep as Python loop)
        lo, hi = h * DIM_HEAD, (h + 1) * DIM_HEAD
        qh = q[:, lo:hi]                                   # (N, D)  static lane slice
        kh = kv[:, lo:hi]                                  # (N, D)
        vh = kv[:, INNER + lo:INNER + hi]                  # (N, D)

        # content attention: q . k^T (contract last dims, no explicit transpose)
        dots = lax.dot_general(qh, kh, (((1,), (1,)), ((), ())),
                               preferred_element_type=jnp.float32)             # (N, N)
        # relative-position attention: pos[i, r] = q[i] . rel[i, r]
        pos = jnp.sum(qh[:, None, :] * rel, axis=-1)                           # (N, N)

        logits = dots + pos
        m = jnp.max(logits, axis=-1, keepdims=True)
        e = jnp.exp(logits - m)
        denom = jnp.sum(e, axis=-1, keepdims=True)
        attn = e * pl.reciprocal(denom, approx=True)                           # EUP divide

        heads_out.append(jnp.dot(attn, vh, preferred_element_type=jnp.float32))  # (N, D)

    # ---- fused output projection: one (N,64) x (64,128) matmul ----
    ocat = jnp.concatenate(heads_out, axis=-1)                                  # (N, INNER)
    out = jnp.dot(ocat, wo_ref[...], preferred_element_type=jnp.float32) + bo_ref[...]

    # nn.Dropout(p=0.0) -> identity
    o_ref[0] = out.astype(o_ref.dtype)


def prepare_kernel_params(params):
    """One-time layout prep (runs once, NOT per attention call)."""
    f32 = jnp.float32
    wq = params["wq"].astype(f32)                                              # (DIM, INNER)
    wkv = params["wkv"].astype(f32)                                            # (DIM, 2*INNER)
    wo = jnp.pad(params["wo"].astype(f32), ((0, 0), (0, DIMP - DIM)))          # (INNER, DIMP)
    bo = jnp.pad(params["bo"].astype(f32).reshape(1, DIM), ((0, 0), (0, DIMP - DIM)))

    # rel_pos_emb(dist): deterministic function of N + the embedding table.
    seq = jnp.arange(N)
    dist = jnp.clip(seq[:, None] - seq[None, :], -MAX_POS_EMB, MAX_POS_EMB) + MAX_POS_EMB
    rel = params["emb"].astype(f32)[dist]                                      # (N, N, D)
    return wq, wkv, rel, wo, bo


@jax.jit
def attention(x, wq, wkv, rel, wo, bo):
    """x: (B, N, DIM). Self-attention (context=None), no mask, dropout=0."""
    flops = int(B * (2 * N * DIM * INNER                  # q projection
                     + 2 * N * DIM * 2 * INNER            # kv projection
                     + HEADS * 3 * 2 * N * N * DIM_HEAD   # dots + pos + attn@v
                     + 2 * N * INNER * DIMP))             # output projection
    bytes_acc = int(4 * (x.size + wq.size + wkv.size + rel.size
                         + wo.size + bo.size + B * N * DIMP))

    out = pl.pallas_call(
        attention_kernel,
        out_shape=jax.ShapeDtypeStruct((B, N, DIMP), x.dtype),
        grid=(B,),
        in_specs=[
            pl.BlockSpec((1, N, DIM), lambda b: (b, 0, 0)),          # x
            pl.BlockSpec((DIM, INNER), lambda b: (0, 0)),            # wq   (32, 64)
            pl.BlockSpec((DIM, 2 * INNER), lambda b: (0, 0)),        # wkv  (32, 128)
            pl.BlockSpec((N, N, DIM_HEAD), lambda b: (0, 0, 0)),     # rel
            pl.BlockSpec((INNER, DIMP), lambda b: (0, 0)),           # wo   (64, 128)
            pl.BlockSpec((1, DIMP), lambda b: (0, 0)),               # bo
        ],
        out_specs=pl.BlockSpec((1, N, DIMP), lambda b: (b, 0, 0)),
        compiler_params=pltpu.CompilerParams(
            dimension_semantics=("parallel",)),
        cost_estimate=pl.CostEstimate(
            flops=flops, transcendentals=B * HEADS * N * N,
            bytes_accessed=bytes_acc),
    )(x, wq, wkv, rel, wo, bo)
    return out[..., :DIM]


def reference(x, params):
    """Pure-JAX mirror of the PyTorch Attention.forward (context=None, no mask)."""
    with jax.default_matmul_precision("highest"):
        q = x @ params["wq"]                                     # (B, N, INNER)
        kv = x @ params["wkv"]
        k, v = kv[..., :INNER], kv[..., INNER:]

        def split(t):
            return t.reshape(B, N, HEADS, DIM_HEAD).transpose(0, 2, 1, 3)   # (B, H, N, D)

        q, k, v = split(q), split(k), split(v)
        dots = jnp.einsum("bhid,bhjd->bhij", q, k) * SCALE
        seq = jnp.arange(N)
        dist = jnp.clip(seq[:, None] - seq[None, :], -MAX_POS_EMB, MAX_POS_EMB) + MAX_POS_EMB
        rel = params["emb"][dist]                                            # (N, N, D)
        pos = jnp.einsum("bhnd,nrd->bhnr", q, rel) * SCALE
        attn = jax.nn.softmax(dots + pos, axis=-1)
        out = jnp.einsum("bhij,bhjd->bhid", attn, v)
        out = out.transpose(0, 2, 1, 3).reshape(B, N, INNER)
        return out @ params["wo"] + params["bo"]


def init_params(key):
    ks = jax.random.split(key, 5)
    f32 = jnp.float32
    return {
        # nn.Linear(dim, inner_dim, bias=False): weight stored pre-transposed (in, out)
        "wq":  jax.random.normal(ks[0], (DIM, INNER), f32) * 0.1,
        # nn.Linear(dim, 2*inner_dim, bias=False)
        "wkv": jax.random.normal(ks[1], (DIM, 2 * INNER), f32) * 0.1,
        # nn.Linear(inner_dim, dim): weight pre-transposed (in, out), bias (dim,)
        "wo":  jax.random.normal(ks[2], (INNER, DIM), f32) * 0.1,
        "bo":  jax.random.normal(ks[3], (DIM,), f32) * 0.1,
        # nn.Embedding(2*max_pos_emb+1, dim_head)
        "emb": jax.random.normal(ks[4], (2 * MAX_POS_EMB + 1, DIM_HEAD), f32) * 0.1,
    }


if __name__ == "__main__":
    key = jax.random.PRNGKey(0)
    kx, kp = jax.random.split(key)
    x = jax.random.normal(kx, (B, N, DIM), jnp.float32)
    params = init_params(kp)

    # Layout prep happens once, outside the per-call path (review item).
    kernel_params = prepare_kernel_params(params)

    out = jax.block_until_ready(attention(x, *kernel_params))
    ref = jax.block_until_ready(reference(x, params))
    assert out.shape == (B, N, DIM)
    # 2e-3 tolerance covers the EUP approx-reciprocal in the kernel softmax.
    np.testing.assert_allclose(np.asarray(out), np.asarray(ref),
                               rtol=2e-3, atol=2e-3)
    print("KERNEL_OK")
</pallas_src>

<mosaic_0001>
module attributes {stable_mosaic.version = 11 : i64} {
  func.func @attention_kernel(%arg0: i32, %arg1: memref<1x16x32xf32, #tpu.memory_space<vmem>>, %arg2: memref<32x64xf32, #tpu.memory_space<vmem>>, %arg3: memref<32x128xf32, #tpu.memory_space<vmem>>, %arg4: memref<16x16x16xf32, #tpu.memory_space<vmem>>, %arg5: memref<64x128xf32, #tpu.memory_space<vmem>>, %arg6: memref<1x128xf32, #tpu.memory_space<vmem>>, %arg7: memref<1x16x128xf32, #tpu.memory_space<vmem>>) attributes {dimension_semantics = [#tpu.dimension_semantics<parallel>], iteration_bounds = array<i64: 2>, scalar_prefetch = 0 : i64, scratch_operands = 0 : i64, tpu.core_type = #tpu.core_type<tc>, window_params = [{transform_indices = @transform_0, window_bounds = array<i64: 1, 16, 32>}, {pipeline_mode = #tpu.pipeline_mode<synchronous>, transform_indices = @transform_1, window_bounds = array<i64: 32, 64>}, {pipeline_mode = #tpu.pipeline_mode<synchronous>, transform_indices = @transform_2, window_bounds = array<i64: 32, 128>}, {pipeline_mode = #tpu.pipeline_mode<synchronous>, transform_indices = @transform_3, window_bounds = array<i64: 16, 16, 16>}, {pipeline_mode = #tpu.pipeline_mode<synchronous>, transform_indices = @transform_4, window_bounds = array<i64: 64, 128>}, {pipeline_mode = #tpu.pipeline_mode<synchronous>, transform_indices = @transform_5, window_bounds = array<i64: 1, 128>}, {transform_indices = @transform_6, window_bounds = array<i64: 1, 16, 128>}]} {
    %c0 = arith.constant 0 : index
    %c0_0 = arith.constant 0 : index
    %c0_1 = arith.constant 0 : index
    %0 = vector.load %arg1[%c0, %c0_0, %c0_1] : memref<1x16x32xf32, #tpu.memory_space<vmem>>, vector<1x16x32xf32>
    %1 = vector.shape_cast %0 : vector<1x16x32xf32> to vector<16x32xf32>
    %c0_2 = arith.constant 0 : index
    %c0_3 = arith.constant 0 : index
    %c0_4 = arith.constant 0 : index
    %2 = vector.load %arg4[%c0_2, %c0_3, %c0_4] : memref<16x16x16xf32, #tpu.memory_space<vmem>>, vector<16x16x16xf32>
    %c0_5 = arith.constant 0 : index
    %c0_6 = arith.constant 0 : index
    %3 = vector.load %arg2[%c0_5, %c0_6] : memref<32x64xf32, #tpu.memory_space<vmem>>, vector<32x64xf32>
    %cst = arith.constant dense<0.000000e+00> : vector<16x64xf32>
    %4 = tpu.matmul %1, %3, %cst {dimension_numbers = #tpu.dot_dimension_numbers<[1], [0], [0], [1], [0, 0, 1, 1], [], []>} : vector<16x32xf32>, vector<32x64xf32>, vector<16x64xf32> -> vector<16x64xf32>
    %cst_7 = arith.constant 2.500000e-01 : f32
    %5 = vector.broadcast %cst_7 : f32 to vector<16x64xf32>
    %6 = arith.mulf %4, %5 : vector<16x64xf32>
    %c0_8 = arith.constant 0 : index
    %c0_9 = arith.constant 0 : index
    %7 = vector.load %arg3[%c0_8, %c0_9] : memref<32x128xf32, #tpu.memory_space<vmem>>, vector<32x128xf32>
    %cst_10 = arith.constant dense<0.000000e+00> : vector<16x128xf32>
    %8 = tpu.matmul %1, %7, %cst_10 {dimension_numbers = #tpu.dot_dimension_numbers<[1], [0], [0], [1], [0, 0, 1, 1], [], []>} : vector<16x32xf32>, vector<32x128xf32>, vector<16x128xf32> -> vector<16x128xf32>
    %9 = vector.extract_strided_slice %6 {offsets = [0, 0], sizes = [16, 16], strides = [1, 1]} : vector<16x64xf32> to vector<16x16xf32>
    %10 = vector.extract_strided_slice %8 {offsets = [0, 0], sizes = [16, 16], strides = [1, 1]} : vector<16x128xf32> to vector<16x16xf32>
    %11 = vector.extract_strided_slice %8 {offsets = [0, 64], sizes = [16, 16], strides = [1, 1]} : vector<16x128xf32> to vector<16x16xf32>
    %cst_11 = arith.constant dense<0.000000e+00> : vector<16x16xf32>
    %12 = tpu.matmul %9, %10, %cst_11 {dimension_numbers = #tpu.dot_dimension_numbers<[1], [1], [0], [0], [0, 0, 1, 0], [], []>} : vector<16x16xf32>, vector<16x16xf32>, vector<16x16xf32> -> vector<16x16xf32>
    %13 = vector.shape_cast %9 : vector<16x16xf32> to vector<16x1x16xf32>
    %14 = vector.broadcast %13 : vector<16x1x16xf32> to vector<16x16x16xf32>
    %15 = arith.mulf %14, %2 : vector<16x16x16xf32>
    %cst_12 = arith.constant dense<0.000000e+00> : vector<16x16xf32>
    %16 = vector.multi_reduction <add>, %15, %cst_12 [2] : vector<16x16x16xf32> to vector<16x16xf32>
    %17 = arith.addf %12, %16 : vector<16x16xf32>
    %cst_13 = arith.constant dense<0xFF800000> : vector<16xf32>
    %18 = vector.multi_reduction <maximumf>, %17, %cst_13 [1] : vector<16x16xf32> to vector<16xf32>
    %19 = vector.shape_cast %18 : vector<16xf32> to vector<16x1xf32>
    %20 = vector.broadcast %19 : vector<16x1xf32> to vector<16x16xf32>
    %21 = arith.subf %17, %20 : vector<16x16xf32>
    %22 = math.exp %21 : vector<16x16xf32>
    %cst_14 = arith.constant dense<0.000000e+00> : vector<16xf32>
    %23 = vector.multi_reduction <add>, %22, %cst_14 [1] : vector<16x16xf32> to vector<16xf32>
    %24 = vector.shape_cast %23 : vector<16xf32> to vector<16x1xf32>
    %25 = tpu.reciprocal %24 {approx = true} : vector<16x1xf32> -> vector<16x1xf32>
    %26 = vector.broadcast %25 : vector<16x1xf32> to vector<16x16xf32>
    %27 = arith.mulf %22, %26 : vector<16x16xf32>
    %cst_15 = arith.constant dense<0.000000e+00> : vector<16x16xf32>
    %28 = tpu.matmul %27, %11, %cst_15 {dimension_numbers = #tpu.dot_dimension_numbers<[1], [0], [0], [1], [0, 0, 1, 1], [], []>} : vector<16x16xf32>, vector<16x16xf32>, vector<16x16xf32> -> vector<16x16xf32>
    %29 = vector.extract_strided_slice %6 {offsets = [0, 16], sizes = [16, 16], strides = [1, 1]} : vector<16x64xf32> to vector<16x16xf32>
    %30 = vector.extract_strided_slice %8 {offsets = [0, 16], sizes = [16, 16], strides = [1, 1]} : vector<16x128xf32> to vector<16x16xf32>
    %31 = vector.extract_strided_slice %8 {offsets = [0, 80], sizes = [16, 16], strides = [1, 1]} : vector<16x128xf32> to vector<16x16xf32>
    %cst_16 = arith.constant dense<0.000000e+00> : vector<16x16xf32>
    %32 = tpu.matmul %29, %30, %cst_16 {dimension_numbers = #tpu.dot_dimension_numbers<[1], [1], [0], [0], [0, 0, 1, 0], [], []>} : vector<16x16xf32>, vector<16x16xf32>, vector<16x16xf32> -> vector<16x16xf32>
    %33 = vector.shape_cast %29 : vector<16x16xf32> to vector<16x1x16xf32>
    %34 = vector.broadcast %33 : vector<16x1x16xf32> to vector<16x16x16xf32>
    %35 = arith.mulf %34, %2 : vector<16x16x16xf32>
    %cst_17 = arith.constant dense<0.000000e+00> : vector<16x16xf32>
    %36 = vector.multi_reduction <add>, %35, %cst_17 [2] : vector<16x16x16xf32> to vector<16x16xf32>
    %37 = arith.addf %32, %36 : vector<16x16xf32>
    %cst_18 = arith.constant dense<0xFF800000> : vector<16xf32>
    %38 = vector.multi_reduction <maximumf>, %37, %cst_18 [1] : vector<16x16xf32> to vector<16xf32>
    %39 = vector.shape_cast %38 : vector<16xf32> to vector<16x1xf32>
    %40 = vector.broadcast %39 : vector<16x1xf32> to vector<16x16xf32>
    %41 = arith.subf %37, %40 : vector<16x16xf32>
    %42 = math.exp %41 : vector<16x16xf32>
    %cst_19 = arith.constant dense<0.000000e+00> : vector<16xf32>
    %43 = vector.multi_reduction <add>, %42, %cst_19 [1] : vector<16x16xf32> to vector<16xf32>
    %44 = vector.shape_cast %43 : vector<16xf32> to vector<16x1xf32>
    %45 = tpu.reciprocal %44 {approx = true} : vector<16x1xf32> -> vector<16x1xf32>
    %46 = vector.broadcast %45 : vector<16x1xf32> to vector<16x16xf32>
    %47 = arith.mulf %42, %46 : vector<16x16xf32>
    %cst_20 = arith.constant dense<0.000000e+00> : vector<16x16xf32>
    %48 = tpu.matmul %47, %31, %cst_20 {dimension_numbers = #tpu.dot_dimension_numbers<[1], [0], [0], [1], [0, 0, 1, 1], [], []>} : vector<16x16xf32>, vector<16x16xf32>, vector<16x16xf32> -> vector<16x16xf32>
    %49 = vector.extract_strided_slice %6 {offsets = [0, 32], sizes = [16, 16], strides = [1, 1]} : vector<16x64xf32> to vector<16x16xf32>
    %50 = vector.extract_strided_slice %8 {offsets = [0, 32], sizes = [16, 16], strides = [1, 1]} : vector<16x128xf32> to vector<16x16xf32>
    %51 = vector.extract_strided_slice %8 {offsets = [0, 96], sizes = [16, 16], strides = [1, 1]} : vector<16x128xf32> to vector<16x16xf32>
    %cst_21 = arith.constant dense<0.000000e+00> : vector<16x16xf32>
    %52 = tpu.matmul %49, %50, %cst_21 {dimension_numbers = #tpu.dot_dimension_numbers<[1], [1], [0], [0], [0, 0, 1, 0], [], []>} : vector<16x16xf32>, vector<16x16xf32>, vector<16x16xf32> -> vector<16x16xf32>
    %53 = vector.shape_cast %49 : vector<16x16xf32> to vector<16x1x16xf32>
    %54 = vector.broadcast %53 : vector<16x1x16xf32> to vector<16x16x16xf32>
    %55 = arith.mulf %54, %2 : vector<16x16x16xf32>
    %cst_22 = arith.constant dense<0.000000e+00> : vector<16x16xf32>
    %56 = vector.multi_reduction <add>, %55, %cst_22 [2] : vector<16x16x16xf32> to vector<16x16xf32>
    %57 = arith.addf %52, %56 : vector<16x16xf32>
    %cst_23 = arith.constant dense<0xFF800000> : vector<16xf32>
    %58 = vector.multi_reduction <maximumf>, %57, %cst_23 [1] : vector<16x16xf32> to vector<16xf32>
    %59 = vector.shape_cast %58 : vector<16xf32> to vector<16x1xf32>
    %60 = vector.broadcast %59 : vector<16x1xf32> to vector<16x16xf32>
    %61 = arith.subf %57, %60 : vector<16x16xf32>
    %62 = math.exp %61 : vector<16x16xf32>
    %cst_24 = arith.constant dense<0.000000e+00> : vector<16xf32>
    %63 = vector.multi_reduction <add>, %62, %cst_24 [1] : vector<16x16xf32> to vector<16xf32>
    %64 = vector.shape_cast %63 : vector<16xf32> to vector<16x1xf32>
    %65 = tpu.reciprocal %64 {approx = true} : vector<16x1xf32> -> vector<16x1xf32>
    %66 = vector.broadcast %65 : vector<16x1xf32> to vector<16x16xf32>
    %67 = arith.mulf %62, %66 : vector<16x16xf32>
    %cst_25 = arith.constant dense<0.000000e+00> : vector<16x16xf32>
    %68 = tpu.matmul %67, %51, %cst_25 {dimension_numbers = #tpu.dot_dimension_numbers<[1], [0], [0], [1], [0, 0, 1, 1], [], []>} : vector<16x16xf32>, vector<16x16xf32>, vector<16x16xf32> -> vector<16x16xf32>
    %69 = vector.extract_strided_slice %6 {offsets = [0, 48], sizes = [16, 16], strides = [1, 1]} : vector<16x64xf32> to vector<16x16xf32>
    %70 = vector.extract_strided_slice %8 {offsets = [0, 48], sizes = [16, 16], strides = [1, 1]} : vector<16x128xf32> to vector<16x16xf32>
    %71 = vector.extract_strided_slice %8 {offsets = [0, 112], sizes = [16, 16], strides = [1, 1]} : vector<16x128xf32> to vector<16x16xf32>
    %cst_26 = arith.constant dense<0.000000e+00> : vector<16x16xf32>
    %72 = tpu.matmul %69, %70, %cst_26 {dimension_numbers = #tpu.dot_dimension_numbers<[1], [1], [0], [0], [0, 0, 1, 0], [], []>} : vector<16x16xf32>, vector<16x16xf32>, vector<16x16xf32> -> vector<16x16xf32>
    %73 = vector.shape_cast %69 : vector<16x16xf32> to vector<16x1x16xf32>
    %74 = vector.broadcast %73 : vector<16x1x16xf32> to vector<16x16x16xf32>
    %75 = arith.mulf %74, %2 : vector<16x16x16xf32>
    %cst_27 = arith.constant dense<0.000000e+00> : vector<16x16xf32>
    %76 = vector.multi_reduction <add>, %75, %cst_27 [2] : vector<16x16x16xf32> to vector<16x16xf32>
    %77 = arith.addf %72, %76 : vector<16x16xf32>
    %cst_28 = arith.constant dense<0xFF800000> : vector<16xf32>
    %78 = vector.multi_reduction <maximumf>, %77, %cst_28 [1] : vector<16x16xf32> to vector<16xf32>
    %79 = vector.shape_cast %78 : vector<16xf32> to vector<16x1xf32>
    %80 = vector.broadcast %79 : vector<16x1xf32> to vector<16x16xf32>
    %81 = arith.subf %77, %80 : vector<16x16xf32>
    %82 = math.exp %81 : vector<16x16xf32>
    %cst_29 = arith.constant dense<0.000000e+00> : vector<16xf32>
    %83 = vector.multi_reduction <add>, %82, %cst_29 [1] : vector<16x16xf32> to vector<16xf32>
    %84 = vector.shape_cast %83 : vector<16xf32> to vector<16x1xf32>
    %85 = tpu.reciprocal %84 {approx = true} : vector<16x1xf32> -> vector<16x1xf32>
    %86 = vector.broadcast %85 : vector<16x1xf32> to vector<16x16xf32>
    %87 = arith.mulf %82, %86 : vector<16x16xf32>
    %cst_30 = arith.constant dense<0.000000e+00> : vector<16x16xf32>
    %88 = tpu.matmul %87, %71, %cst_30 {dimension_numbers = #tpu.dot_dimension_numbers<[1], [0], [0], [1], [0, 0, 1, 1], [], []>} : vector<16x16xf32>, vector<16x16xf32>, vector<16x16xf32> -> vector<16x16xf32>
    %89 = tpu.concatenate %28, %48, %68, %88 in 1 : vector<16x16xf32>, vector<16x16xf32>, vector<16x16xf32>, vector<16x16xf32> -> vector<16x64xf32>
    %c0_31 = arith.constant 0 : index
    %c0_32 = arith.constant 0 : index
    %90 = vector.load %arg5[%c0_31, %c0_32] : memref<64x128xf32, #tpu.memory_space<vmem>>, vector<64x128xf32>
    %cst_33 = arith.constant dense<0.000000e+00> : vector<16x128xf32>
    %91 = tpu.matmul %89, %90, %cst_33 {dimension_numbers = #tpu.dot_dimension_numbers<[1], [0], [0], [1], [0, 0, 1, 1], [], []>} : vector<16x64xf32>, vector<64x128xf32>, vector<16x128xf32> -> vector<16x128xf32>
    %c0_34 = arith.constant 0 : index
    %c0_35 = arith.constant 0 : index
    %92 = vector.load %arg6[%c0_34, %c0_35] : memref<1x128xf32, #tpu.memory_space<vmem>>, vector<1x128xf32>
    %93 = vector.broadcast %92 : vector<1x128xf32> to vector<16x128xf32>
    %94 = arith.addf %91, %93 : vector<16x128xf32>
    %c0_36 = arith.constant 0 : index
    %c0_37 = arith.constant 0 : index
    %c0_38 = arith.constant 0 : index
    %95 = vector.load %arg7[%c0_36, %c0_37, %c0_38] : memref<1x16x128xf32, #tpu.memory_space<vmem>>, vector<1x16x128xf32>
    %96 = vector.shape_cast %95 : vector<1x16x128xf32> to vector<16x128xf32>
    %97 = vector.shape_cast %94 : vector<16x128xf32> to vector<1x16x128xf32>
    tpu.vector_store %arg7[%c0_36, %c0_37, %c0_38], %97 {strides = array<i32>} : memref<1x16x128xf32, #tpu.memory_space<vmem>>, vector<1x16x128xf32>,
    return
  }
  func.func @transform_0(%arg0: i32) -> (i32, i32, i32) {
    %c0_i32 = arith.constant 0 : i32
    %c0_i32_0 = arith.constant 0 : i32
    %c0_i32_1 = arith.constant 0 : i32
    return %arg0, %c0_i32, %c0_i32_0 : i32, i32, i32
  }
  func.func @transform_1(%arg0: i32) -> (i32, i32) {
    %c0_i32 = arith.constant 0 : i32
    %c0_i32_0 = arith.constant 0 : i32
    %c0_i32_1 = arith.constant 0 : i32
    return %c0_i32, %c0_i32_0 : i32, i32
  }
  func.func @transform_2(%arg0: i32) -> (i32, i32) {
    %c0_i32 = arith.constant 0 : i32
    %c0_i32_0 = arith.constant 0 : i32
    %c0_i32_1 = arith.constant 0 : i32
    return %c0_i32, %c0_i32_0 : i32, i32
  }
  func.func @transform_3(%arg0: i32) -> (i32, i32, i32) {
    %c0_i32 = arith.constant 0 : i32
    %c0_i32_0 = arith.constant 0 : i32
    %c0_i32_1 = arith.constant 0 : i32
    %c0_i32_2 = arith.constant 0 : i32
    return %c0_i32, %c0_i32_0, %c0_i32_1 : i32, i32, i32
  }
  func.func @transform_4(%arg0: i32) -> (i32, i32) {
    %c0_i32 = arith.constant 0 : i32
    %c0_i32_0 = arith.constant 0 : i32
    %c0_i32_1 = arith.constant 0 : i32
    return %c0_i32, %c0_i32_0 : i32, i32
  }
  func.func @transform_5(%arg0: i32) -> (i32, i32) {
    %c0_i32 = arith.constant 0 : i32
    %c0_i32_0 = arith.constant 0 : i32
    %c0_i32_1 = arith.constant 0 : i32
    return %c0_i32, %c0_i32_0 : i32, i32
  }
  func.func @transform_6(%arg0: i32) -> (i32, i32, i32) {
    %c0_i32 = arith.constant 0 : i32
    %c0_i32_0 = arith.constant 0 : i32
    %c0_i32_1 = arith.constant 0 : i32
    return %arg0, %c0_i32, %c0_i32_0 : i32, i32, i32
  }
}

</mosaic_0001>

<bundles_post_ra>
// kernel: attention.1
= control target key start
LH: loop header
LB: loop body
LE: loop exit
PB: predicated region body
PF: predicated region fallthrough
CT: control target
= control target key end

     0   :  { %11 = vsyncpa [#allocation3], 0  ;;  %s6093_s0 = inlined_call_operand.hbm [shape: f32[2,16,32], index: 0, kind: input, shape index: {}]   ;;  %s6094_s1 = inlined_call_operand.hbm [shape: f32[32,64], index: 1, kind: input, shape index: {}]   ;;  %s6095_s2 = inlined_call_operand.hbm [shape: f32[32,128], index: 2, kind: input, shape index: {}]   ;;  %s6096_s3 = inlined_call_operand.hbm [shape: f32[16,16,16], index: 3, kind: input, shape index: {}]   ;;  %s6097_s4 = inlined_call_operand.hbm [shape: f32[64,128], index: 4, kind: input, shape index: {}]   ;;  %s6098_s5 = inlined_call_operand.vmem [shape: f32[1,128], index: 5, kind: input, shape index: {}]   ;;  %s6099_s6 = inlined_call_operand.hbm [shape: f32[2,16,128], index: 6, kind: output, shape index: {}]  }
   0x1   :  { %13 = vsyncpa [#allocation3 + $0x1], 0 }
   0x2   :  { %14 = vsyncpa [#allocation6], 0 }
   0x3   :  { %15 = vsyncpa [#allocation9], 0 }
   0x4   :  { %16 = vsyncpa [#allocation4], 0 }
   0x5   :  { %18 = vsyncpa [#allocation4 + $0x1], 0  ;;  %s4501_s21 = smov 0   ;;  %s4503_s22 = smov 0  }
   0x6   :  { %s4505_s23 = smov 0   ;;  %s4507_s24 = smov 0  }
   0x7 LB: > { %s4522_s25 = sadd.s32 4294967295, %s4446_s24   ;;  %s3754_s26 = sadd.s32 4294967294, %s4446_s24   ;;  %s4446_s24 = sphi %s4507_s24, %s6303_s24   ;;  %s4442_s23 = sphi %s4505_s23, %s6302_s23   ;;  %s4438_s22 = sphi %s4503_s22, %s6301_s22   ;;  %s4434_s21 = sphi %s4501_s21, %s6300_s21  }
   0x8   : > { %p44_p0 = scmp.ne.s32.totalorder %s4438_s22, %s4434_s21  ;;  %p6100_p1 = scmp.eq.s32.totalorder %s4522_s25, 0 }
   0x9   : > { %p179_p3 = scmp.eq.s32.totalorder %s3754_s26, 1  ;;  %p3755_p5 = scmp.ge.s32.totalorder %s4446_s24, 1 }
   0xa   : > { %p4531_p4 = por %p6100_p1, %p44_p0  ;;  %p186_p7 = scmp.lt.s32.totalorder %s4446_s24, 3 }
   0xb   : > { %p4536_p6 = por %p179_p3, %p44_p0  ;;  %s4448_s30 = smov [#allocation5]  }
   0xc   : > { %s6176_s27 = scalar_select %p4531_p4, 1, 0 }
   0xd   : > { %s6177_s28 = scalar_select %p4536_p6, 1, 0 }
   0xe   : > { %p4541_p8 = pnand %p3755_p5, %p186_p7  ;;  %s198_s7 = sshll.u32 %s4448_s30, 4  ;;  %s4545_s7 = int_to_ptr.vmem [resolvable:$true] %s198_s7 }
   0xf   : > { %s4449_s9 = smov [#allocation8]   ;;  %s4450_s11 = smov [#allocation7]  }
  0x10   : > { %s6178_s29 = scalar_select %p4541_p8, 1, 0 }
  0x11   : > { %p4052_p9 = pneg %p4541_p8  ;;  %s224_s10 = sshll.u32 %s4449_s9, 4  ;;  %s4556_s10 = int_to_ptr.vmem [resolvable:$true] %s224_s10 }
  0x12   : > { %s4558_s12 = sshll.u32 %s4450_s11, 4  ;;  %s4230_s15 = scalar_lea.hbm %s6094_s1, 512  ;;  %s212_s12 = int_to_ptr.vmem [resolvable:$true] %s4558_s12 }
  0x13   : > { %p4552_p11 = pnand %p4052_p9, %p6100_p1  ;;  %p4231_p12 = scmp.ne.s32.totalorder %s6094_s1, %s4230_s15 }
  0x14   : > { %p4237_p5 = scmp.lt.u32.totalorder %s4230_s15, %s6094_s1 }
  0x15   : > { %p4568_p13 = pneg %p4552_p11 }
  0x17   : > { %p4233_p0 = pnand %p4568_p13, %p4231_p12 }
  0x19   : > { %p4234_p3 = pneg %p4233_p0 }
  0x1b   : > { %p4239_p7 = pnand %p4237_p5, %p4234_p3 }
  0x1d   : > { %4242 = shalt.err (!%p4239_p7)
}
  0x1e   : > { %s4243_s26 = scalar_lea.vmem %s4545_s7, 512  ;;  %p4251_p2 = scmp.lt.s32.totalorder %s4545_s7, %s4545_s7 }
  0x1f   : > { %p4244_p9 = scmp.ne.s32.totalorder %s4545_s7, %s4243_s26  ;;  %p4252_p6 = scmp.lt.s32.totalorder %s4243_s26, %s4243_s26 }
  0x21   : > { %p4246_p10 = pnand %p4244_p9, %p4568_p13  ;;  %p4253_p12 = por %p4252_p6, %p4251_p2 }
  0x23   : > { %p4247_p1 = pneg %p4246_p10 }
  0x25   : > { %p4254_p0 = pnand %p4253_p12, %p4247_p1 }
  0x27   : > { %4257 = shalt.err (!%p4254_p0)
}
  0x28   : > { %s4451_s30 = smov 128   ;;  %s4452_s9 = smov 8  }
  0x29   : > { %4055 = dma.hbm_to_vmem [thread:$0]  (!%p4552_p11), %s6094_s1, 512, %s4545_s7, [#allocation6], %s4451_s30, %s4451_s30, %s4452_s9  }
  0x2a   : > { %s4258_s16 = scalar_lea.hbm %s6096_s3, 4096 }
  0x2b   : > { %p4259_p1 = scmp.ne.s32.totalorder %s6096_s3, %s4258_s16  ;;  %p4265_p10 = scmp.lt.u32.totalorder %s4258_s16, %s6096_s3 }
  0x2d   : > { %p4261_p2 = pnand %p4259_p1, %p4568_p13 }
  0x2f   : > { %p4262_p6 = pneg %p4261_p2 }
  0x31   : > { %p4267_p3 = pnand %p4265_p10, %p4262_p6 }
  0x33   : > { %4270 = shalt.err (!%p4267_p3)
}
  0x34   : > { %s4271_s7 = scalar_lea.vmem %s4556_s10, 4096  ;;  %p4279_p12 = scmp.lt.s32.totalorder %s4556_s10, %s4556_s10 }
  0x35   : > { %p4272_p5 = scmp.ne.s32.totalorder %s4556_s10, %s4271_s7  ;;  %p4280_p0 = scmp.lt.s32.totalorder %s4271_s7, %s4271_s7 }
  0x37   : > { %p4274_p7 = pnand %p4272_p5, %p4568_p13  ;;  %p4281_p1 = por %p4280_p0, %p4279_p12 }
  0x39   : > { %p4275_p9 = pneg %p4274_p7 }
  0x3b   : > { %p4282_p2 = pnand %p4281_p1, %p4275_p9 }
  0x3d   : > { %4285 = shalt.err (!%p4282_p2)
}
  0x3e   : > { %4061 = dma.hbm_to_vmem [thread:$0]  (!%p4552_p11), %s6096_s3, 4096, %s4556_s10, [#allocation9], %s4451_s30, %s4451_s30, %s4452_s9  }
  0x3f   : > { %s4286_s16 = scalar_lea.hbm %s6095_s2, 512 }
  0x40   : > { %p4287_p6 = scmp.ne.s32.totalorder %s6095_s2, %s4286_s16  ;;  %p4293_p5 = scmp.lt.u32.totalorder %s4286_s16, %s6095_s2 }
  0x42   : > { %p4289_p10 = pnand %p4287_p6, %p4568_p13 }
  0x44   : > { %p4290_p3 = pneg %p4289_p10 }
  0x46   : > { %p4295_p7 = pnand %p4293_p5, %p4290_p3 }
  0x48   : > { %4298 = shalt.err (!%p4295_p7)
}
  0x49   : > { %s4299_s7 = scalar_lea.vmem %s212_s12, 512  ;;  %p4307_p1 = scmp.lt.s32.totalorder %s212_s12, %s212_s12 }
  0x4a   : > { %p4300_p9 = scmp.ne.s32.totalorder %s212_s12, %s4299_s7  ;;  %p4308_p2 = scmp.lt.s32.totalorder %s4299_s7, %s4299_s7 }
  0x4c   : > { %p4302_p12 = pnand %p4300_p9, %p4568_p13  ;;  %p4309_p4 = por %p4308_p2, %p4307_p1 }
  0x4e   : > { %p4303_p0 = pneg %p4302_p12 }
  0x50   : > { %p4310_p8 = pnand %p4309_p4, %p4303_p0 }
  0x52   : > { %4313 = shalt.err (!%p4310_p8)
}
  0x53   : > { %4058 = dma.hbm_to_vmem [thread:$0]  (!%p4552_p11), %s6095_s2, 512, %s212_s12, [#allocation6], %s4451_s30, %s4451_s30, %s4452_s9  }
  0x54   : > { %s4453_s13 = smov [#allocation10]   ;;  %s4314_s17 = scalar_lea.hbm %s6097_s4, 1024 }
  0x55   : > { %s237_s14 = sshll.u32 %s4453_s13, 4  ;;  %p4315_p4 = scmp.ne.s32.totalorder %s6097_s4, %s4314_s17  ;;  %s238_s14 = int_to_ptr.vmem [resolvable:$true] %s237_s14 }
  0x56   : > { %p4321_p10 = scmp.lt.u32.totalorder %s4314_s17, %s6097_s4 }
  0x57   : > { %p4317_p8 = pnand %p4315_p4, %p4568_p13 }
  0x59   : > { %p4318_p6 = pneg %p4317_p8 }
  0x5b   : > { %p4323_p3 = pnand %p4321_p10, %p4318_p6 }
  0x5d   : > { %4326 = shalt.err (!%p4323_p3)
}
  0x5e   : > { %s4327_s12 = scalar_lea.vmem %s238_s14, 1024  ;;  %p4335_p12 = scmp.lt.s32.totalorder %s238_s14, %s238_s14 }
  0x5f   : > { %p4328_p5 = scmp.ne.s32.totalorder %s238_s14, %s4327_s12  ;;  %p4336_p0 = scmp.lt.s32.totalorder %s4327_s12, %s4327_s12 }
  0x61   : > { %p4330_p7 = pnand %p4328_p5, %p4568_p13  ;;  %p4337_p1 = por %p4336_p0, %p4335_p12 }
  0x63   : > { %p4331_p9 = pneg %p4330_p7 }
  0x65   : > { %p4338_p2 = pnand %p4337_p1, %p4331_p9 }
  0x67   : > { %4341 = shalt.err (!%p4338_p2)
}
  0x68   : > { %4064 = dma.hbm_to_vmem [thread:$0]  (!%p4552_p11), %s6097_s4, 1024, %s238_s14, [#allocation9], %s4451_s30, %s4451_s30, %s4452_s9  }
  0x69   : > { %s4662_s18 = sadd.s32 1, %s4446_s24   ;;  %s31_s8 = sadd.s32 1, %s4442_s23 }
  0x6a   : > { %s28_s13 = ssub.s32 %s4446_s24, %s4662_s18  ;;  %p38_p13 = scmp.ne.s32.totalorder %s4442_s23, %s4438_s22 }
  0x6b   : > { %p29_p4 = scmp.eq.s32.totalorder %s28_s13, 0  ;;  %p39_p8 = scmp.eq.s32.totalorder %s4446_s24, 0 }
  0x6c   : > { %p6181_p6 = scmp.eq.s32.totalorder %s4522_s25, 1  ;;  %p4077_p3 = scmp.lt.s32.totalorder %s4446_s24, 2 }
  0x6d   : > { %s4678_s16 = scalar_select %p29_p4, %s4442_s23, %s31_s8  }
  0x6e   : > { %p4672_p10 = por %p6181_p6, %p38_p13  ;;  %p40_p5 = por %p39_p8, %p38_p13 }
  0x6f   : > { %s254_s17 = sand.u32 1, %s4442_s23   ;;  %s3807_s14 = sshll.u32 %s4446_s24, 8 }
  0x70   : > { %s3761_s19 = sshll.u32 %s254_s17, 4  ;;  %s4685_s7 = scalar_lea.hbm %s6093_s0, %s3807_s14 }
  0x71   : > { %s258_s12 = scalar_lea.vmem [#allocation2], %s3761_s19  ;;  %p4689_p11 = pnand %p4077_p3, %p40_p5 }
  0x72   : > { %s265_s10 = sshll.u32 %s258_s12, 4  ;;  %s4693_s8 = scalar_lea.sflag [#allocation3], %s254_s17  ;;  %s4687_s10 = int_to_ptr.vmem [resolvable:$true] %s265_s10 }
  0x73   : > { %s4342_s13 = scalar_lea.hbm %s4685_s7, 256  ;;  %p4344_p9 = pneg %p4689_p11 }
  0x74   : > { %p4343_p7 = scmp.ne.s32.totalorder %s4685_s7, %s4342_s13  ;;  %s4347_s20 = scalar_lea.hbm %s6093_s0, 512 }
  0x75   : > { %p4348_p1 = scmp.lt.u32.totalorder %s4685_s7, %s6093_s0  ;;  %p4349_p2 = scmp.lt.u32.totalorder %s4347_s20, %s4342_s13 }
  0x76   : > { %p4345_p12 = pnand %p4344_p9, %p4343_p7  ;;  %p4351_p4 = scmp.lt.u32.totalorder %s4342_s13, %s4685_s7 }
  0x77   : > { %p4350_p13 = por %p4349_p2, %p4348_p1 }
  0x78   : > { %p4346_p0 = pneg %p4345_p12 }
  0x79   : > { %p4352_p8 = por %p4351_p4, %p4350_p13 }
  0x7b   : > { %p4353_p6 = pnand %p4352_p8, %p4346_p0 }
  0x7d   : > { %4356 = shalt.err (!%p4353_p6)
}
  0x7e   : > { %s4357_s17 = scalar_lea.vmem %s4687_s10, 256  ;;  %s4454_s19 = smov [#allocation2]  }
  0x7f   : > { %p4358_p3 = scmp.ne.s32.totalorder %s4687_s10, %s4357_s17  ;;  %s4362_s14 = sshll.u32 %s4454_s19, 4  ;;  %s4363_s14 = int_to_ptr.vmem [resolvable:$false] %s4362_s14 }
  0x80   : > { %s4364_s26 = scalar_lea.vmem %s4363_s14, 512  ;;  %p4365_p12 = scmp.lt.s32.totalorder %s4687_s10, %s4363_s14 }
  0x81   : > { %p4360_p5 = pnand %p4358_p3, %p4344_p9  ;;  %p4366_p1 = scmp.lt.s32.totalorder %s4364_s26, %s4357_s17 }
  0x83   : > { %p4361_p7 = pneg %p4360_p5  ;;  %p4367_p2 = por %p4366_p1, %p4365_p12 }
  0x85   : > { %p4368_p13 = pnand %p4367_p2, %p4361_p7 }
  0x87   : > { %4371 = shalt.err (!%p4368_p13)
}
  0x88   : > { %4068 = dma.hbm_to_vmem [thread:$0]  (!%p4689_p11), %s4685_s7, 256, %s4687_s10, %s4693_s8, %s4451_s30, %s4451_s30, %s4452_s9  }
  0x89   : > { %p6184_p9 = scmp.ne.s32.totalorder %s6178_s29, 0 }
  0x8b   : > { %277 = sbr.rel (%p6184_p9) target bundleno = 3380 (0xd34), region = 44 }
  0x92   : > { %s4727_s13 = sand.u32 1, %s4438_s22   ;;  %p6185_p0 = scmp.ne.s32.totalorder %s6176_s27, 0 }
  0x93   : > { %s3765_s20 = sshll.u32 %s4727_s13, 4  ;;  %s280_s12 = scalar_lea.sflag [#allocation3], %s4727_s13 }
  0x94   : > { %s283_s11 = scalar_lea.vmem [#allocation2], %s3765_s20 }
  0x95   : > { %4417 = dma.done.wait (%p6185_p0), %s280_s12, 256  }
  0x96   : > { %4419 = vsyncadd (%p6185_p0), %s280_s12, 4294967040  ;;  %p6186_p11 = scmp.eq.s32.totalorder %s4522_s25, 0 }
  0x98   : > { %4421 = dma.done.wait (%p6186_p11), [#allocation6], 1024   ;;  %p6187_p4 = pmov %p6186_p11 }
  0x9a   : > { %4423 = vsyncadd (%p6187_p4), [#allocation6], 4294966272  ;;  %p6188_p8 = pmov %p6187_p4 }
  0x9b   : > { %p6189_p6 = pmov %p6187_p4 }
  0x9c   : > { %4425 = dma.done.wait (%p6188_p8), [#allocation9], 5120  }
  0x9d   : > { %4427 = vsyncadd (%p6189_p6), [#allocation9], 4294962176  ;;  %vm366_vm0 = vcmask 261120   ;;  %v362_v0 = vld [vmem:[#allocation5] sm:$0xff]  ;;  %v363_v1 = vld [vmem:[#allocation5 + $0x8] sm:$0xff]  ;;  %v535_v14 = vlaneseq  ;;  %vm741_vm1 = vcmask 130048  }
  0x9e   : > { %v364_v2 = vld [vmem:[#allocation5 + $0x10] sm:$0xff]  ;;  %v3960_v3 = vpack.c.bf16 %v363_v1, %v362_v0  ;;  %v365_v4 = vld [vmem:[#allocation5 + $0x18] sm:$0xff]  ;;  %v450_v7 = vld [vmem:[#allocation7] sm:$0xff]  ;;  %v4455_v20 = vmov 1966171168   ;;  %vm881_vm3 = vcmask 130112  }
  0x9f   : > { %v328_v5 = vld [vmem:[%s283_s11] sm:$0xff]  ;;  %v3964_v6 = vpack.c.bf16 %v365_v4, %v364_v2  ;;  %v451_v8 = vld [vmem:[#allocation7 + $0x8] sm:$0xff]  ;;  %v453_v11 = vld [vmem:[#allocation7 + $0x18] sm:$0xff]  ;;  %v536_v15 = vshrl.u32 %v535_v14, 7  ;;  %v871_v16 = vand.u32 127, %v535_v14  ;;  %v533_v21 = vunpack.c.l.s4 %v4455_v20  ;;  %s4456_s27 = smov 112  }
  0xa0   : > { %3871 = vmatprep.mubr.msk.f32.mxu1 %vm366_vm0, %v328_v5  ;;  %3961 = vmatprep.subr.bf16.mxu1 %v3960_v3  ;;  %v3968_v9 = vpack.c.bf16 %v451_v8, %v450_v7  ;;  %v452_v10 = vld [vmem:[#allocation7 + $0x10] sm:$0xff]  ;;  %v329_v12 = vld [vmem:[%s283_s11 + $0x8] sm:$0xff]  ;;  %v4786_v42 = vld [vmem:[#allocation8 + $0x80] sm:$0xff]  ;;  %vm1018_vm4 = vcmask 1041409   ;;  %vm1020_vm5 = vcmask 1042434   ;;  %vm1022_vm6 = vcmask 1043459  }
  0xa1   : > { %3963 = vmatpush3.bf16.msra.mxu1 %v3960_v3  ;;  %v3972_v13 = vpack.c.bf16 %v453_v11, %v452_v10  ;;  %v4749_v17 = vsub.s32 %v871_v16, %v536_v15  ;;  %v876_v18 = vadd.s32 4294967288, %v871_v16  ;;  %v534_v22 = vunpack.c.0.s8 %v533_v21  ;;  %v4784_v41 = vld [vmem:[#allocation8 + $0x88] sm:$0xff]  ;;  %v4788_v43 = vld [vmem:[#allocation8 + $0x98] sm:$0xff]  ;;  %vm4795_vm2 = vmpackc.low %vm741_vm1, %vm741_vm1  ;;  %s4457_s29 = smov 64   ;;  %s4458_s30 = smov 16  }
  0xa2   : > { %3965 = vmatprep.subr.bf16.mxu1 %v3964_v6  ;;  %v4769_v33 = vsub.s32 0, %v536_v15  ;;  %v4799_v47 = vld [vmem:[#allocation8] sm:$0xff]  ;;  %v4820_v58 = vld [vmem:[#allocation8 + $0xa8] sm:$0xff]  ;;  %v4841_v3 = vld [vmem:[#allocation8 + $0x90] sm:$0xff]  ;;  %vm1024_vm7 = vcmask 1044484   ;;  %vm1026_vm8 = vcmask 1045509  }
  0xa3   : > { %v4751_v19 = vsub.s32 %v876_v18, %v536_v15  ;;  %v4753_v23 = vsub.s32 %v534_v22, %v536_v15  ;;  %v4825_v60 = vld [vmem:[#allocation8 + $0x8] sm:$0xff]  ;;  %v4857_v10 = vld [vmem:[#allocation8 + $0x10] sm:$0xff]  ;;  %v4859_v11 = vld [vmem:[#allocation8 + $0xa0] sm:$0xff]  ;;  %vm1028_vm9 = vcmask 1046534   ;;  %vm1030_vm10 = vcmask 1047559   ;;  %s4459_s9 = smov 48  }
  0xa4   : > { %v4839_v2 = vld [vmem:[#allocation8 + $0xc8] sm:$0xff]  ;;  %v4870_v20 = vld [vmem:[#allocation8 + $0x18] sm:$0xff]  ;;  %v4872_v21 = vld [vmem:[#allocation8 + $0xc0] sm:$0xff]  ;;  %s4460_s7 = smov 96   ;;  %s4461_s10 = smov 32   ;;  %vm3527_vm11 = vcmask 392192  }
  0xa5   : > { %3967 = vmatpush3.bf16.msra.mxu1 %v3964_v6  ;;  %6197 = vst [vmem:[#allocation21_spill] sm:$0xff] %v4839_v2  ;;  %6199 = vst [vmem:[#allocation23_spill] sm:$0xff] %v4872_v21  ;;  %s4462_s8 = smov 80   ;;  %vm3545_vm12 = vcmask 523264   ;;  %s327_s17 = scalar_lea.vmem [#allocation11], %s3765_s20 }
  0xa6   : > { %3969 = vmatprep.subr.bf16.mxu1 %v3968_v9  ;;  %s3643_s19 = sshll.u32 %s327_s17, 4  ;;  %s3808_s12 = sshll.u32 %s4522_s25, 8  ;;  %s6044_s19 = int_to_ptr.vmem [resolvable:$true] %s3643_s19 }
  0xa7   : > { %s3630_s20 = scalar_lea.sflag [#allocation4], %s4727_s13  ;;  %s4463_s25 = smov [#allocation11]  }
  0xa8   : > { %3872 = vmatmul.mubr.msk.f32.vlgmr.msra.gmra.mrb[0].mxu1 %vm366_vm0, %v329_v12 }
  0xa9   : > { %3971 = vmatpush3.bf16.msra.mxu1 %v3968_v9  ;;  %3882 = vmatprep.mubr.msk.f32.mxu1 %vm366_vm0, %v328_v5 }
  0xaa   : > { %3973 = vmatprep.subr.bf16.mxu1 %v3972_v13 }
  0xad   : > { %3975 = vmatpush3.bf16.msra.mxu1 %v3972_v13 }
  0xb0   : > { %3883 = vmatmul.mubr.msk.f32.vlgmr.msra.gmra.mrb[2].mxu1 %vm366_vm0, %v329_v12 }
 0x17b   : > { %v3873_v24 = vpop.f32.mrb[0].mxu1 }
 0x17c   : > { %v4755_v25 = vmul.f32 0.25, %v3873_v24  ;;  %v439_v26 = vpop.f32.mrb[1].mxu1 }
 0x17d   : > { %v4757_v27 = vmul.f32 0.25, %v439_v26 }
 0x17e   : > { %v587_v28 = vrot.slane %v4755_v25, %v4753_v23  ;;  %v580_v34 = vcombine.high %v4755_v25, %v4755_v25 }
 0x17f   : > { %3889 = vmatprep.mubr.msk.f32.mxu0 %vm741_vm1, %v4757_v27  ;;  %v538_v30 = vrot.slane %v4757_v27, %v4753_v23  ;;  %v531_v4 = vcombine.high %v4757_v27, %v4757_v27 }
 0x180   : > { %v595_v29 = vcombine.high %v587_v28, %v587_v28  ;;  %v603_v31 = vrot.slane %v587_v28, %v4753_v23  ;;  %v4782_v40 = vrot.slane %v580_v34, %v4753_v23  ;;  %v4889_v34 = vld [vmem:[#allocation8 + $0x28] sm:$0xff] }
 0x181   : > { %v554_v36 = vrot.slane %v538_v30, %v4753_v23  ;;  %v546_v53 = vcombine.high %v538_v30, %v538_v30  ;;  %v4862_v12 = vrot.slane %v531_v4, %v4753_v23 }
 0x182   : > { %v4767_v32 = vrot.slane %v595_v29, %v4753_v23  ;;  %v4775_v38 = vrot.slane %v603_v31, %v4769_v33  ;;  %v625_v44 = vcombine.high %v603_v31, %v603_v31  ;;  %v4809_v52 = vrot.slane %v4782_v40, %v4753_v23 }
 0x183   : > { %v3884_v35 = vpop.f32.mrb[2].mxu1  ;;  %v4791_v45 = vrot.slane %v554_v36, %v4769_v33  ;;  %v4832_v62 = vrot.slane %v546_v53, %v4753_v23  ;;  %v576_v13 = vcombine.high %v554_v36, %v554_v36  ;;  %v4878_v24 = vrot.slane %v4862_v12, %v4753_v23  ;;  %v4907_v53 = vld [vmem:[#allocation8 + $0x48] sm:$0xff] }
 0x184   : > { %v520_v37 = vpop.f32.mrb[3].mxu1  ;;  %6190 = vst [vmem:[#allocation16_spill] sm:$0xff] %v4775_v38  ;;  %v4779_v39 = vrot.slane %v4767_v32, %v4769_v33  ;;  %v726_v48 = vmul.f32 %v4775_v38, %v4784_v41  ;;  %v725_v49 = vmul.f32 %v4775_v38, %v4786_v42  ;;  %v4812_v54 = vrot.slane %v625_v44, %v4769_v33 }
 0x185   : > { %6192 = vst [vmem:[#allocation18_spill] sm:$0xff] %v4791_v45  ;;  %v3976_v50 = vpack.c.bf16 %v3884_v35, %v520_v37  ;;  %v709_v57 = vmul.f32 %v4791_v45, %v4799_v47  ;;  %v4829_v61 = vrot.slane %v4809_v52, %v4769_v33  ;;  %v710_v1 = vmul.f32 %v4791_v45, %v4825_v60 }
 0x186   : > { %6191 = vst [vmem:[#allocation17_spill] sm:$0xff] %v4779_v39  ;;  %v728_v51 = vmul.f32 %v4779_v39, %v4788_v43  ;;  %6195 = vst [vmem:[#allocation19_spill] sm:$0xff] %v4812_v54  ;;  %v793_v55 = vsel %vm741_vm1, %v726_v48, 0.0  ;;  %v790_v56 = vsel %vm741_vm1, %v725_v49, 0.0  ;;  %v730_v0 = vmul.f32 %v4812_v54, %v4820_v58 }
 0x187   : > { %3978 = vmatprep.subr.msk.bf16.mxu0 %vm4795_vm2, %v3976_v50  ;;  %794 = vadd.xlane.f32.xlu1 %v793_v55  ;;  %6196 = vst [vmem:[#allocation20_spill] sm:$0xff] %v4829_v61  ;;  %v742_v63 = vsel %vm741_vm1, %v709_v57, 0.0  ;;  %v4847_v5 = vrot.slane %v4832_v62, %v4769_v33  ;;  %v734_v7 = vmul.f32 %v4829_v61, %v4839_v2  ;;  %v745_v8 = vsel %vm741_vm1, %v710_v1, 0.0  ;;  %v4925_v1 = vld [vmem:[#allocation8 + $0xb0] sm:$0xff] }
 0x188   : > { %791 = vadd.xlane.f32.xlu0 %v790_v56  ;;  %3981 = vmatpush3.bf16.xpose.msk.msra.mxu0 %vm4795_vm2, %v3976_v50  ;;  %v799_v59 = vsel %vm741_vm1, %v728_v51, 0.0  ;;  %v805_v6 = vsel %vm741_vm1, %v730_v0, 0.0  ;;  %v727_v9 = vmul.f32 %v4779_v39, %v4841_v3  ;;  %v729_v18 = vmul.f32 %v4812_v54, %v4859_v11  ;;  %v4923_v0 = vld [vmem:[#allocation8 + $0xb8] sm:$0xff] }
 0x189   : > { %6198 = vst [vmem:[#allocation22_spill] sm:$0xff] %v4847_v5  ;;  %v817_v14 = vsel %vm741_vm1, %v734_v7, 0.0  ;;  %v711_v15 = vmul.f32 %v4847_v5, %v4857_v10  ;;  %v4874_v22 = vpack.i.bf16 %v3884_v35, %v520_v37  ;;  %v4881_v26 = vrot.slane %v576_v13, %v4769_v33  ;;  %v4891_v35 = vld [vmem:[#allocation8 + $0x20] sm:$0xff] }
 0x18a   : > { %v796_v16 = vsel %vm741_vm1, %v727_v9, 0.0  ;;  %v712_v29 = vmul.f32 %v4847_v5, %v4870_v20  ;;  %v802_v30 = vsel %vm741_vm1, %v729_v18, 0.0  ;;  %v733_v31 = vmul.f32 %v4829_v61, %v4872_v21 }
 0x18b   : > { %800 = vadd.xlane.f32.xlu1 %v799_v59  ;;  %6200 = vst [vmem:[#allocation24_spill] sm:$0xff] %v4881_v26  ;;  %v748_v28 = vsel %vm741_vm1, %v711_v15, 0.0  ;;  %v596_v36 = vcombine.high %v4782_v40, %v4782_v40  ;;  %v627_v37 = vcombine.high %v4767_v32, %v4767_v32  ;;  %v4899_v44 = vrot.slane %v4878_v24, %v4769_v33  ;;  %v4909_v40 = vld [vmem:[#allocation8 + $0x40] sm:$0xff]  ;;  %v4941_v15 = vld [vmem:[#allocation8 + $0xd0] sm:$0xff] }
 0x18c   : > { %743 = vadd.xlane.f32.xlu0 %v742_v63  ;;  %v751_v48 = vsel %vm741_vm1, %v712_v29, 0.0  ;;  %v714_v49 = vmul.f32 %v4881_v26, %v4889_v34  ;;  %v814_v50 = vsel %vm741_vm1, %v733_v31, 0.0  ;;  %v713_v51 = vmul.f32 %v4881_v26, %v4891_v35  ;;  %6205 = vst [vmem:[#allocation29_spill] sm:$0xff] %v4941_v15 }
 0x18d   : > { %6201 = vst [vmem:[#allocation25_spill] sm:$0xff] %v4899_v44  ;;  %v4912_v32 = vrot.slane %v596_v36, %v4753_v23  ;;  %v4915_v55 = vrot.slane %v627_v37, %v4769_v33  ;;  %v718_v57 = vmul.f32 %v4899_v44, %v4907_v53  ;;  %v717_v63 = vmul.f32 %v4899_v44, %v4909_v40  ;;  %v4956_v36 = vld [vmem:[#allocation8 + $0xe8] sm:$0xff] }
 0x18e   : > { %v757_v56 = vsel %vm741_vm1, %v714_v49, 0.0  ;;  %v754_v59 = vsel %vm741_vm1, %v713_v51, 0.0  ;;  %v626_v4 = vcombine.high %v4809_v52, %v4809_v52  ;;  %v547_v52 = vcombine.high %v4862_v12, %v4862_v12  ;;  %6207 = vst [vmem:[#allocation31_spill] sm:$0xff] %v4956_v36  ;;  %v4958_v12 = vld [vmem:[#allocation8 + $0xe0] sm:$0xff] }
 0x18f   : > { %806 = vadd.xlane.f32.xlu1 %v805_v6  ;;  %3890 = vmatmul.mubr.msk.f32.vlgmr.msra.gmra.mrb[0].mxu0 %vm741_vm1, %v4755_v25  ;;  %6202 = vst [vmem:[#allocation26_spill] sm:$0xff] %v4915_v55  ;;  %v4931_v6 = vrot.slane %v4912_v32, %v4769_v33  ;;  %v769_v7 = vsel %vm741_vm1, %v718_v57, 0.0  ;;  %v766_v9 = vsel %vm741_vm1, %v717_v63, 0.0  ;;  %v731_v13 = vmul.f32 %v4915_v55, %v4925_v1  ;;  %v4972_v57 = vld [vmem:[#allocation8 + $0x30] sm:$0xff] }
 0x190   : > { %746 = vadd.xlane.f32.xlu0 %v745_v8  ;;  %v732_v8 = vmul.f32 %v4915_v55, %v4923_v0  ;;  %v578_v18 = vcombine.high %v4832_v62, %v4832_v62  ;;  %6208 = vst [vmem:[#allocation32_spill] sm:$0xff] %v4958_v12  ;;  %v575_v37 = vrot.slane %v547_v52, %v4753_v23 }
 0x191   : > { %6203 = vst [vmem:[#allocation27_spill] sm:$0xff] %v4931_v6  ;;  %v735_v31 = vmul.f32 %v4931_v6, %v4941_v15  ;;  %v577_v23 = vcombine.high %v4878_v24, %v4878_v24 }
 0x192   : > { %v4962_v62 = vrot.slane %v578_v18, %v4769_v33  ;;  %v579_v24 = vcombine.high %v575_v37, %v575_v37 }
 0x193   : > { %818 = vadd.xlane.f32.xlu1 %v817_v14  ;;  %v4939_v14 = vld [vmem:[#allocation8 + $0xd8] sm:$0xff]  ;;  %v4990_v52 = vrot.slane %v577_v23, %v4769_v33 }
 0x194   : > { %797 = vadd.xlane.f32.xlu0 %v796_v16  ;;  %6204 = vst [vmem:[#allocation28_spill] sm:$0xff] %v4939_v14  ;;  %v4946_v16 = vrot.slane %v626_v4, %v4769_v33  ;;  %v736_v29 = vmul.f32 %v4931_v6, %v4939_v14  ;;  %6209 = vst [vmem:[#allocation33_spill] sm:$0xff] %v4962_v62 }
 0x195   : > { %6213 = vst [vmem:[#allocation37_spill] sm:$0xff] %v4990_v52 }
 0x196   : > { %6206 = vst [vmem:[#allocation30_spill] sm:$0xff] %v4946_v16  ;;  %v738_v49 = vmul.f32 %v4946_v16, %v4956_v36  ;;  %v737_v51 = vmul.f32 %v4946_v16, %v4958_v12 }
 0x197   : > { %749 = vadd.xlane.f32.xlu1 %v748_v28  ;;  %v811_v28 = vsel %vm741_vm1, %v732_v8, 0.0  ;;  %v715_v8 = vmul.f32 %v4962_v62, %v4972_v57 }
 0x198   : > { %803 = vadd.xlane.f32.xlu0 %v802_v30  ;;  %v808_v30 = vsel %vm741_vm1, %v731_v13, 0.0  ;;  %v829_v63 = vsel %vm741_vm1, %v738_v49, 0.0  ;;  %v4987_v13 = vld [vmem:[#allocation8 + $0x50] sm:$0xff]  ;;  %v5005_v49 = vrot.slane %v579_v24, %v4769_v33 }
 0x199   : > { %6212 = vst [vmem:[#allocation36_spill] sm:$0xff] %v4987_v13 }
 0x19a   : > { %6216 = vst [vmem:[#allocation40_spill] sm:$0xff] %v5005_v49 }
 0x19b   : > { %752 = vadd.xlane.f32.xlu1 %v751_v48  ;;  %v823_v48 = vsel %vm741_vm1, %v736_v29, 0.0  ;;  %v760_v29 = vsel %vm741_vm1, %v715_v8, 0.0 }
 0x19c   : > { %815 = vadd.xlane.f32.xlu0 %v814_v50  ;;  %v820_v50 = vsel %vm741_vm1, %v735_v31, 0.0  ;;  %v4998_v31 = vld [vmem:[#allocation8 + $0x68] sm:$0xff] }
 0x19d   : > { %6214 = vst [vmem:[#allocation38_spill] sm:$0xff] %v4998_v31 }
 0x19f   : > { %758 = vadd.xlane.f32.xlu1 %v757_v56  ;;  %v4970_v56 = vld [vmem:[#allocation8 + $0x38] sm:$0xff] }
 0x1a0   : > { %755 = vadd.xlane.f32.xlu0 %v754_v59  ;;  %v4977_v59 = vrot.slane %v575_v37, %v4769_v33  ;;  %v716_v4 = vmul.f32 %v4962_v62, %v4970_v56  ;;  %v628_v37 = vcombine.high %v4912_v32, %v4912_v32 }
 0x1a2   : > { %6210 = vst [vmem:[#allocation34_spill] sm:$0xff] %v4977_v59  ;;  %v763_v18 = vsel %vm741_vm1, %v716_v4, 0.0  ;;  %v5013_v4 = vld [vmem:[#allocation8 + $0x78] sm:$0xff]  ;;  %v5018_v32 = vrot.slane %v628_v37, %v4769_v33 }
 0x1a3   : > { %770 = vadd.xlane.f32.xlu1 %v769_v7  ;;  %v826_v7 = vsel %vm741_vm1, %v737_v51, 0.0  ;;  %v722_v51 = vmul.f32 %v4990_v52, %v4998_v31  ;;  %6217 = vst [vmem:[#allocation41_spill] sm:$0xff] %v5013_v4  ;;  %v724_v24 = vmul.f32 %v5005_v49, %v5013_v4 }
 0x1a4   : > { %767 = vadd.xlane.f32.xlu0 %v766_v9  ;;  %v4985_v9 = vld [vmem:[#allocation8 + $0x58] sm:$0xff]  ;;  %6219 = vst [vmem:[#allocation43_spill] sm:$0xff] %v5018_v32 }
 0x1a5   : > { %6211 = vst [vmem:[#allocation35_spill] sm:$0xff] %v4985_v9  ;;  %v781_v8 = vsel %vm741_vm1, %v722_v51, 0.0 }
 0x1a7   : > { %812 = vadd.xlane.f32.xlu1 %v811_v28  ;;  %v720_v28 = vmul.f32 %v4977_v59, %v4985_v9 }
 0x1a8   : > { %809 = vadd.xlane.f32.xlu0 %v808_v30  ;;  %v719_v30 = vmul.f32 %v4977_v59, %v4987_v13 }
 0x1aa   : > { %v772_v23 = vsel %vm741_vm1, %v719_v30, 0.0  ;;  %v5028_v30 = vld [vmem:[#allocation8 + $0xf0] sm:$0xff] }
 0x1ab   : > { %824 = vadd.xlane.f32.xlu1 %v823_v48  ;;  %v5000_v48 = vld [vmem:[#allocation8 + $0x60] sm:$0xff]  ;;  %6221 = vst [vmem:[#allocation45_spill] sm:$0xff] %v5028_v30  ;;  %v739_v51 = vmul.f32 %v5018_v32, %v5028_v30 }
 0x1ac   : > { %821 = vadd.xlane.f32.xlu0 %v820_v50  ;;  %6215 = vst [vmem:[#allocation39_spill] sm:$0xff] %v5000_v48  ;;  %v775_v50 = vsel %vm741_vm1, %v720_v28, 0.0 }
 0x1af   : > { %830 = vadd.xlane.f32.xlu1 %v829_v63  ;;  %v721_v63 = vmul.f32 %v4990_v52, %v5000_v48 }
 0x1b0   : > { %827 = vadd.xlane.f32.xlu0 %v826_v7  ;;  %v5015_v7 = vld [vmem:[#allocation8 + $0x70] sm:$0xff] }
 0x1b1   : > { %6218 = vst [vmem:[#allocation42_spill] sm:$0xff] %v5015_v7  ;;  %v723_v28 = vmul.f32 %v5005_v49, %v5015_v7 }
 0x1b3   : > { %764 = vadd.xlane.f32.xlu1 %v763_v18  ;;  %v778_v18 = vsel %vm741_vm1, %v721_v63, 0.0  ;;  %v784_v37 = vsel %vm741_vm1, %v723_v28, 0.0  ;;  %v832_v63 = vsel %vm741_vm1, %v739_v51, 0.0 }
 0x1b4   : > { %761 = vadd.xlane.f32.xlu0 %v760_v29  ;;  %v5026_v29 = vld [vmem:[#allocation8 + $0xf8] sm:$0xff] }
 0x1b5   : > { %6220 = vst [vmem:[#allocation44_spill] sm:$0xff] %v5026_v29  ;;  %v740_v33 = vmul.f32 %v5018_v32, %v5026_v29 }
 0x1b7   : > { %776 = vadd.xlane.f32.xlu1 %v775_v50  ;;  %v787_v50 = vsel %vm741_vm1, %v724_v24, 0.0 }
 0x1b8   : > { %773 = vadd.xlane.f32.xlu0 %v772_v23  ;;  %v835_v23 = vsel %vm741_vm1, %v740_v33, 0.0 }
 0x1bb   : > { %782 = vadd.xlane.f32.xlu1 %v781_v8 }
 0x1bc   : > { %779 = vadd.xlane.f32.xlu0 %v778_v18 }
 0x1bf   : > { %788 = vadd.xlane.f32.xlu1 %v787_v50 }
 0x1c0   : > { %785 = vadd.xlane.f32.xlu0 %v784_v37 }
 0x1c3   : > { %836 = vadd.xlane.f32.xlu1 %v835_v23 }
 0x1c4   : > { %833 = vadd.xlane.f32.xlu0 %v832_v63 }
 0x214   : > { %v795_v8 = vpop.xlane.xlu1 %794 }
 0x215   : > { %v792_v18 = vpop.xlane.xlu0 %791  ;;  %v953_v12 = vrot.slane %v795_v8, %v4751_v19 }
 0x216   : > { %v949_v4 = vrot.slane %v792_v18, %v4749_v17 }
 0x218   : > { %v801_v16 = vpop.xlane.xlu1 %800 }
 0x219   : > { %v744_v24 = vpop.xlane.xlu0 %743  ;;  %v962_v14 = vrot.slane %v801_v16, %v4751_v19 }
 0x21c   : > { %v807_v49 = vpop.xlane.xlu1 %806 }
 0x21d   : > { %v747_v6 = vpop.xlane.xlu0 %746  ;;  %v971_v31 = vrot.slane %v807_v49, %v4751_v19  ;;  %v875_v49 = vrot.slane %v744_v24, %v4749_v17 }
 0x21e   : > { %v880_v21 = vrot.slane %v747_v6, %v4751_v19 }
 0x220   : > { %v5038_v52 = vpop.xlane.xlu1 %818 }
 0x221   : > { %v798_v50 = vpop.xlane.xlu0 %797 }
 0x222   : > { %v958_v36 = vrot.slane %v798_v50, %v4749_v17 }
 0x224   : > { %v750_v28 = vpop.xlane.xlu1 %749  ;;  %v963_v50 = vsel %vm881_vm3, %v962_v14, %v958_v36 }
 0x225   : > { %v804_v61 = vpop.xlane.xlu0 %803  ;;  %v886_v8 = vrot.slane %v750_v28, %v4749_v17 }
 0x226   : > { %v967_v7 = vrot.slane %v804_v61, %v4749_v17  ;;  %v954_v61 = vsel %vm881_vm3, %v953_v12, %v949_v4  ;;  %v989_v4 = vrot.slane %v5038_v52, %v4751_v19 }
 0x227   : > { %v1032_v14 = vsel %vm1018_vm4, %v963_v50, %v954_v61 }
 0x228   : > { %v753_v59 = vpop.xlane.xlu1 %752  ;;  %v972_v18 = vsel %vm881_vm3, %v971_v31, %v967_v7  ;;  %v882_v31 = vsel %vm881_vm3, %v880_v21, %v875_v49 }
 0x229   : > { %v5040_v32 = vpop.xlane.xlu0 %815  ;;  %v890_v15 = vrot.slane %v753_v59, %v4751_v19  ;;  %v1033_v7 = vsel %vm1020_vm5, %v972_v18, %v1032_v14 }
 0x22b   : > { %v891_v9 = vsel %vm881_vm3, %v890_v15, %v886_v8  ;;  %v985_v15 = vrot.slane %v5040_v32, %v4749_v17 }
 0x22c   : > { %v759_v37 = vpop.xlane.xlu1 %758  ;;  %v1019_v24 = vsel %vm1018_vm4, %v891_v9, %v882_v31 }
 0x22d   : > { %v756_v33 = vpop.xlane.xlu0 %755  ;;  %v899_v59 = vrot.slane %v759_v37, %v4751_v19 }
 0x22e   : > { %v895_v16 = vrot.slane %v756_v33, %v4749_v17 }
 0x230   : > { %v5042_v23 = vpop.xlane.xlu1 %770 }
 0x231   : > { %v5044_v51 = vpop.xlane.xlu0 %767 }
 0x234   : > { %v813_v63 = vpop.xlane.xlu1 %812 }
 0x235   : > { %v810_v55 = vpop.xlane.xlu0 %809  ;;  %v980_v13 = vrot.slane %v813_v63, %v4751_v19 }
 0x236   : > { %v976_v6 = vrot.slane %v810_v55, %v4749_v17  ;;  %v900_v55 = vsel %vm881_vm3, %v899_v59, %v895_v16 }
 0x238   : > { %v5046_v44 = vpop.xlane.xlu1 %824  ;;  %v981_v37 = vsel %vm881_vm3, %v980_v13, %v976_v6 }
 0x239   : > { %v5048_v54 = vpop.xlane.xlu0 %821  ;;  %v998_v52 = vrot.slane %v5046_v44, %v4751_v19  ;;  %v1034_v50 = vsel %vm1022_vm6, %v981_v37, %v1033_v7 }
 0x23a   : > { %v994_v32 = vrot.slane %v5048_v54, %v4749_v17 }
 0x23c   : > { %v5050_v62 = vpop.xlane.xlu1 %830 }
 0x23d   : > { %v5052_v39 = vpop.xlane.xlu0 %827  ;;  %v1007_v9 = vrot.slane %v5050_v62, %v4751_v19 }
 0x23e   : > { %v1003_v33 = vrot.slane %v5052_v39, %v4749_v17  ;;  %v1021_v39 = vsel %vm1020_vm5, %v900_v55, %v1019_v24 }
 0x240   : > { %v765_v38 = vpop.xlane.xlu1 %764  ;;  %v1008_v18 = vsel %vm881_vm3, %v1007_v9, %v1003_v33 }
 0x241   : > { %v762_v26 = vpop.xlane.xlu0 %761  ;;  %v908_v36 = vrot.slane %v765_v38, %v4751_v19  ;;  %v917_v38 = vrot.slane %v5042_v23, %v4751_v19 }
 0x242   : > { %v904_v12 = vrot.slane %v762_v26, %v4749_v17  ;;  %v913_v26 = vrot.slane %v5044_v51, %v4749_v17 }
 0x244   : > { %v5054_v5 = vpop.xlane.xlu1 %776  ;;  %v909_v23 = vsel %vm881_vm3, %v908_v36, %v904_v12  ;;  %v918_v16 = vsel %vm881_vm3, %v917_v38, %v913_v26 }
 0x245   : > { %v5056_v29 = vpop.xlane.xlu0 %773  ;;  %v926_v51 = vrot.slane %v5054_v5, %v4751_v19  ;;  %v1023_v61 = vsel %vm1022_vm6, %v909_v23, %v1021_v39 }
 0x246   : > { %v922_v13 = vrot.slane %v5056_v29, %v4749_v17  ;;  %v999_v29 = vsel %vm881_vm3, %v998_v52, %v994_v32  ;;  %v1025_v14 = vsel %vm1024_vm7, %v918_v16, %v1023_v61  ;;  %v6237_v61 = vld [vmem:[#allocation22_spill] sm:$0xff] }
 0x248   : > { %v5058_v45 = vpop.xlane.xlu1 %782 }
 0x249   : > { %v5060_v30 = vpop.xlane.xlu0 %779  ;;  %v935_v44 = vrot.slane %v5058_v45, %v4751_v19  ;;  %v990_v45 = vsel %vm881_vm3, %v989_v4, %v985_v15 }
 0x24a   : > { %v931_v54 = vrot.slane %v5060_v30, %v4749_v17  ;;  %v927_v30 = vsel %vm881_vm3, %v926_v51, %v922_v13 }
 0x24b   : > { %v1027_v12 = vsel %vm1026_vm8, %v927_v30, %v1025_v14 }
 0x24c   : > { %v789_v48 = vpop.xlane.xlu1 %788 }
 0x24d   : > { %v786_v2 = vpop.xlane.xlu0 %785  ;;  %v944_v8 = vrot.slane %v789_v48, %v4751_v19  ;;  %v1035_v48 = vsel %vm1024_vm7, %v990_v45, %v1034_v50 }
 0x24e   : > { %v940_v5 = vrot.slane %v786_v2, %v4749_v17  ;;  %v936_v2 = vsel %vm881_vm3, %v935_v44, %v931_v54  ;;  %v1036_v49 = vsel %vm1026_vm8, %v999_v29, %v1035_v48 }
 0x24f   : > { %v1037_v36 = vsel %vm1028_vm9, %v1008_v18, %v1036_v49  ;;  %v1029_v7 = vsel %vm1028_vm9, %v936_v2, %v1027_v12 }
 0x250   : > { %v837_v28 = vpop.xlane.xlu1 %836  ;;  %v945_v6 = vsel %vm881_vm3, %v944_v8, %v940_v5  ;;  %v6236_v5 = vld [vmem:[#allocation44_spill] sm:$0xff] }
 0x251   : > { %v834_v21 = vpop.xlane.xlu0 %833  ;;  %v1016_v63 = vrot.slane %v837_v28, %v4751_v19  ;;  %v1031_v24 = vsel %vm1030_vm10, %v945_v6, %v1029_v7  ;;  %v6238_v6 = vld [vmem:[#allocation24_spill] sm:$0xff] }
 0x252   : > { %v1012_v62 = vrot.slane %v834_v21, %v4749_v17 }
 0x254   : > { %v1017_v59 = vsel %vm881_vm3, %v1016_v63, %v1012_v62 }
 0x255   : > { %v1038_v31 = vsel %vm1030_vm10, %v1017_v59, %v1037_v36 }
 0x262   : > { %v3891_v4 = vpop.f32.mrb[0].mxu0 }
 0x263   : > { %v1123_v15 = vadd.f32 %v3891_v4, %v1038_v31  ;;  %v1117_v55 = vpop.f32.mrb[1].mxu0  ;;  %v6239_v4 = vld [vmem:[#allocation16_spill] sm:$0xff] }
 0x264   : > { %v1118_v38 = vadd.f32 %v1117_v55, %v1031_v24 }
 0x265   : > { %v1129_v26 = vsel %vm741_vm1, %v1123_v15, -inf }
 0x266   : > { %1130 = vmax.xlane.f32.xlu1 %v1129_v26  ;;  %v1126_v28 = vsel %vm741_vm1, %v1118_v38, -inf }
 0x267   : > { %1127 = vmax.xlane.f32.xlu0 %v1126_v28 }
 0x277   : > { %4137 = vrot.lane.b32.xlu1 %v4874_v22, %s4456_s27 }
 0x27b   : > { %1619 = vrot.lane.b32.xlu1 %v4757_v27, %s4456_s27 }
 0x27d   : > { %4132 = vrot.lane.b32.xlu0 %v4874_v22, %s4457_s29  ;;  %s6049_s29 = scalar_lea.hbm %s6099_s6, %s3808_s12 }
 0x27f   : > { %1621 = vrot.lane.b32.xlu1 %v4755_v25, %s4456_s27 }
 0x281   : > { %1267 = vrot.lane.b32.xlu0 %v4799_v47, %s4458_s30 }
 0x285   : > { %1271 = vrot.lane.b32.xlu0 %v4857_v10, %s4458_s30 }
 0x2f3   : > { %v1131_v21 = vpop.xlane.xlu1 %1130 }
 0x2f4   : > { %v1133_v37 = vsub.f32 %v1123_v15, %v1131_v21  ;;  %v1128_v52 = vpop.xlane.xlu0 %1127  ;;  %v6240_v21 = vld [vmem:[#allocation17_spill] sm:$0xff] }
 0x2f5   : > { %v1132_v32 = vsub.f32 %v1118_v38, %v1128_v52 }
 0x2f6   : > { %v1136_v9 = vmul.f32 1.442695, %v1133_v37 }
 0x2f7   : > { %v1134_v33 = vmul.f32 1.442695, %v1132_v32  ;;  %v4138_v23 = vpop.permute.xlu1 %4137 }
 0x2f8   : > { %4166 = vpow2.f32 %v1136_v9  ;;  %v4140_v51 = vunpack.i.h.bf16 %v4138_v23  ;;  %v4133_v13 = vpop.permute.xlu0 %4132  ;;  %v4139_v44 = vunpack.i.l.bf16 %v4138_v23  ;;  %v6241_v23 = vld [vmem:[#allocation33_spill] sm:$0xff] }
 0x2f9   : > { %4168 = vpow2.f32 %v1134_v33  ;;  %v4135_v54 = vunpack.i.h.bf16 %v4133_v13  ;;  %v4134_v63 = vunpack.i.l.bf16 %v4133_v13 }
 0x2fa   : > { %v5149_v39 = vpack.c.bf16 %v4140_v51, %v4139_v44 }
 0x2fb   : > { %v3982_v62 = vpack.c.bf16 %v4135_v54, %v4134_v63  ;;  %v1620_v30 = vpop.permute.xlu1 %1619  ;;  %v6242_v63 = vld [vmem:[#allocation19_spill] sm:$0xff] }
 0x2fd   : > { %3983 = vmatprep.subr.bf16.mxu1 %v3982_v62 }
 0x2fe   : > { %3985 = vmatpush3.bf16.msra.mxu1 %v3982_v62 }
 0x2ff   : > { %3988 = vmatprep.subr.msk.bf16.mxu1 %vm4795_vm2, %v5149_v39  ;;  %v1622_v18 = vpop.permute.xlu1 %1621 }
 0x302   : > { %v5154_v47 = vpop.eup %4166 }
 0x303   : > { %v5156_v10 = vpop.eup %4168  ;;  %v1141_v50 = vsel %vm741_vm1, %v5154_v47, 0.0 }
 0x304   : > { %1142 = vadd.xlane.f32.xlu1 %v1141_v50  ;;  %v1138_v8 = vsel %vm741_vm1, %v5156_v10, 0.0  ;;  %v6243_v50 = vld [vmem:[#allocation25_spill] sm:$0xff] }
 0x305   : > { %1139 = vadd.xlane.f32.xlu0 %v1138_v8 }
 0x315   : > { %1269 = vrot.lane.b32.xlu1 %v4825_v60, %s4458_s30  ;;  %v6226_v60 = vld [vmem:[#allocation39_spill] sm:$0xff] }
 0x319   : > { %1273 = vrot.lane.b32.xlu1 %v4870_v20, %s4458_s30  ;;  %v6229_v20 = vld [vmem:[#allocation28_spill] sm:$0xff] }
 0x31b   : > { %1275 = vrot.lane.b32.xlu0 %v4891_v35, %s4458_s30  ;;  %v6231_v35 = vld [vmem:[#allocation41_spill] sm:$0xff] }
 0x31d   : > { %1277 = vrot.lane.b32.xlu1 %v4889_v34, %s4458_s30  ;;  %v6230_v34 = vld [vmem:[#allocation42_spill] sm:$0xff] }
 0x31f   : > { %1299 = vrot.lane.b32.xlu0 %v4786_v42, %s4458_s30  ;;  %v6223_v42 = vld [vmem:[#allocation35_spill] sm:$0xff] }
 0x321   : > { %1301 = vrot.lane.b32.xlu1 %v4784_v41, %s4458_s30  ;;  %v6222_v41 = vld [vmem:[#allocation36_spill] sm:$0xff] }
 0x323   : > { %1303 = vrot.lane.b32.xlu0 %v4841_v3, %s4458_s30  ;;  %v6227_v3 = vld [vmem:[#allocation38_spill] sm:$0xff] }
 0x325   : > { %1305 = vrot.lane.b32.xlu1 %v4788_v43, %s4458_s30  ;;  %v6224_v43 = vld [vmem:[#allocation23_spill] sm:$0xff] }
 0x327   : > { %1279 = vrot.lane.b32.xlu0 %v4972_v57, %s4458_s30 }
 0x329   : > { %1281 = vrot.lane.b32.xlu1 %v4970_v56, %s4458_s30  ;;  %v6235_v56 = vld [vmem:[#allocation18_spill] sm:$0xff] }
 0x32b   : > { %1307 = vrot.lane.b32.xlu0 %v4859_v11, %s4458_s30  ;;  %v6228_v11 = vld [vmem:[#allocation29_spill] sm:$0xff] }
 0x32d   : > { %1309 = vrot.lane.b32.xlu1 %v4820_v58, %s4458_s30  ;;  %v6225_v58 = vld [vmem:[#allocation21_spill] sm:$0xff] }
 0x32f   : > { %1283 = vrot.lane.b32.xlu0 %v4909_v40, %s4458_s30  ;;  %v1268_v40 = vpop.permute.xlu0 %1267 }
 0x330   : > { %v1363_v57 = vmul.f32 %v1268_v40, %v6235_v56 }
 0x331   : > { %1285 = vrot.lane.b32.xlu1 %v4907_v53, %s4458_s30  ;;  %v6232_v53 = vld [vmem:[#allocation32_spill] sm:$0xff] }
 0x333   : > { %1311 = vrot.lane.b32.xlu0 %v4925_v1, %s4458_s30  ;;  %v6234_v1 = vld [vmem:[#allocation45_spill] sm:$0xff]  ;;  %v1272_v29 = vpop.permute.xlu0 %1271 }
 0x334   : > { %v1365_v45 = vmul.f32 %v1272_v29, %v6237_v61 }
 0x335   : > { %1313 = vrot.lane.b32.xlu1 %v4923_v0, %s4458_s30  ;;  %v6233_v0 = vld [vmem:[#allocation31_spill] sm:$0xff] }
 0x337   : > { %1287 = vrot.lane.b32.xlu0 %v6222_v41, %s4458_s30 }
 0x339   : > { %1289 = vrot.lane.b32.xlu1 %v6223_v42, %s4458_s30 }
 0x33b   : > { %1315 = vrot.lane.b32.xlu0 %v6224_v43, %s4458_s30 }
 0x33d   : > { %1317 = vrot.lane.b32.xlu1 %v6225_v58, %s4458_s30  ;;  %v6244_v58 = vld [vmem:[#allocation26_spill] sm:$0xff] }
 0x33f   : > { %1291 = vrot.lane.b32.xlu0 %v6226_v60, %s4458_s30 }
 0x341   : > { %1293 = vrot.lane.b32.xlu1 %v6227_v3, %s4458_s30 }
 0x343   : > { %1319 = vrot.lane.b32.xlu0 %v6228_v11, %s4458_s30 }
 0x345   : > { %1321 = vrot.lane.b32.xlu1 %v6229_v20, %s4458_s30 }
 0x347   : > { %1295 = vrot.lane.b32.xlu0 %v6230_v34, %s4458_s30  ;;  %v6245_v34 = vld [vmem:[#allocation34_spill] sm:$0xff] }
 0x349   : > { %1297 = vrot.lane.b32.xlu1 %v6231_v35, %s4458_s30 }
 0x34b   : > { %1323 = vrot.lane.b32.xlu0 %v6232_v53, %s4458_s30 }
 0x34d   : > { %1325 = vrot.lane.b32.xlu1 %v6233_v0, %s4458_s30 }
 0x34f   : > { %1327 = vrot.lane.b32.xlu0 %v6234_v1, %s4458_s30  ;;  %v6246_v1 = vld [vmem:[#allocation20_spill] sm:$0xff] }
 0x351   : > { %1329 = vrot.lane.b32.xlu1 %v6236_v5, %s4458_s30 }
 0x353   : > { %1427 = vrot.lane.b32.xlu0 %v1363_v57, %s4456_s27 }
 0x357   : > { %1431 = vrot.lane.b32.xlu0 %v1365_v45, %s4456_s27 }
 0x391   : > { %v1143_v16 = vpop.xlane.xlu1 %1142 }
 0x392   : > { %4170 = vrcp.f32 %v1143_v16  ;;  %v1140_v59 = vpop.xlane.xlu0 %1139 }
 0x393   : > { %4172 = vrcp.f32 %v1140_v59 }
 0x395   : > { %v1270_v48 = vpop.permute.xlu1 %1269 }
 0x396   : > { %v1364_v2 = vmul.f32 %v1270_v48, %v6235_v56  ;;  %v1276_v49 = vpop.permute.xlu0 %1275 }
 0x397   : > { %v1367_v14 = vmul.f32 %v1276_v49, %v6238_v6 }
 0x398   : > { %1429 = vrot.lane.b32.xlu1 %v1364_v2, %s4456_s27  ;;  %v6248_v2 = vld [vmem:[#allocation27_spill] sm:$0xff] }
 0x399   : > { %v1274_v36 = vpop.permute.xlu1 %1273  ;;  %1435 = vrot.lane.b32.xlu0 %v1367_v14, %s4456_s27 }
 0x39a   : > { %v1366_v12 = vmul.f32 %v1274_v36, %v6237_v61  ;;  %v1300_v31 = vpop.permute.xlu0 %1299 }
 0x39b   : > { %v1379_v7 = vmul.f32 %v1300_v31, %v6239_v4  ;;  %v6249_v31 = vld [vmem:[#allocation40_spill] sm:$0xff] }
 0x39c   : > { %v4171_v15 = vpop.eup %4170  ;;  %1433 = vrot.lane.b32.xlu1 %v1366_v12, %s4456_s27 }
 0x39d   : > { %v4173_v24 = vpop.eup %4172  ;;  %v1278_v55 = vpop.permute.xlu1 %1277  ;;  %1459 = vrot.lane.b32.xlu0 %v1379_v7, %s4456_s27  ;;  %v1147_v52 = vmul.f32 %v4171_v15, %v5154_v47 }
 0x39e   : > { %v1368_v38 = vmul.f32 %v1278_v55, %v6238_v6  ;;  %v1304_v26 = vpop.permute.xlu0 %1303  ;;  %v1146_v28 = vmul.f32 %v4173_v24, %v5156_v10 }
 0x39f   : > { %v1381_v37 = vmul.f32 %v1304_v26, %v6240_v21 }
 0x3a0   : > { %1437 = vrot.lane.b32.xlu1 %v1368_v38, %s4456_s27  ;;  %3896 = vmatprep.mubr.msk.f32.mxu1 %vm741_vm1, %v1146_v28  ;;  %v6250_v38 = vld [vmem:[#allocation30_spill] sm:$0xff] }
 0x3a1   : > { %v1302_v32 = vpop.permute.xlu1 %1301  ;;  %1463 = vrot.lane.b32.xlu0 %v1381_v37, %s4456_s27  ;;  %3897 = vmatmul.mubr.msk.f32.vlgmr.msra.gmra.mrb[4].mxu1 %vm741_vm1, %v1147_v52 }
 0x3a2   : > { %v1380_v9 = vmul.f32 %v1302_v32, %v6239_v4  ;;  %3991 = vmatpush3.bf16.xpose.msk.msra.mxu1 %vm4795_vm2, %v5149_v39  ;;  %v1280_v33 = vpop.permute.xlu0 %1279  ;;  %3903 = vmatprep.mubr.msk.f32.mxu1 %vm741_vm1, %v1620_v30  ;;  %v6247_v30 = vld [vmem:[#allocation37_spill] sm:$0xff]  ;;  %v6251_v32 = vld [vmem:[#allocation43_spill] sm:$0xff] }
 0x3a3   : > { %v1369_v51 = vmul.f32 %v1280_v33, %v6241_v23 }
 0x3a4   : > { %1461 = vrot.lane.b32.xlu1 %v1380_v9, %s4456_s27 }
 0x3a5   : > { %v1306_v13 = vpop.permute.xlu1 %1305  ;;  %1439 = vrot.lane.b32.xlu0 %v1369_v51, %s4456_s27 }
 0x3a6   : > { %v1382_v44 = vmul.f32 %v1306_v13, %v6240_v21  ;;  %v1308_v54 = vpop.permute.xlu0 %1307 }
 0x3a7   : > { %v1383_v62 = vmul.f32 %v1308_v54, %v6242_v63 }
 0x3a8   : > { %1465 = vrot.lane.b32.xlu1 %v1382_v44, %s4456_s27 }
 0x3a9   : > { %3904 = vmatmul.mubr.msk.f32.vlgmr.msra.gmra.mrb[6].mxu1 %vm741_vm1, %v1622_v18  ;;  %v1282_v39 = vpop.permute.xlu1 %1281  ;;  %1467 = vrot.lane.b32.xlu0 %v1383_v62, %s4456_s27 }
 0x3aa   : > { %v1370_v47 = vmul.f32 %v1282_v39, %v6241_v23  ;;  %v1284_v10 = vpop.permute.xlu0 %1283 }
 0x3ab   : > { %v1371_v8 = vmul.f32 %v1284_v10, %v6243_v50 }
 0x3ac   : > { %1441 = vrot.lane.b32.xlu1 %v1370_v47, %s4456_s27 }
 0x3ad   : > { %v1310_v41 = vpop.permute.xlu1 %1309  ;;  %1443 = vrot.lane.b32.xlu0 %v1371_v8, %s4456_s27 }
 0x3ae   : > { %v1384_v42 = vmul.f32 %v1310_v41, %v6242_v63  ;;  %v1312_v43 = vpop.permute.xlu0 %1311 }
 0x3af   : > { %v1385_v60 = vmul.f32 %v1312_v43, %v6244_v58 }
 0x3b0   : > { %1469 = vrot.lane.b32.xlu1 %v1384_v42, %s4456_s27 }
 0x3b1   : > { %v1286_v3 = vpop.permute.xlu1 %1285  ;;  %1471 = vrot.lane.b32.xlu0 %v1385_v60, %s4456_s27 }
 0x3b2   : > { %v1372_v11 = vmul.f32 %v1286_v3, %v6243_v50  ;;  %v1288_v20 = vpop.permute.xlu0 %1287 }
 0x3b3   : > { %v1373_v35 = vmul.f32 %v1288_v20, %v6245_v34 }
 0x3b4   : > { %1445 = vrot.lane.b32.xlu1 %v1372_v11, %s4456_s27 }
 0x3b5   : > { %v1314_v53 = vpop.permute.xlu1 %1313  ;;  %1447 = vrot.lane.b32.xlu0 %v1373_v35, %s4456_s27 }
 0x3b6   : > { %v1386_v40 = vmul.f32 %v1314_v53, %v6244_v58  ;;  %v1316_v0 = vpop.permute.xlu0 %1315 }
 0x3b7   : > { %v1387_v57 = vmul.f32 %v1316_v0, %v6246_v1 }
 0x3b8   : > { %1473 = vrot.lane.b32.xlu1 %v1386_v40, %s4456_s27 }
 0x3b9   : > { %v1290_v5 = vpop.permute.xlu1 %1289  ;;  %1475 = vrot.lane.b32.xlu0 %v1387_v57, %s4456_s27 }
 0x3ba   : > { %v1374_v29 = vmul.f32 %v1290_v5, %v6245_v34  ;;  %v1292_v45 = vpop.permute.xlu0 %1291 }
 0x3bb   : > { %v1375_v18 = vmul.f32 %v1292_v45, %v6247_v30 }
 0x3bc   : > { %1449 = vrot.lane.b32.xlu1 %v1374_v29, %s4456_s27 }
 0x3bd   : > { %v1318_v16 = vpop.permute.xlu1 %1317  ;;  %1451 = vrot.lane.b32.xlu0 %v1375_v18, %s4456_s27 }
 0x3be   : > { %v1388_v59 = vmul.f32 %v1318_v16, %v6246_v1  ;;  %v1320_v48 = vpop.permute.xlu0 %1319 }
 0x3bf   : > { %v1389_v49 = vmul.f32 %v1320_v48, %v6248_v2 }
 0x3c0   : > { %1477 = vrot.lane.b32.xlu1 %v1388_v59, %s4456_s27 }
 0x3c1   : > { %v1294_v14 = vpop.permute.xlu1 %1293  ;;  %1479 = vrot.lane.b32.xlu0 %v1389_v49, %s4456_s27 }
 0x3c2   : > { %v1376_v36 = vmul.f32 %v1294_v14, %v6247_v30  ;;  %v1296_v12 = vpop.permute.xlu0 %1295 }
 0x3c3   : > { %v1377_v7 = vmul.f32 %v1296_v12, %v6249_v31 }
 0x3c4   : > { %1453 = vrot.lane.b32.xlu1 %v1376_v36, %s4456_s27 }
 0x3c5   : > { %v1322_v15 = vpop.permute.xlu1 %1321  ;;  %1455 = vrot.lane.b32.xlu0 %v1377_v7, %s4456_s27 }
 0x3c6   : > { %v1390_v24 = vmul.f32 %v1322_v15, %v6248_v2  ;;  %v1324_v55 = vpop.permute.xlu0 %1323 }
 0x3c7   : > { %v1391_v26 = vmul.f32 %v1324_v55, %v6250_v38 }
 0x3c8   : > { %1481 = vrot.lane.b32.xlu1 %v1390_v24, %s4456_s27 }
 0x3c9   : > { %v1298_v28 = vpop.permute.xlu1 %1297  ;;  %1483 = vrot.lane.b32.xlu0 %v1391_v26, %s4456_s27 }
 0x3ca   : > { %v1378_v37 = vmul.f32 %v1298_v28, %v6249_v31  ;;  %v1328_v52 = vpop.permute.xlu0 %1327 }
 0x3cb   : > { %v1393_v9 = vmul.f32 %v1328_v52, %v6251_v32 }
 0x3cc   : > { %1457 = vrot.lane.b32.xlu1 %v1378_v37, %s4456_s27 }
 0x3cd   : > { %v1326_v33 = vpop.permute.xlu1 %1325  ;;  %1487 = vrot.lane.b32.xlu0 %v1393_v9, %s4456_s27 }
 0x3ce   : > { %v1392_v51 = vmul.f32 %v1326_v33, %v6250_v38  ;;  %v1428_v54 = vpop.permute.xlu0 %1427 }
 0x3cf   : > { %v1523_v62 = vsel %vm741_vm1, %v1428_v54, 0.0 }
 0x3d0   : > { %1485 = vrot.lane.b32.xlu1 %v1392_v51, %s4456_s27 }
 0x3d1   : > { %v1330_v13 = vpop.permute.xlu1 %1329 }
 0x3d2   : > { %v1394_v44 = vmul.f32 %v1330_v13, %v6251_v32  ;;  %v1432_v39 = vpop.permute.xlu0 %1431 }
 0x3d3   : > { %v1529_v47 = vsel %vm741_vm1, %v1432_v39, 0.0 }
 0x3d4   : > { %1489 = vrot.lane.b32.xlu1 %v1394_v44, %s4456_s27 }
 0x3ec   : > { %1524 = vadd.xlane.f32.xlu0 %v1523_v62 }
 0x3f0   : > { %1530 = vadd.xlane.f32.xlu0 %v1529_v47 }
 0x40a   : > { %v1430_v10 = vpop.permute.xlu1 %1429 }
 0x40b   : > { %v1436_v8 = vpop.permute.xlu0 %1435  ;;  %v1526_v41 = vsel %vm741_vm1, %v1430_v10, 0.0 }
 0x40c   : > { %1527 = vadd.xlane.f32.xlu1 %v1526_v41  ;;  %v1535_v35 = vsel %vm741_vm1, %v1436_v8, 0.0 }
 0x40e   : > { %v1434_v42 = vpop.permute.xlu1 %1433 }
 0x40f   : > { %v1460_v43 = vpop.permute.xlu0 %1459  ;;  %v1532_v60 = vsel %vm741_vm1, %v1434_v42, 0.0 }
 0x410   : > { %1533 = vadd.xlane.f32.xlu0 %v1532_v60  ;;  %v1571_v57 = vsel %vm741_vm1, %v1460_v43, 0.0 }
 0x412   : > { %v1438_v3 = vpop.permute.xlu1 %1437 }
 0x413   : > { %v1464_v11 = vpop.permute.xlu0 %1463  ;;  %v1538_v20 = vsel %vm741_vm1, %v1438_v3, 0.0 }
 0x414   : > { %1539 = vadd.xlane.f32.xlu1 %v1538_v20  ;;  %1536 = vadd.xlane.f32.xlu0 %v1535_v35  ;;  %v1577_v18 = vsel %vm741_vm1, %v1464_v11, 0.0 }
 0x416   : > { %v1462_v53 = vpop.permute.xlu1 %1461 }
 0x417   : > { %v1440_v40 = vpop.permute.xlu0 %1439  ;;  %v1574_v0 = vsel %vm741_vm1, %v1462_v53, 0.0 }
 0x418   : > { %1575 = vadd.xlane.f32.xlu1 %v1574_v0  ;;  %1572 = vadd.xlane.f32.xlu0 %v1571_v57  ;;  %v1541_v49 = vsel %vm741_vm1, %v1440_v40, 0.0 }
 0x41a   : > { %v1466_v5 = vpop.permute.xlu1 %1465 }
 0x41b   : > { %v1468_v29 = vpop.permute.xlu0 %1467  ;;  %v1580_v45 = vsel %vm741_vm1, %v1466_v5, 0.0 }
 0x41c   : > { %1581 = vadd.xlane.f32.xlu1 %v1580_v45  ;;  %1578 = vadd.xlane.f32.xlu0 %v1577_v18  ;;  %v1583_v7 = vsel %vm741_vm1, %v1468_v29, 0.0 }
 0x41e   : > { %v1442_v16 = vpop.permute.xlu1 %1441 }
 0x41f   : > { %v1444_v59 = vpop.permute.xlu0 %1443  ;;  %v1544_v48 = vsel %vm741_vm1, %v1442_v16, 0.0 }
 0x420   : > { %1545 = vadd.xlane.f32.xlu1 %v1544_v48  ;;  %1542 = vadd.xlane.f32.xlu0 %v1541_v49  ;;  %v1547_v26 = vsel %vm741_vm1, %v1444_v59, 0.0 }
 0x422   : > { %v1470_v14 = vpop.permute.xlu1 %1469 }
 0x423   : > { %v1472_v36 = vpop.permute.xlu0 %1471  ;;  %v1586_v12 = vsel %vm741_vm1, %v1470_v14, 0.0 }
 0x424   : > { %1587 = vadd.xlane.f32.xlu1 %v1586_v12  ;;  %1584 = vadd.xlane.f32.xlu0 %v1583_v7  ;;  %v1589_v9 = vsel %vm741_vm1, %v1472_v36, 0.0 }
 0x426   : > { %v1446_v15 = vpop.permute.xlu1 %1445 }
 0x427   : > { %v1448_v24 = vpop.permute.xlu0 %1447  ;;  %v1550_v55 = vsel %vm741_vm1, %v1446_v15, 0.0 }
 0x428   : > { %1551 = vadd.xlane.f32.xlu1 %v1550_v55  ;;  %1548 = vadd.xlane.f32.xlu0 %v1547_v26  ;;  %v1553_v44 = vsel %vm741_vm1, %v1448_v24, 0.0 }
 0x42a   : > { %v1474_v28 = vpop.permute.xlu1 %1473 }
 0x42b   : > { %v1476_v37 = vpop.permute.xlu0 %1475  ;;  %v1592_v52 = vsel %vm741_vm1, %v1474_v28, 0.0 }
 0x42c   : > { %1593 = vadd.xlane.f32.xlu1 %v1592_v52  ;;  %1590 = vadd.xlane.f32.xlu0 %v1589_v9  ;;  %v1595_v47 = vsel %vm741_vm1, %v1476_v37, 0.0 }
 0x42e   : > { %v1450_v33 = vpop.permute.xlu1 %1449 }
 0x42f   : > { %v1452_v51 = vpop.permute.xlu0 %1451  ;;  %v1556_v13 = vsel %vm741_vm1, %v1450_v33, 0.0 }
 0x430   : > { %1557 = vadd.xlane.f32.xlu1 %v1556_v13  ;;  %1554 = vadd.xlane.f32.xlu0 %v1553_v44  ;;  %v1559_v41 = vsel %vm741_vm1, %v1452_v51, 0.0 }
 0x432   : > { %v1478_v54 = vpop.permute.xlu1 %1477 }
 0x433   : > { %v1480_v62 = vpop.permute.xlu0 %1479  ;;  %v1598_v39 = vsel %vm741_vm1, %v1478_v54, 0.0 }
 0x434   : > { %1599 = vadd.xlane.f32.xlu1 %v1598_v39  ;;  %1596 = vadd.xlane.f32.xlu0 %v1595_v47  ;;  %v1601_v3 = vsel %vm741_vm1, %v1480_v62, 0.0 }
 0x436   : > { %v1454_v10 = vpop.permute.xlu1 %1453 }
 0x437   : > { %v1562_v8 = vsel %vm741_vm1, %v1454_v10, 0.0  ;;  %v1456_v42 = vpop.permute.xlu0 %1455 }
 0x438   : > { %1563 = vadd.xlane.f32.xlu1 %v1562_v8  ;;  %1560 = vadd.xlane.f32.xlu0 %v1559_v41  ;;  %v1565_v53 = vsel %vm741_vm1, %v1456_v42, 0.0 }
 0x43a   : > { %v1482_v43 = vpop.permute.xlu1 %1481 }
 0x43b   : > { %v1604_v60 = vsel %vm741_vm1, %v1482_v43, 0.0  ;;  %v1484_v11 = vpop.permute.xlu0 %1483 }
 0x43c   : > { %1605 = vadd.xlane.f32.xlu1 %v1604_v60  ;;  %1602 = vadd.xlane.f32.xlu0 %v1601_v3  ;;  %v1607_v57 = vsel %vm741_vm1, %v1484_v11, 0.0 }
 0x43e   : > { %v1458_v20 = vpop.permute.xlu1 %1457 }
 0x43f   : > { %v1568_v35 = vsel %vm741_vm1, %v1458_v20, 0.0  ;;  %v1488_v5 = vpop.permute.xlu0 %1487 }
 0x440   : > { %1569 = vadd.xlane.f32.xlu1 %v1568_v35  ;;  %1566 = vadd.xlane.f32.xlu0 %v1565_v53  ;;  %v1613_v18 = vsel %vm741_vm1, %v1488_v5, 0.0 }
 0x442   : > { %v1486_v40 = vpop.permute.xlu1 %1485 }
 0x443   : > { %v1610_v0 = vsel %vm741_vm1, %v1486_v40, 0.0 }
 0x444   : > { %1611 = vadd.xlane.f32.xlu1 %v1610_v0  ;;  %1608 = vadd.xlane.f32.xlu0 %v1607_v57 }
 0x446   : > { %v1490_v29 = vpop.permute.xlu1 %1489 }
 0x447   : > { %v1616_v45 = vsel %vm741_vm1, %v1490_v29, 0.0 }
 0x448   : > { %1617 = vadd.xlane.f32.xlu1 %v1616_v45  ;;  %1614 = vadd.xlane.f32.xlu0 %v1613_v18 }
 0x474   : > { %v5327_v16 = vpop.f32.mrb[4].mxu1 }
 0x475   : > { %6252 = vst [vmem:[#allocation36_spill] sm:$0xff] %v5327_v16  ;;  %v5329_v59 = vpop.f32.mrb[5].mxu1 }
 0x476   : > { %6253 = vst [vmem:[#allocation35_spill] sm:$0xff] %v5329_v59 }
 0x479   : > { %v1525_v14 = vpop.xlane.xlu0 %1524 }
 0x47a   : > { %v1662_v57 = vrot.slane %v1525_v14, %v4749_v17 }
 0x47c   : > { %v5331_v48 = vpop.f32.mrb[6].mxu1 }
 0x47d   : > { %v5333_v49 = vpop.f32.mrb[7].mxu1  ;;  %v1531_v36 = vpop.xlane.xlu0 %1530 }
 0x47e   : > { %v1671_v60 = vrot.slane %v1531_v36, %v4749_v17 }
 0x499   : > { %v1528_v12 = vpop.xlane.xlu1 %1527 }
 0x49a   : > { %v1666_v3 = vrot.slane %v1528_v12, %v4751_v19 }
 0x49c   : > { %v1667_v36 = vsel %vm881_vm3, %v1666_v3, %v1662_v57 }
 0x49d   : > { %v1534_v7 = vpop.xlane.xlu0 %1533 }
 0x49e   : > { %v1675_v41 = vrot.slane %v1534_v7, %v4751_v19 }
 0x4a0   : > { %v1676_v5 = vsel %vm881_vm3, %v1675_v41, %v1671_v60 }
 0x4a1   : > { %v1540_v15 = vpop.xlane.xlu1 %1539  ;;  %v1537_v24 = vpop.xlane.xlu0 %1536  ;;  %v1803_v14 = vsel %vm1018_vm4, %v1676_v5, %v1667_v36 }
 0x4a2   : > { %v1684_v42 = vrot.slane %v1540_v15, %v4751_v19  ;;  %v1680_v43 = vrot.slane %v1537_v24, %v4749_v17 }
 0x4a4   : > { %v1685_v29 = vsel %vm881_vm3, %v1684_v42, %v1680_v43 }
 0x4a5   : > { %v5335_v55 = vpop.xlane.xlu1 %1575  ;;  %v5337_v26 = vpop.xlane.xlu0 %1572 }
 0x4a6   : > { %v1734_v41 = vrot.slane %v5337_v26, %v4749_v17 }
 0x4a9   : > { %v1582_v28 = vpop.xlane.xlu1 %1581  ;;  %v1579_v37 = vpop.xlane.xlu0 %1578 }
 0x4ad   : > { %v1546_v52 = vpop.xlane.xlu1 %1545  ;;  %v1543_v9 = vpop.xlane.xlu0 %1542 }
 0x4ae   : > { %v1693_v11 = vrot.slane %v1546_v52, %v4751_v19  ;;  %v1689_v20 = vrot.slane %v1543_v9, %v4749_v17 }
 0x4b0   : > { %v1694_v12 = vsel %vm881_vm3, %v1693_v11, %v1689_v20 }
 0x4b1   : > { %v1588_v33 = vpop.xlane.xlu1 %1587  ;;  %v1585_v51 = vpop.xlane.xlu0 %1584 }
 0x4b2   : > { %v1756_v60 = vrot.slane %v1588_v33, %v4751_v19  ;;  %v1752_v3 = vrot.slane %v1585_v51, %v4749_v17 }
 0x4b5   : > { %v1552_v13 = vpop.xlane.xlu1 %1551  ;;  %v1549_v44 = vpop.xlane.xlu0 %1548 }
 0x4b6   : > { %v1702_v40 = vrot.slane %v1552_v13, %v4751_v19  ;;  %v1698_v0 = vrot.slane %v1549_v44, %v4749_v17  ;;  %v1804_v13 = vsel %vm1020_vm5, %v1685_v29, %v1803_v14  ;;  %v1747_v44 = vrot.slane %v1582_v28, %v4751_v19 }
 0x4b7   : > { %v1805_v42 = vsel %vm1022_vm6, %v1694_v12, %v1804_v13 }
 0x4b8   : > { %v1703_v9 = vsel %vm881_vm3, %v1702_v40, %v1698_v0 }
 0x4b9   : > { %v1594_v54 = vpop.xlane.xlu1 %1593  ;;  %v1591_v62 = vpop.xlane.xlu0 %1590  ;;  %v1806_v11 = vsel %vm1024_vm7, %v1703_v9, %v1805_v42 }
 0x4bd   : > { %v1558_v39 = vpop.xlane.xlu1 %1557  ;;  %v1555_v47 = vpop.xlane.xlu0 %1554 }
 0x4be   : > { %v1711_v45 = vrot.slane %v1558_v39, %v4751_v19  ;;  %v1707_v18 = vrot.slane %v1555_v47, %v4749_v17  ;;  %v1743_v39 = vrot.slane %v1579_v37, %v4749_v17  ;;  %v1738_v47 = vrot.slane %v5335_v55, %v4751_v19 }
 0x4bf   : > { %v1761_v55 = vrot.slane %v1591_v62, %v4749_v17 }
 0x4c0   : > { %v1712_v43 = vsel %vm881_vm3, %v1711_v45, %v1707_v18  ;;  %v1748_v40 = vsel %vm881_vm3, %v1747_v44, %v1743_v39  ;;  %v1739_v29 = vsel %vm881_vm3, %v1738_v47, %v1734_v41  ;;  %v1757_v45 = vsel %vm881_vm3, %v1756_v60, %v1752_v3 }
 0x4c1   : > { %v5339_v10 = vpop.xlane.xlu1 %1599  ;;  %v1597_v8 = vpop.xlane.xlu0 %1596  ;;  %v1807_v33 = vsel %vm1026_vm8, %v1712_v43, %v1806_v11 }
 0x4c2   : > { %v1774_v51 = vrot.slane %v5339_v10, %v4751_v19  ;;  %v1770_v0 = vrot.slane %v1597_v8, %v4749_v17 }
 0x4c5   : > { %v1564_v35 = vpop.xlane.xlu1 %1563  ;;  %v1561_v53 = vpop.xlane.xlu0 %1560 }
 0x4c6   : > { %v1720_v7 = vrot.slane %v1564_v35, %v4751_v19  ;;  %v1716_v15 = vrot.slane %v1561_v53, %v4749_v17  ;;  %v1765_v35 = vrot.slane %v1594_v54, %v4751_v19 }
 0x4c8   : > { %v1721_v28 = vsel %vm881_vm3, %v1720_v7, %v1716_v15  ;;  %v1766_v10 = vsel %vm881_vm3, %v1765_v35, %v1761_v55  ;;  %v5414_v35 = vld [vmem:[#allocation8] sm:$0xff] }
 0x4c9   : > { %v1606_v24 = vpop.xlane.xlu1 %1605  ;;  %v1603_v52 = vpop.xlane.xlu0 %1602  ;;  %v1808_v62 = vsel %vm1028_vm9, %v1721_v28, %v1807_v33 }
 0x4ca   : > { %v1783_v57 = vrot.slane %v1606_v24, %v4751_v19  ;;  %v1779_v5 = vrot.slane %v1603_v52, %v4749_v17  ;;  %v1810_v24 = vsel %vm1018_vm4, %v1748_v40, %v1739_v29  ;;  %v1775_v52 = vsel %vm881_vm3, %v1774_v51, %v1770_v0 }
 0x4cb   : > { %v1811_v14 = vsel %vm1020_vm5, %v1757_v45, %v1810_v24  ;;  %v5447_v24 = vld [vmem:[#allocation8 + $0x80] sm:$0xff] }
 0x4cc   : > { %v1784_v9 = vsel %vm881_vm3, %v1783_v57, %v1779_v5  ;;  %v1812_v44 = vsel %vm1022_vm6, %v1766_v10, %v1811_v14  ;;  %v5455_v14 = vld [vmem:[#allocation8 + $0x90] sm:$0xff] }
 0x4cd   : > { %v1570_v20 = vpop.xlane.xlu1 %1569  ;;  %v1567_v37 = vpop.xlane.xlu0 %1566  ;;  %v1813_v42 = vsel %vm1024_vm7, %v1775_v52, %v1812_v44  ;;  %v5451_v52 = vld [vmem:[#allocation8 + $0x18] sm:$0xff]  ;;  %v5467_v44 = vld [vmem:[#allocation8 + $0x88] sm:$0xff] }
 0x4ce   : > { %v1729_v26 = vrot.slane %v1570_v20, %v4751_v19  ;;  %v1725_v53 = vrot.slane %v1567_v37, %v4749_v17  ;;  %v1814_v60 = vsel %vm1026_vm8, %v1784_v9, %v1813_v42  ;;  %v5459_v9 = vld [vmem:[#allocation8 + $0x28] sm:$0xff]  ;;  %v5483_v42 = vld [vmem:[#allocation8 + $0x38] sm:$0xff] }
 0x4d0   : > { %v1730_v54 = vsel %vm881_vm3, %v1729_v26, %v1725_v53 }
 0x4d1   : > { %v1612_v18 = vpop.xlane.xlu1 %1611  ;;  %v1609_v36 = vpop.xlane.xlu0 %1608  ;;  %v1809_v12 = vsel %vm1030_vm10, %v1730_v54, %v1808_v62 }
 0x4d2   : > { %v1792_v8 = vrot.slane %v1612_v18, %v4751_v19  ;;  %v1788_v7 = vrot.slane %v1609_v36, %v4749_v17  ;;  %v1894_v15 = vadd.f32 %v5333_v49, %v1809_v12 }
 0x4d4   : > { %v1902_v13 = vsel %vm741_vm1, %v1894_v15, -inf  ;;  %v1793_v39 = vsel %vm881_vm3, %v1792_v8, %v1788_v7  ;;  %v5439_v7 = vld [vmem:[#allocation8 + $0x20] sm:$0xff] }
 0x4d5   : > { %v1618_v47 = vpop.xlane.xlu1 %1617  ;;  %v1615_v41 = vpop.xlane.xlu0 %1614  ;;  %1903 = vmax.xlane.f32.xlu0 %v1902_v13  ;;  %v1815_v11 = vsel %vm1028_vm9, %v1793_v39, %v1814_v60  ;;  %v5463_v13 = vld [vmem:[#allocation8 + $0x30] sm:$0xff]  ;;  %v5471_v39 = vld [vmem:[#allocation8 + $0xa0] sm:$0xff] }
 0x4d6   : > { %v1801_v49 = vrot.slane %v1618_v47, %v4751_v19  ;;  %v1797_v43 = vrot.slane %v1615_v41, %v4749_v17  ;;  %v5475_v47 = vld [vmem:[#allocation8 + $0x98] sm:$0xff]  ;;  %v5479_v41 = vld [vmem:[#allocation8 + $0x40] sm:$0xff]  ;;  %v5495_v60 = vld [vmem:[#allocation8 + $0x50] sm:$0xff] }
 0x4d8   : > { %v1802_v3 = vsel %vm881_vm3, %v1801_v49, %v1797_v43  ;;  %v5487_v49 = vld [vmem:[#allocation8 + $0xb0] sm:$0xff]  ;;  %v5491_v43 = vld [vmem:[#allocation8 + $0xa8] sm:$0xff] }
 0x4d9   : > { %v1816_v28 = vsel %vm1030_vm10, %v1802_v3, %v1815_v11  ;;  %v5499_v3 = vld [vmem:[#allocation8 + $0x48] sm:$0xff]  ;;  %v5503_v11 = vld [vmem:[#allocation8 + $0xc0] sm:$0xff] }
 0x4da   : > { %v1899_v20 = vadd.f32 %v5331_v48, %v1816_v28  ;;  %v5420_v48 = vld [vmem:[#allocation8 + $0x10] sm:$0xff]  ;;  %v5507_v28 = vld [vmem:[#allocation8 + $0xb8] sm:$0xff] }
 0x4dc   : > { %v1905_v37 = vsel %vm741_vm1, %v1899_v20, -inf }
 0x4dd   : > { %1906 = vmax.xlane.f32.xlu1 %v1905_v37  ;;  %v5515_v37 = vld [vmem:[#allocation8 + $0x58] sm:$0xff] }
 0x4de   : > { %6254 = vst [vmem:[#allocation23_spill] sm:$0xff] %v5515_v37 }
 0x4eb   : > { %4142 = vrot.lane.b32.xlu0 %v4874_v22, %s4459_s9 }
 0x4ee   : > { %4147 = vrot.lane.b32.xlu1 %v4874_v22, %s4460_s7 }
 0x4ef   : > { %2011 = vrot.lane.b32.xlu0 %v5414_v35, %s4461_s10 }
 0x4f2   : > { %2363 = vrot.lane.b32.xlu1 %v4757_v27, %s4460_s7 }
 0x4f3   : > { %2015 = vrot.lane.b32.xlu0 %v5420_v48, %s4461_s10 }
 0x4f6   : > { %2365 = vrot.lane.b32.xlu1 %v4755_v25, %s4460_s7 }
 0x562   : > { %v1904_v55 = vpop.xlane.xlu0 %1903 }
 0x563   : > { %v1908_v26 = vsub.f32 %v1894_v15, %v1904_v55  ;;  %v5443_v15 = vld [vmem:[#allocation8 + $0x8] sm:$0xff]  ;;  %v5519_v55 = vld [vmem:[#allocation8 + $0xd0] sm:$0xff] }
 0x564   : > { %6255 = vst [vmem:[#allocation21_spill] sm:$0xff] %v5519_v55 }
 0x565   : > { %v1910_v53 = vmul.f32 1.442695, %v1908_v26  ;;  %v5523_v26 = vld [vmem:[#allocation8 + $0xc8] sm:$0xff] }
 0x566   : > { %v4143_v40 = vpop.permute.xlu0 %4142  ;;  %6256 = vst [vmem:[#allocation39_spill] sm:$0xff] %v5523_v26 }
 0x567   : > { %4174 = vpow2.f32 %v1910_v53  ;;  %v4145_v33 = vunpack.i.h.bf16 %v4143_v40  ;;  %v4144_v51 = vunpack.i.l.bf16 %v4143_v40  ;;  %v5527_v53 = vld [vmem:[#allocation8 + $0x70] sm:$0xff]  ;;  %v5531_v40 = vld [vmem:[#allocation8 + $0x68] sm:$0xff] }
 0x568   : > { %6257 = vst [vmem:[#allocation38_spill] sm:$0xff] %v5527_v53  ;;  %6258 = vst [vmem:[#allocation29_spill] sm:$0xff] %v5531_v40 }
 0x569   : > { %v3992_v0 = vpack.c.bf16 %v4145_v33, %v4144_v51  ;;  %v5535_v33 = vld [vmem:[#allocation8 + $0xe0] sm:$0xff] }
 0x56a   : > { %v1907_v57 = vpop.xlane.xlu1 %1906  ;;  %6259 = vst [vmem:[#allocation28_spill] sm:$0xff] %v5535_v33  ;;  %v2012_v51 = vpop.permute.xlu0 %2011 }
 0x56b   : > { %v1909_v5 = vsub.f32 %v1899_v20, %v1907_v57  ;;  %3993 = vmatprep.subr.bf16.mxu0 %v3992_v0  ;;  %v5511_v20 = vld [vmem:[#allocation8 + $0x60] sm:$0xff]  ;;  %v5543_v57 = vld [vmem:[#allocation8 + $0xf0] sm:$0xff] }
 0x56c   : > { %3995 = vmatpush3.bf16.msra.mxu0 %v3992_v0  ;;  %v5539_v0 = vld [vmem:[#allocation8 + $0xd8] sm:$0xff]  ;;  %6261 = vst [vmem:[#allocation41_spill] sm:$0xff] %v5543_v57 }
 0x56d   : > { %v1912_v54 = vmul.f32 1.442695, %v1909_v5  ;;  %6260 = vst [vmem:[#allocation42_spill] sm:$0xff] %v5539_v0  ;;  %v2107_v5 = vmul.f32 %v2012_v51, %v6235_v56 }
 0x56e   : > { %v4148_v62 = vpop.permute.xlu1 %4147 }
 0x56f   : > { %4176 = vpow2.f32 %v1912_v54  ;;  %v4150_v29 = vunpack.i.h.bf16 %v4148_v62  ;;  %v4149_v45 = vunpack.i.l.bf16 %v4148_v62  ;;  %v2016_v54 = vpop.permute.xlu0 %2015  ;;  %v5548_v62 = vld [vmem:[#allocation8 + $0x78] sm:$0xff] }
 0x570   : > { %6262 = vst [vmem:[#allocation32_spill] sm:$0xff] %v5548_v62 }
 0x571   : > { %v5426_v18 = vpop.eup %4174  ;;  %v5428_v36 = vpack.c.bf16 %v4150_v29, %v4149_v45  ;;  %v2109_v29 = vmul.f32 %v2016_v54, %v6237_v61  ;;  %v5554_v45 = vld [vmem:[#allocation8 + $0xe8] sm:$0xff] }
 0x572   : > { %v1914_v12 = vsel %vm741_vm1, %v5426_v18, 0.0  ;;  %6263 = vst [vmem:[#allocation31_spill] sm:$0xff] %v5554_v45 }
 0x573   : > { %1915 = vadd.xlane.f32.xlu0 %v1914_v12  ;;  %3998 = vmatprep.subr.msk.bf16.mxu0 %vm4795_vm2, %v5428_v36  ;;  %v5559_v12 = vld [vmem:[#allocation8 + $0xf8] sm:$0xff] }
 0x574   : > { %6264 = vst [vmem:[#allocation45_spill] sm:$0xff] %v5559_v12 }
 0x579   : > { %v5435_v10 = vpop.eup %4176 }
 0x57a   : > { %v1917_v8 = vsel %vm741_vm1, %v5435_v10, 0.0 }
 0x57b   : > { %1918 = vadd.xlane.f32.xlu1 %v1917_v8  ;;  %v2364_v8 = vpop.permute.xlu1 %2363 }
 0x57f   : > { %v2366_v59 = vpop.permute.xlu1 %2365 }
 0x589   : > { %2019 = vrot.lane.b32.xlu0 %v5439_v7, %s4461_s10 }
 0x58c   : > { %2013 = vrot.lane.b32.xlu1 %v5443_v15, %s4461_s10 }
 0x58d   : > { %2043 = vrot.lane.b32.xlu0 %v5447_v24, %s4461_s10 }
 0x590   : > { %2017 = vrot.lane.b32.xlu1 %v5451_v52, %s4461_s10 }
 0x591   : > { %2047 = vrot.lane.b32.xlu0 %v5455_v14, %s4461_s10 }
 0x594   : > { %2021 = vrot.lane.b32.xlu1 %v5459_v9, %s4461_s10 }
 0x595   : > { %2023 = vrot.lane.b32.xlu0 %v5463_v13, %s4461_s10 }
 0x598   : > { %2045 = vrot.lane.b32.xlu1 %v5467_v44, %s4461_s10 }
 0x599   : > { %2051 = vrot.lane.b32.xlu0 %v5471_v39, %s4461_s10 }
 0x59c   : > { %2049 = vrot.lane.b32.xlu1 %v5475_v47, %s4461_s10 }
 0x59d   : > { %2027 = vrot.lane.b32.xlu0 %v5479_v41, %s4461_s10 }
 0x5a0   : > { %2025 = vrot.lane.b32.xlu1 %v5483_v42, %s4461_s10 }
 0x5a1   : > { %2055 = vrot.lane.b32.xlu0 %v5487_v49, %s4461_s10 }
 0x5a4   : > { %2053 = vrot.lane.b32.xlu1 %v5491_v43, %s4461_s10 }
 0x5a5   : > { %2031 = vrot.lane.b32.xlu0 %v5495_v60, %s4461_s10 }
 0x5a8   : > { %2029 = vrot.lane.b32.xlu1 %v5499_v3, %s4461_s10 }
 0x5a9   : > { %2059 = vrot.lane.b32.xlu0 %v5503_v11, %s4461_s10 }
 0x5ac   : > { %2057 = vrot.lane.b32.xlu1 %v5507_v28, %s4461_s10 }
 0x5ad   : > { %2035 = vrot.lane.b32.xlu0 %v5511_v20, %s4461_s10 }
 0x5b0   : > { %2033 = vrot.lane.b32.xlu1 %v5515_v37, %s4461_s10 }
 0x5b1   : > { %2063 = vrot.lane.b32.xlu0 %v5519_v55, %s4461_s10 }
 0x5b4   : > { %2061 = vrot.lane.b32.xlu1 %v5523_v26, %s4461_s10 }
 0x5b5   : > { %2039 = vrot.lane.b32.xlu0 %v5527_v53, %s4461_s10 }
 0x5b8   : > { %2037 = vrot.lane.b32.xlu1 %v5531_v40, %s4461_s10 }
 0x5b9   : > { %2067 = vrot.lane.b32.xlu0 %v5535_v33, %s4461_s10 }
 0x5bc   : > { %2065 = vrot.lane.b32.xlu1 %v5539_v0, %s4461_s10 }
 0x5bd   : > { %2071 = vrot.lane.b32.xlu0 %v5543_v57, %s4461_s10 }
 0x5c0   : > { %2041 = vrot.lane.b32.xlu1 %v5548_v62, %s4461_s10 }
 0x5c1   : > { %2171 = vrot.lane.b32.xlu0 %v2107_v5, %s4460_s7 }
 0x5c4   : > { %2069 = vrot.lane.b32.xlu1 %v5554_v45, %s4461_s10 }
 0x5c5   : > { %2175 = vrot.lane.b32.xlu0 %v2109_v29, %s4460_s7 }
 0x5c8   : > { %2073 = vrot.lane.b32.xlu1 %v5559_v12, %s4461_s10 }
 0x600   : > { %v1916_v51 = vpop.xlane.xlu0 %1915 }
 0x601   : > { %4178 = vrcp.f32 %v1916_v51 }
 0x604   : > { %v2020_v16 = vpop.permute.xlu0 %2019 }
 0x605   : > { %v2111_v5 = vmul.f32 %v2020_v16, %v6238_v6 }
 0x607   : > { %2179 = vrot.lane.b32.xlu0 %v2111_v5, %s4460_s7 }
 0x608   : > { %v1919_v54 = vpop.xlane.xlu1 %1918  ;;  %v2044_v62 = vpop.permute.xlu0 %2043 }
 0x609   : > { %4180 = vrcp.f32 %v1919_v54  ;;  %v2123_v45 = vmul.f32 %v2044_v62, %v6239_v4 }
 0x60b   : > { %v4179_v29 = vpop.eup %4178  ;;  %2203 = vrot.lane.b32.xlu0 %v2123_v45, %s4460_s7 }
 0x60c   : > { %v2014_v57 = vpop.permute.xlu1 %2013  ;;  %v2048_v0 = vpop.permute.xlu0 %2047  ;;  %v1922_v12 = vmul.f32 %v4179_v29, %v5426_v18 }
 0x60d   : > { %v2108_v51 = vmul.f32 %v2014_v57, %v6235_v56  ;;  %v2125_v33 = vmul.f32 %v2048_v0, %v6240_v21 }
 0x60e   : > { %3910 = vmatprep.mubr.msk.f32.mxu0 %vm741_vm1, %v1922_v12 }
 0x60f   : > { %2173 = vrot.lane.b32.xlu1 %v2108_v51, %s4460_s7  ;;  %2207 = vrot.lane.b32.xlu0 %v2125_v33, %s4460_s7 }
 0x610   : > { %v2018_v16 = vpop.permute.xlu1 %2017  ;;  %v2024_v5 = vpop.permute.xlu0 %2023 }
 0x611   : > { %v2110_v62 = vmul.f32 %v2018_v16, %v6237_v61  ;;  %v2113_v45 = vmul.f32 %v2024_v5, %v6241_v23 }
 0x613   : > { %v4181_v54 = vpop.eup %4180  ;;  %2177 = vrot.lane.b32.xlu1 %v2110_v62, %s4460_s7  ;;  %2183 = vrot.lane.b32.xlu0 %v2113_v45, %s4460_s7 }
 0x614   : > { %v2022_v18 = vpop.permute.xlu1 %2021  ;;  %v2052_v57 = vpop.permute.xlu0 %2051  ;;  %v1923_v0 = vmul.f32 %v4181_v54, %v5435_v10 }
 0x615   : > { %v2112_v12 = vmul.f32 %v2022_v18, %v6238_v6  ;;  %v2127_v29 = vmul.f32 %v2052_v57, %v6242_v63 }
 0x616   : > { %3911 = vmatmul.mubr.msk.f32.vlgmr.msra.gmra.mrb[2].mxu0 %vm741_vm1, %v1923_v0 }
 0x617   : > { %4001 = vmatpush3.bf16.xpose.msk.msra.mxu0 %vm4795_vm2, %v5428_v36  ;;  %2181 = vrot.lane.b32.xlu1 %v2112_v12, %s4460_s7 }
 0x618   : > { %2211 = vrot.lane.b32.xlu0 %v2127_v29, %s4460_s7  ;;  %3917 = vmatprep.mubr.msk.f32.mxu0 %vm741_vm1, %v2364_v8  ;;  %v2046_v33 = vpop.permute.xlu1 %2045  ;;  %v2028_v51 = vpop.permute.xlu0 %2027 }
 0x619   : > { %v2124_v10 = vmul.f32 %v2046_v33, %v6239_v4  ;;  %v2115_v16 = vmul.f32 %v2028_v51, %v6243_v50 }
 0x61b   : > { %2205 = vrot.lane.b32.xlu1 %v2124_v10, %s4460_s7 }
 0x61c   : > { %2187 = vrot.lane.b32.xlu0 %v2115_v16, %s4460_s7  ;;  %v2050_v5 = vpop.permute.xlu1 %2049  ;;  %v2056_v62 = vpop.permute.xlu0 %2055 }
 0x61d   : > { %v2126_v36 = vmul.f32 %v2050_v5, %v6240_v21  ;;  %v2129_v45 = vmul.f32 %v2056_v62, %v6244_v58 }
 0x61e   : > { %3918 = vmatmul.mubr.msk.f32.vlgmr.msra.gmra.mrb[4].mxu0 %vm741_vm1, %v2366_v59 }
 0x61f   : > { %2209 = vrot.lane.b32.xlu1 %v2126_v36, %s4460_s7 }
 0x620   : > { %2215 = vrot.lane.b32.xlu0 %v2129_v45, %s4460_s7  ;;  %v2026_v8 = vpop.permute.xlu1 %2025  ;;  %v2032_v54 = vpop.permute.xlu0 %2031 }
 0x621   : > { %v2114_v18 = vmul.f32 %v2026_v8, %v6241_v23  ;;  %v2117_v57 = vmul.f32 %v2032_v54, %v6245_v34 }
 0x623   : > { %2185 = vrot.lane.b32.xlu1 %v2114_v18, %s4460_s7 }
 0x624   : > { %2191 = vrot.lane.b32.xlu0 %v2117_v57, %s4460_s7  ;;  %v2054_v0 = vpop.permute.xlu1 %2053  ;;  %v2060_v12 = vpop.permute.xlu0 %2059 }
 0x625   : > { %v2128_v29 = vmul.f32 %v2054_v0, %v6242_v63  ;;  %v2131_v59 = vmul.f32 %v2060_v12, %v6246_v1 }
 0x627   : > { %2213 = vrot.lane.b32.xlu1 %v2128_v29, %s4460_s7 }
 0x628   : > { %2219 = vrot.lane.b32.xlu0 %v2131_v59, %s4460_s7  ;;  %v2030_v33 = vpop.permute.xlu1 %2029  ;;  %v2036_v51 = vpop.permute.xlu0 %2035 }
 0x629   : > { %v2116_v10 = vmul.f32 %v2030_v33, %v6243_v50  ;;  %v2119_v16 = vmul.f32 %v2036_v51, %v6247_v30 }
 0x62b   : > { %2189 = vrot.lane.b32.xlu1 %v2116_v10, %s4460_s7 }
 0x62c   : > { %2195 = vrot.lane.b32.xlu0 %v2119_v16, %s4460_s7  ;;  %v2058_v5 = vpop.permute.xlu1 %2057  ;;  %v2064_v62 = vpop.permute.xlu0 %2063 }
 0x62d   : > { %v2130_v36 = vmul.f32 %v2058_v5, %v6244_v58  ;;  %v2133_v45 = vmul.f32 %v2064_v62, %v6248_v2 }
 0x62f   : > { %2217 = vrot.lane.b32.xlu1 %v2130_v36, %s4460_s7 }
 0x630   : > { %2223 = vrot.lane.b32.xlu0 %v2133_v45, %s4460_s7  ;;  %v2034_v8 = vpop.permute.xlu1 %2033  ;;  %v2040_v54 = vpop.permute.xlu0 %2039 }
 0x631   : > { %v2118_v18 = vmul.f32 %v2034_v8, %v6245_v34  ;;  %v2121_v57 = vmul.f32 %v2040_v54, %v6249_v31 }
 0x633   : > { %2193 = vrot.lane.b32.xlu1 %v2118_v18, %s4460_s7 }
 0x634   : > { %2199 = vrot.lane.b32.xlu0 %v2121_v57, %s4460_s7  ;;  %v2062_v0 = vpop.permute.xlu1 %2061  ;;  %v2068_v12 = vpop.permute.xlu0 %2067 }
 0x635   : > { %v2132_v29 = vmul.f32 %v2062_v0, %v6246_v1  ;;  %v2135_v59 = vmul.f32 %v2068_v12, %v6250_v38 }
 0x637   : > { %2221 = vrot.lane.b32.xlu1 %v2132_v29, %s4460_s7 }
 0x638   : > { %2227 = vrot.lane.b32.xlu0 %v2135_v59, %s4460_s7  ;;  %v2038_v33 = vpop.permute.xlu1 %2037  ;;  %v2072_v51 = vpop.permute.xlu0 %2071 }
 0x639   : > { %v2120_v10 = vmul.f32 %v2038_v33, %v6247_v30  ;;  %v2137_v16 = vmul.f32 %v2072_v51, %v6251_v32 }
 0x63b   : > { %2197 = vrot.lane.b32.xlu1 %v2120_v10, %s4460_s7 }
 0x63c   : > { %2231 = vrot.lane.b32.xlu0 %v2137_v16, %s4460_s7  ;;  %v2066_v5 = vpop.permute.xlu1 %2065  ;;  %v2172_v0 = vpop.permute.xlu0 %2171 }
 0x63d   : > { %v2134_v62 = vmul.f32 %v2066_v5, %v6248_v2  ;;  %v2267_v12 = vsel %vm741_vm1, %v2172_v0, 0.0 }
 0x63f   : > { %2225 = vrot.lane.b32.xlu1 %v2134_v62, %s4460_s7 }
 0x640   : > { %v2042_v36 = vpop.permute.xlu1 %2041  ;;  %v2176_v29 = vpop.permute.xlu0 %2175 }
 0x641   : > { %v2122_v45 = vmul.f32 %v2042_v36, %v6249_v31  ;;  %v2273_v59 = vsel %vm741_vm1, %v2176_v29, 0.0 }
 0x643   : > { %2201 = vrot.lane.b32.xlu1 %v2122_v45, %s4460_s7 }
 0x644   : > { %v2070_v8 = vpop.permute.xlu1 %2069 }
 0x645   : > { %v2136_v54 = vmul.f32 %v2070_v8, %v6250_v38 }
 0x647   : > { %2229 = vrot.lane.b32.xlu1 %v2136_v54, %s4460_s7 }
 0x648   : > { %v2074_v18 = vpop.permute.xlu1 %2073 }
 0x649   : > { %v2138_v57 = vmul.f32 %v2074_v18, %v6251_v32 }
 0x64b   : > { %2233 = vrot.lane.b32.xlu1 %v2138_v57, %s4460_s7 }
 0x65b   : > { %2268 = vadd.xlane.f32.xlu0 %v2267_v12 }
 0x65f   : > { %2274 = vadd.xlane.f32.xlu0 %v2273_v59 }
 0x679   : > { %v2180_v33 = vpop.permute.xlu0 %2179 }
 0x67a   : > { %v2279_v57 = vsel %vm741_vm1, %v2180_v33, 0.0 }
 0x67d   : > { %v2204_v51 = vpop.permute.xlu0 %2203 }
 0x67e   : > { %v2315_v59 = vsel %vm741_vm1, %v2204_v51, 0.0 }
 0x681   : > { %v2174_v10 = vpop.permute.xlu1 %2173  ;;  %v2208_v16 = vpop.permute.xlu0 %2207 }
 0x682   : > { %v2270_v5 = vsel %vm741_vm1, %v2174_v10, 0.0 }
 0x683   : > { %2271 = vadd.xlane.f32.xlu1 %v2270_v5 }
 0x685   : > { %v2178_v62 = vpop.permute.xlu1 %2177  ;;  %v2184_v36 = vpop.permute.xlu0 %2183 }
 0x686   : > { %v2276_v45 = vsel %vm741_vm1, %v2178_v62, 0.0 }
 0x687   : > { %2277 = vadd.xlane.f32.xlu0 %v2276_v45  ;;  %v2321_v45 = vsel %vm741_vm1, %v2208_v16, 0.0 }
 0x689   : > { %v2182_v8 = vpop.permute.xlu1 %2181 }
 0x68a   : > { %v2212_v54 = vpop.permute.xlu0 %2211  ;;  %v2282_v18 = vsel %vm741_vm1, %v2182_v8, 0.0 }
 0x68b   : > { %2283 = vadd.xlane.f32.xlu1 %v2282_v18  ;;  %2280 = vadd.xlane.f32.xlu0 %v2279_v57  ;;  %v2285_v18 = vsel %vm741_vm1, %v2184_v36, 0.0 }
 0x68d   : > { %v2206_v0 = vpop.permute.xlu1 %2205 }
 0x68e   : > { %v2188_v12 = vpop.permute.xlu0 %2187  ;;  %v2318_v29 = vsel %vm741_vm1, %v2206_v0, 0.0 }
 0x68f   : > { %2319 = vadd.xlane.f32.xlu1 %v2318_v29  ;;  %2316 = vadd.xlane.f32.xlu0 %v2315_v59  ;;  %v2327_v29 = vsel %vm741_vm1, %v2212_v54, 0.0 }
 0x691   : > { %v2210_v10 = vpop.permute.xlu1 %2209 }
 0x692   : > { %v2216_v5 = vpop.permute.xlu0 %2215  ;;  %v2324_v62 = vsel %vm741_vm1, %v2210_v10, 0.0 }
 0x693   : > { %2325 = vadd.xlane.f32.xlu1 %v2324_v62  ;;  %2322 = vadd.xlane.f32.xlu0 %v2321_v45  ;;  %v2291_v62 = vsel %vm741_vm1, %v2188_v12, 0.0 }
 0x695   : > { %v2186_v8 = vpop.permute.xlu1 %2185 }
 0x696   : > { %v2288_v33 = vsel %vm741_vm1, %v2186_v8, 0.0  ;;  %v2192_v57 = vpop.permute.xlu0 %2191  ;;  %v2333_v8 = vsel %vm741_vm1, %v2216_v5, 0.0 }
 0x697   : > { %2289 = vadd.xlane.f32.xlu1 %v2288_v33  ;;  %2286 = vadd.xlane.f32.xlu0 %v2285_v18 }
 0x699   : > { %v2214_v0 = vpop.permute.xlu1 %2213 }
 0x69a   : > { %v2330_v51 = vsel %vm741_vm1, %v2214_v0, 0.0  ;;  %v2220_v59 = vpop.permute.xlu0 %2219  ;;  %v2297_v0 = vsel %vm741_vm1, %v2192_v57, 0.0 }
 0x69b   : > { %2331 = vadd.xlane.f32.xlu1 %v2330_v51  ;;  %2328 = vadd.xlane.f32.xlu0 %v2327_v29 }
 0x69d   : > { %v2190_v10 = vpop.permute.xlu1 %2189 }
 0x69e   : > { %v2294_v16 = vsel %vm741_vm1, %v2190_v10, 0.0  ;;  %v2196_v33 = vpop.permute.xlu0 %2195  ;;  %v2339_v10 = vsel %vm741_vm1, %v2220_v59, 0.0 }
 0x69f   : > { %2295 = vadd.xlane.f32.xlu1 %v2294_v16  ;;  %2292 = vadd.xlane.f32.xlu0 %v2291_v62  ;;  %v2303_v62 = vsel %vm741_vm1, %v2196_v33, 0.0 }
 0x6a1   : > { %v2218_v45 = vpop.permute.xlu1 %2217 }
 0x6a2   : > { %v2336_v36 = vsel %vm741_vm1, %v2218_v45, 0.0  ;;  %v2224_v51 = vpop.permute.xlu0 %2223 }
 0x6a3   : > { %2337 = vadd.xlane.f32.xlu1 %v2336_v36  ;;  %2334 = vadd.xlane.f32.xlu0 %v2333_v8  ;;  %v2345_v8 = vsel %vm741_vm1, %v2224_v51, 0.0 }
 0x6a5   : > { %v2194_v18 = vpop.permute.xlu1 %2193 }
 0x6a6   : > { %v2300_v54 = vsel %vm741_vm1, %v2194_v18, 0.0  ;;  %v2200_v45 = vpop.permute.xlu0 %2199 }
 0x6a7   : > { %2301 = vadd.xlane.f32.xlu1 %v2300_v54  ;;  %2298 = vadd.xlane.f32.xlu0 %v2297_v0  ;;  %v2309_v0 = vsel %vm741_vm1, %v2200_v45, 0.0 }
 0x6a9   : > { %v2222_v29 = vpop.permute.xlu1 %2221 }
 0x6aa   : > { %v2342_v12 = vsel %vm741_vm1, %v2222_v29, 0.0  ;;  %v2228_v18 = vpop.permute.xlu0 %2227 }
 0x6ab   : > { %2343 = vadd.xlane.f32.xlu1 %v2342_v12  ;;  %2340 = vadd.xlane.f32.xlu0 %v2339_v10  ;;  %v2351_v12 = vsel %vm741_vm1, %v2228_v18, 0.0 }
 0x6ad   : > { %v2198_v16 = vpop.permute.xlu1 %2197 }
 0x6ae   : > { %v2306_v5 = vsel %vm741_vm1, %v2198_v16, 0.0  ;;  %v2232_v10 = vpop.permute.xlu0 %2231 }
 0x6af   : > { %2307 = vadd.xlane.f32.xlu1 %v2306_v5  ;;  %2304 = vadd.xlane.f32.xlu0 %v2303_v62  ;;  %v2357_v5 = vsel %vm741_vm1, %v2232_v10, 0.0 }
 0x6b1   : > { %v2226_v36 = vpop.permute.xlu1 %2225 }
 0x6b2   : > { %v2348_v57 = vsel %vm741_vm1, %v2226_v36, 0.0 }
 0x6b3   : > { %2349 = vadd.xlane.f32.xlu1 %v2348_v57  ;;  %2346 = vadd.xlane.f32.xlu0 %v2345_v8 }
 0x6b5   : > { %v2202_v54 = vpop.permute.xlu1 %2201 }
 0x6b6   : > { %v2312_v59 = vsel %vm741_vm1, %v2202_v54, 0.0 }
 0x6b7   : > { %2313 = vadd.xlane.f32.xlu1 %v2312_v59  ;;  %2310 = vadd.xlane.f32.xlu0 %v2309_v0 }
 0x6b9   : > { %v2230_v29 = vpop.permute.xlu1 %2229 }
 0x6ba   : > { %v2354_v33 = vsel %vm741_vm1, %v2230_v29, 0.0 }
 0x6bb   : > { %2355 = vadd.xlane.f32.xlu1 %v2354_v33  ;;  %2352 = vadd.xlane.f32.xlu0 %v2351_v12 }
 0x6bd   : > { %v2234_v16 = vpop.permute.xlu1 %2233 }
 0x6be   : > { %v2360_v51 = vsel %vm741_vm1, %v2234_v16, 0.0 }
 0x6bf   : > { %2361 = vadd.xlane.f32.xlu1 %v2360_v51  ;;  %2358 = vadd.xlane.f32.xlu0 %v2357_v5 }
 0x6e8   : > { %v2269_v8 = vpop.xlane.xlu0 %2268 }
 0x6e9   : > { %v5664_v62 = vpop.f32.mrb[2].mxu0 }
 0x6ea   : > { %6265 = vst [vmem:[#allocation44_spill] sm:$0xff] %v5664_v62  ;;  %v5666_v45 = vpop.f32.mrb[3].mxu0 }
 0x6eb   : > { %6266 = vst [vmem:[#allocation46_spill] sm:$0xff] %v5666_v45 }
 0x6ec   : > { %v2275_v18 = vpop.xlane.xlu0 %2274 }
 0x6ed   : > { %v2415_v21 = vrot.slane %v2275_v18, %v4749_v17 }
 0x6f1   : > { %v5668_v36 = vpop.f32.mrb[4].mxu0 }
 0x6f2   : > { %v5670_v57 = vpop.f32.mrb[5].mxu0 }
 0x710   : > { %v2272_v54 = vpop.xlane.xlu1 %2271 }
 0x711   : > { %v2410_v4 = vrot.slane %v2272_v54, %v4751_v19 }
 0x714   : > { %v2278_v59 = vpop.xlane.xlu0 %2277 }
 0x715   : > { %v2419_v50 = vrot.slane %v2278_v59, %v4751_v19  ;;  %v2406_v59 = vrot.slane %v2269_v8, %v4749_v17 }
 0x718   : > { %v2284_v0 = vpop.xlane.xlu1 %2283  ;;  %v2281_v29 = vpop.xlane.xlu0 %2280 }
 0x719   : > { %v2428_v63 = vrot.slane %v2284_v0, %v4751_v19  ;;  %v2424_v23 = vrot.slane %v2281_v29, %v4749_v17  ;;  %v2420_v0 = vsel %vm881_vm3, %v2419_v50, %v2415_v21 }
 0x71b   : > { %v2429_v29 = vsel %vm881_vm3, %v2428_v63, %v2424_v23 }
 0x71c   : > { %v5672_v33 = vpop.xlane.xlu1 %2319  ;;  %v5674_v12 = vpop.xlane.xlu0 %2316 }
 0x720   : > { %v2326_v10 = vpop.xlane.xlu1 %2325  ;;  %v2323_v16 = vpop.xlane.xlu0 %2322 }
 0x721   : > { %v2491_v63 = vrot.slane %v2326_v10, %v4751_v19  ;;  %v2487_v50 = vrot.slane %v2323_v16, %v4749_v17 }
 0x724   : > { %v2290_v51 = vpop.xlane.xlu1 %2289  ;;  %v2287_v5 = vpop.xlane.xlu0 %2286 }
 0x725   : > { %v2437_v6 = vrot.slane %v2290_v51, %v4751_v19  ;;  %v2433_v61 = vrot.slane %v2287_v5, %v4749_v17  ;;  %v2411_v51 = vsel %vm881_vm3, %v2410_v4, %v2406_v59  ;;  %v2482_v4 = vrot.slane %v5672_v33, %v4751_v19 }
 0x726   : > { %v2547_v8 = vsel %vm1018_vm4, %v2420_v0, %v2411_v51  ;;  %v2492_v0 = vsel %vm881_vm3, %v2491_v63, %v2487_v50 }
 0x727   : > { %v2438_v5 = vsel %vm881_vm3, %v2437_v6, %v2433_v61  ;;  %v2548_v23 = vsel %vm1020_vm5, %v2429_v29, %v2547_v8 }
 0x728   : > { %v2332_v62 = vpop.xlane.xlu1 %2331  ;;  %v2329_v45 = vpop.xlane.xlu0 %2328  ;;  %v2549_v61 = vsel %vm1022_vm6, %v2438_v5, %v2548_v23 }
 0x72c   : > { %v2296_v32 = vpop.xlane.xlu1 %2295  ;;  %v2293_v38 = vpop.xlane.xlu0 %2292 }
 0x72d   : > { %v2446_v53 = vrot.slane %v2296_v32, %v4751_v19  ;;  %v2442_v26 = vrot.slane %v2293_v38, %v4749_v17 }
 0x72f   : > { %v2447_v21 = vsel %vm881_vm3, %v2446_v53, %v2442_v26 }
 0x730   : > { %v2338_v31 = vpop.xlane.xlu1 %2337  ;;  %v2335_v2 = vpop.xlane.xlu0 %2334  ;;  %v2550_v26 = vsel %vm1024_vm7, %v2447_v21, %v2549_v61 }
 0x731   : > { %v2509_v16 = vrot.slane %v2338_v31, %v4751_v19  ;;  %v2505_v33 = vrot.slane %v2335_v2, %v4749_v17 }
 0x734   : > { %v2302_v30 = vpop.xlane.xlu1 %2301  ;;  %v2299_v1 = vpop.xlane.xlu0 %2298 }
 0x735   : > { %v2455_v18 = vrot.slane %v2302_v30, %v4751_v19  ;;  %v2451_v54 = vrot.slane %v2299_v1, %v4749_v17  ;;  %v2500_v1 = vrot.slane %v2332_v62, %v4751_v19  ;;  %v2496_v30 = vrot.slane %v2329_v45, %v4749_v17 }
 0x737   : > { %v2456_v6 = vsel %vm881_vm3, %v2455_v18, %v2451_v54  ;;  %v2501_v51 = vsel %vm881_vm3, %v2500_v1, %v2496_v30 }
 0x738   : > { %v5676_v34 = vpop.xlane.xlu1 %2343  ;;  %v2341_v58 = vpop.xlane.xlu0 %2340  ;;  %v2551_v62 = vsel %vm1026_vm8, %v2456_v6, %v2550_v26 }
 0x739   : > { %v2518_v45 = vrot.slane %v5676_v34, %v4751_v19  ;;  %v2514_v29 = vrot.slane %v2341_v58, %v4749_v17  ;;  %v2510_v34 = vsel %vm881_vm3, %v2509_v16, %v2505_v33 }
 0x73b   : > { %v2519_v23 = vsel %vm881_vm3, %v2518_v45, %v2514_v29 }
 0x73c   : > { %v2308_v56 = vpop.xlane.xlu1 %2307  ;;  %v2305_v40 = vpop.xlane.xlu0 %2304 }
 0x73d   : > { %v2464_v55 = vrot.slane %v2308_v56, %v4751_v19  ;;  %v2460_v32 = vrot.slane %v2305_v40, %v4749_v17  ;;  %v2478_v56 = vrot.slane %v5674_v12, %v4749_v17 }
 0x73f   : > { %v2465_v53 = vsel %vm881_vm3, %v2464_v55, %v2460_v32  ;;  %v2483_v54 = vsel %vm881_vm3, %v2482_v4, %v2478_v56 }
 0x740   : > { %v2350_v37 = vpop.xlane.xlu1 %2349  ;;  %v2347_v38 = vpop.xlane.xlu0 %2346  ;;  %v2552_v2 = vsel %vm1028_vm9, %v2465_v53, %v2551_v62  ;;  %v2554_v21 = vsel %vm1018_vm4, %v2492_v0, %v2483_v54 }
 0x741   : > { %v2527_v55 = vrot.slane %v2350_v37, %v4751_v19  ;;  %v2523_v18 = vrot.slane %v2347_v38, %v4749_v17  ;;  %v2555_v63 = vsel %vm1020_vm5, %v2501_v51, %v2554_v21 }
 0x742   : > { %v2556_v56 = vsel %vm1022_vm6, %v2510_v34, %v2555_v63 }
 0x743   : > { %v2528_v50 = vsel %vm881_vm3, %v2527_v55, %v2523_v18  ;;  %v2557_v30 = vsel %vm1024_vm7, %v2519_v23, %v2556_v56  ;;  %v6281_v23 = vld [vmem:[#allocation16_spill] sm:$0xff] }
 0x744   : > { %v2314_v40 = vpop.xlane.xlu1 %2313  ;;  %v2311_v10 = vpop.xlane.xlu0 %2310  ;;  %v2558_v53 = vsel %vm1026_vm8, %v2528_v50, %v2557_v30 }
 0x745   : > { %v2473_v12 = vrot.slane %v2314_v40, %v4751_v19  ;;  %v2469_v59 = vrot.slane %v2311_v10, %v4749_v17 }
 0x747   : > { %v2474_v31 = vsel %vm881_vm3, %v2473_v12, %v2469_v59 }
 0x748   : > { %v2356_v5 = vpop.xlane.xlu1 %2355  ;;  %v2353_v32 = vpop.xlane.xlu0 %2352  ;;  %v2553_v8 = vsel %vm1030_vm10, %v2474_v31, %v2552_v2 }
 0x749   : > { %v2536_v58 = vrot.slane %v2356_v5, %v4751_v19  ;;  %v2532_v37 = vrot.slane %v2353_v32, %v4749_v17  ;;  %v2638_v38 = vadd.f32 %v5670_v57, %v2553_v8 }
 0x74b   : > { %v2646_v4 = vsel %vm741_vm1, %v2638_v38, -inf  ;;  %v2537_v61 = vsel %vm881_vm3, %v2536_v58, %v2532_v37  ;;  %v6280_v58 = vld [vmem:[#allocation24_spill] sm:$0xff] }
 0x74c   : > { %v2362_v6 = vpop.xlane.xlu1 %2361  ;;  %v2359_v1 = vpop.xlane.xlu0 %2358  ;;  %2647 = vmax.xlane.f32.xlu0 %v2646_v4  ;;  %v2559_v10 = vsel %vm1028_vm9, %v2537_v61, %v2558_v53 }
 0x74d   : > { %v2545_v57 = vrot.slane %v2362_v6, %v4751_v19  ;;  %v2541_v26 = vrot.slane %v2359_v1, %v4749_v17  ;;  %v6282_v1 = vld [vmem:[#allocation17_spill] sm:$0xff] }
 0x74f   : > { %v2546_v40 = vsel %vm881_vm3, %v2545_v57, %v2541_v26 }
 0x750   : > { %v2560_v16 = vsel %vm1030_vm10, %v2546_v40, %v2559_v10  ;;  %v6283_v40 = vld [vmem:[#allocation33_spill] sm:$0xff] }
 0x751   : > { %v2643_v33 = vadd.f32 %v5668_v36, %v2560_v16 }
 0x753   : > { %v2649_v12 = vsel %vm741_vm1, %v2643_v33, -inf }
 0x754   : > { %2650 = vmax.xlane.f32.xlu1 %v2649_v12 }
 0x762   : > { %4152 = vrot.lane.b32.xlu0 %v4874_v22, %s4461_s10 }
 0x765   : > { %4157 = vrot.lane.b32.xlu1 %v4874_v22, %s4462_s8 }
 0x766   : > { %2755 = vrot.lane.b32.xlu0 %v5414_v35, %s4459_s9 }
 0x769   : > { %3107 = vrot.lane.b32.xlu1 %v4757_v27, %s4462_s8 }
 0x76a   : > { %2759 = vrot.lane.b32.xlu0 %v5420_v48, %s4459_s9 }
 0x76d   : > { %3109 = vrot.lane.b32.xlu1 %v4755_v25, %s4462_s8 }
 0x7d9   : > { %v2648_v36 = vpop.xlane.xlu0 %2647 }
 0x7da   : > { %v2652_v59 = vsub.f32 %v2638_v38, %v2648_v36 }
 0x7dc   : > { %v2654_v0 = vmul.f32 1.442695, %v2652_v59 }
 0x7dd   : > { %v4153_v62 = vpop.permute.xlu0 %4152 }
 0x7de   : > { %4182 = vpow2.f32 %v2654_v0  ;;  %v4155_v45 = vunpack.i.h.bf16 %v4153_v62  ;;  %v4154_v29 = vunpack.i.l.bf16 %v4153_v62  ;;  %v6284_v0 = vld [vmem:[#allocation19_spill] sm:$0xff] }
 0x7e0   : > { %v4002_v55 = vpack.c.bf16 %v4155_v45, %v4154_v29 }
 0x7e1   : > { %v2651_v18 = vpop.xlane.xlu1 %2650 }
 0x7e2   : > { %v2653_v31 = vsub.f32 %v2643_v33, %v2651_v18  ;;  %4003 = vmatprep.subr.bf16.mxu1 %v4002_v55  ;;  %v6285_v18 = vld [vmem:[#allocation25_spill] sm:$0xff] }
 0x7e3   : > { %4005 = vmatpush3.bf16.msra.mxu1 %v4002_v55 }
 0x7e4   : > { %v2656_v35 = vmul.f32 1.442695, %v2653_v31 }
 0x7e5   : > { %v4158_v27 = vpop.permute.xlu1 %4157 }
 0x7e6   : > { %4184 = vpow2.f32 %v2656_v35  ;;  %v4160_v2 = vunpack.i.h.bf16 %v4158_v27  ;;  %v4159_v48 = vunpack.i.l.bf16 %v4158_v27 }
 0x7e8   : > { %v4183_v54 = vpop.eup %4182  ;;  %v5759_v51 = vpack.c.bf16 %v4160_v2, %v4159_v48  ;;  %v6286_v2 = vld [vmem:[#allocation26_spill] sm:$0xff] }
 0x7e9   : > { %v2658_v25 = vsel %vm741_vm1, %v4183_v54, 0.0 }
 0x7ea   : > { %2659 = vadd.xlane.f32.xlu0 %v2658_v25  ;;  %4008 = vmatprep.subr.msk.bf16.mxu1 %vm4795_vm2, %v5759_v51 }
 0x7f0   : > { %v5765_v5 = vpop.eup %4184 }
 0x7f1   : > { %v2661_v32 = vsel %vm741_vm1, %v5765_v5, 0.0 }
 0x7f2   : > { %2662 = vadd.xlane.f32.xlu1 %v2661_v32 }
 0x800   : > { %2763 = vrot.lane.b32.xlu0 %v5439_v7, %s4459_s9  ;;  %v6267_v7 = vld [vmem:[#allocation23_spill] sm:$0xff] }
 0x803   : > { %2757 = vrot.lane.b32.xlu1 %v5443_v15, %s4459_s9  ;;  %v6268_v15 = vld [vmem:[#allocation21_spill] sm:$0xff] }
 0x804   : > { %2787 = vrot.lane.b32.xlu0 %v5447_v24, %s4459_s9  ;;  %v6269_v24 = vld [vmem:[#allocation39_spill] sm:$0xff] }
 0x807   : > { %2761 = vrot.lane.b32.xlu1 %v5451_v52, %s4459_s9  ;;  %v6270_v52 = vld [vmem:[#allocation38_spill] sm:$0xff] }
 0x808   : > { %2791 = vrot.lane.b32.xlu0 %v5455_v14, %s4459_s9  ;;  %v6271_v14 = vld [vmem:[#allocation29_spill] sm:$0xff] }
 0x80b   : > { %2765 = vrot.lane.b32.xlu1 %v5459_v9, %s4459_s9  ;;  %v6272_v9 = vld [vmem:[#allocation28_spill] sm:$0xff] }
 0x80c   : > { %2767 = vrot.lane.b32.xlu0 %v5463_v13, %s4459_s9  ;;  %v2756_v13 = vpop.permute.xlu0 %2755 }
 0x80f   : > { %2789 = vrot.lane.b32.xlu1 %v5467_v44, %s4459_s9  ;;  %v6273_v44 = vld [vmem:[#allocation42_spill] sm:$0xff] }
 0x810   : > { %2795 = vrot.lane.b32.xlu0 %v5471_v39, %s4459_s9  ;;  %v6274_v39 = vld [vmem:[#allocation41_spill] sm:$0xff] }
 0x813   : > { %2793 = vrot.lane.b32.xlu1 %v5475_v47, %s4459_s9  ;;  %v6275_v47 = vld [vmem:[#allocation18_spill] sm:$0xff] }
 0x814   : > { %2771 = vrot.lane.b32.xlu0 %v5479_v41, %s4459_s9  ;;  %v2851_v41 = vmul.f32 %v2756_v13, %v6275_v47 }
 0x817   : > { %2769 = vrot.lane.b32.xlu1 %v5483_v42, %s4459_s9  ;;  %v2760_v42 = vpop.permute.xlu0 %2759 }
 0x818   : > { %2799 = vrot.lane.b32.xlu0 %v5487_v49, %s4459_s9  ;;  %v6276_v49 = vld [vmem:[#allocation32_spill] sm:$0xff] }
 0x81b   : > { %2797 = vrot.lane.b32.xlu1 %v5491_v43, %s4459_s9  ;;  %v6277_v43 = vld [vmem:[#allocation22_spill] sm:$0xff] }
 0x81c   : > { %2775 = vrot.lane.b32.xlu0 %v5495_v60, %s4459_s9  ;;  %v2853_v60 = vmul.f32 %v2760_v42, %v6277_v43 }
 0x81f   : > { %2773 = vrot.lane.b32.xlu1 %v5499_v3, %s4459_s9  ;;  %v6278_v3 = vld [vmem:[#allocation31_spill] sm:$0xff] }
 0x820   : > { %2803 = vrot.lane.b32.xlu0 %v5503_v11, %s4459_s9  ;;  %v6279_v11 = vld [vmem:[#allocation45_spill] sm:$0xff] }
 0x823   : > { %2801 = vrot.lane.b32.xlu1 %v5507_v28, %s4459_s9  ;;  %v3108_v28 = vpop.permute.xlu1 %3107 }
 0x824   : > { %2779 = vrot.lane.b32.xlu0 %v5511_v20, %s4459_s9 }
 0x827   : > { %2777 = vrot.lane.b32.xlu1 %v6267_v7, %s4459_s9  ;;  %v3110_v8 = vpop.permute.xlu1 %3109 }
 0x828   : > { %2807 = vrot.lane.b32.xlu0 %v6268_v15, %s4459_s9 }
 0x82b   : > { %2805 = vrot.lane.b32.xlu1 %v6269_v24, %s4459_s9 }
 0x82c   : > { %2783 = vrot.lane.b32.xlu0 %v6270_v52, %s4459_s9  ;;  %v6288_v52 = vld [vmem:[#allocation20_spill] sm:$0xff] }
 0x82f   : > { %2781 = vrot.lane.b32.xlu1 %v6271_v14, %s4459_s9 }
 0x830   : > { %2811 = vrot.lane.b32.xlu0 %v6272_v9, %s4459_s9 }
 0x833   : > { %2809 = vrot.lane.b32.xlu1 %v6273_v44, %s4459_s9 }
 0x834   : > { %2815 = vrot.lane.b32.xlu0 %v6274_v39, %s4459_s9  ;;  %v6289_v39 = vld [vmem:[#allocation37_spill] sm:$0xff] }
 0x837   : > { %2785 = vrot.lane.b32.xlu1 %v6276_v49, %s4459_s9 }
 0x838   : > { %2915 = vrot.lane.b32.xlu0 %v2851_v41, %s4462_s8 }
 0x83b   : > { %2813 = vrot.lane.b32.xlu1 %v6278_v3, %s4459_s9 }
 0x83c   : > { %2919 = vrot.lane.b32.xlu0 %v2853_v60, %s4462_s8 }
 0x83f   : > { %2817 = vrot.lane.b32.xlu1 %v6279_v11, %s4459_s9 }
 0x877   : > { %v2660_v20 = vpop.xlane.xlu0 %2659 }
 0x878   : > { %4186 = vrcp.f32 %v2660_v20  ;;  %v6291_v20 = vld [vmem:[#allocation40_spill] sm:$0xff] }
 0x87b   : > { %v2764_v34 = vpop.permute.xlu0 %2763 }
 0x87c   : > { %v2855_v37 = vmul.f32 %v2764_v34, %v6280_v58 }
 0x87e   : > { %2923 = vrot.lane.b32.xlu0 %v2855_v37, %s4462_s8 }
 0x87f   : > { %v2663_v38 = vpop.xlane.xlu1 %2662  ;;  %v2788_v21 = vpop.permute.xlu0 %2787 }
 0x880   : > { %4188 = vrcp.f32 %v2663_v38  ;;  %v2867_v63 = vmul.f32 %v2788_v21, %v6281_v23  ;;  %v6292_v38 = vld [vmem:[#allocation30_spill] sm:$0xff] }
 0x882   : > { %v4187_v50 = vpop.eup %4186  ;;  %2947 = vrot.lane.b32.xlu0 %v2867_v63, %s4462_s8 }
 0x883   : > { %v2758_v4 = vpop.permute.xlu1 %2757  ;;  %v2792_v56 = vpop.permute.xlu0 %2791  ;;  %v2666_v61 = vmul.f32 %v4187_v50, %v4183_v54 }
 0x884   : > { %v2852_v6 = vmul.f32 %v2758_v4, %v6275_v47  ;;  %v2869_v30 = vmul.f32 %v2792_v56, %v6282_v1  ;;  %v6293_v4 = vld [vmem:[#allocation43_spill] sm:$0xff] }
 0x885   : > { %3924 = vmatprep.mubr.msk.f32.mxu1 %vm741_vm1, %v2666_v61 }
 0x886   : > { %2917 = vrot.lane.b32.xlu1 %v2852_v6, %s4462_s8  ;;  %2951 = vrot.lane.b32.xlu0 %v2869_v30, %s4462_s8 }
 0x887   : > { %v2762_v57 = vpop.permute.xlu1 %2761  ;;  %v2768_v26 = vpop.permute.xlu0 %2767 }
 0x888   : > { %v2854_v53 = vmul.f32 %v2762_v57, %v6277_v43  ;;  %v2857_v10 = vmul.f32 %v2768_v26, %v6283_v40  ;;  %v6290_v43 = vld [vmem:[#allocation27_spill] sm:$0xff] }
 0x88a   : > { %v4189_v16 = vpop.eup %4188  ;;  %2921 = vrot.lane.b32.xlu1 %v2854_v53, %s4462_s8  ;;  %2927 = vrot.lane.b32.xlu0 %v2857_v10, %s4462_s8 }
 0x88b   : > { %v2766_v33 = vpop.permute.xlu1 %2765  ;;  %v2796_v12 = vpop.permute.xlu0 %2795  ;;  %v2667_v36 = vmul.f32 %v4189_v16, %v5765_v5  ;;  %v6287_v5 = vld [vmem:[#allocation34_spill] sm:$0xff] }
 0x88c   : > { %v2856_v59 = vmul.f32 %v2766_v33, %v6280_v58  ;;  %v2871_v62 = vmul.f32 %v2796_v12, %v6284_v0 }
 0x88d   : > { %3925 = vmatmul.mubr.msk.f32.vlgmr.msra.gmra.mrb[8].mxu1 %vm741_vm1, %v2667_v36 }
 0x88e   : > { %4011 = vmatpush3.bf16.xpose.msk.msra.mxu1 %vm4795_vm2, %v5759_v51  ;;  %2925 = vrot.lane.b32.xlu1 %v2856_v59, %s4462_s8 }
 0x88f   : > { %2955 = vrot.lane.b32.xlu0 %v2871_v62, %s4462_s8  ;;  %3931 = vmatprep.mubr.msk.f32.mxu1 %vm741_vm1, %v3108_v28  ;;  %v2790_v45 = vpop.permute.xlu1 %2789  ;;  %v2772_v29 = vpop.permute.xlu0 %2771 }
 0x890   : > { %v2868_v55 = vmul.f32 %v2790_v45, %v6281_v23  ;;  %v2859_v31 = vmul.f32 %v2772_v29, %v6285_v18 }
 0x892   : > { %2949 = vrot.lane.b32.xlu1 %v2868_v55, %s4462_s8 }
 0x893   : > { %2931 = vrot.lane.b32.xlu0 %v2859_v31, %s4462_s8  ;;  %v2794_v35 = vpop.permute.xlu1 %2793  ;;  %v2800_v27 = vpop.permute.xlu0 %2799 }
 0x894   : > { %v2870_v46 = vmul.f32 %v2794_v35, %v6282_v1  ;;  %v2873_v48 = vmul.f32 %v2800_v27, %v6286_v2 }
 0x895   : > { %3932 = vmatmul.mubr.msk.f32.vlgmr.msra.gmra.mrb[10].mxu1 %vm741_vm1, %v3110_v8 }
 0x896   : > { %2953 = vrot.lane.b32.xlu1 %v2870_v46, %s4462_s8 }
 0x897   : > { %2959 = vrot.lane.b32.xlu0 %v2873_v48, %s4462_s8  ;;  %v2770_v54 = vpop.permute.xlu1 %2769  ;;  %v2776_v51 = vpop.permute.xlu0 %2775 }
 0x898   : > { %v2858_v25 = vmul.f32 %v2770_v54, %v6283_v40  ;;  %v2861_v32 = vmul.f32 %v2776_v51, %v6287_v5 }
 0x89a   : > { %2929 = vrot.lane.b32.xlu1 %v2858_v25, %s4462_s8 }
 0x89b   : > { %2935 = vrot.lane.b32.xlu0 %v2861_v32, %s4462_s8  ;;  %v2798_v7 = vpop.permute.xlu1 %2797  ;;  %v2804_v15 = vpop.permute.xlu0 %2803 }
 0x89c   : > { %v2872_v24 = vmul.f32 %v2798_v7, %v6284_v0  ;;  %v2875_v14 = vmul.f32 %v2804_v15, %v6288_v52 }
 0x89e   : > { %2957 = vrot.lane.b32.xlu1 %v2872_v24, %s4462_s8 }
 0x89f   : > { %2963 = vrot.lane.b32.xlu0 %v2875_v14, %s4462_s8  ;;  %v2774_v9 = vpop.permute.xlu1 %2773  ;;  %v2780_v13 = vpop.permute.xlu0 %2779 }
 0x8a0   : > { %v2860_v44 = vmul.f32 %v2774_v9, %v6285_v18  ;;  %v2863_v47 = vmul.f32 %v2780_v13, %v6289_v39 }
 0x8a2   : > { %2933 = vrot.lane.b32.xlu1 %v2860_v44, %s4462_s8 }
 0x8a3   : > { %2939 = vrot.lane.b32.xlu0 %v2863_v47, %s4462_s8  ;;  %v2802_v41 = vpop.permute.xlu1 %2801  ;;  %v2808_v42 = vpop.permute.xlu0 %2807 }
 0x8a4   : > { %v2874_v49 = vmul.f32 %v2802_v41, %v6286_v2  ;;  %v2877_v60 = vmul.f32 %v2808_v42, %v6290_v43 }
 0x8a6   : > { %2961 = vrot.lane.b32.xlu1 %v2874_v49, %s4462_s8 }
 0x8a7   : > { %2967 = vrot.lane.b32.xlu0 %v2877_v60, %s4462_s8  ;;  %v2778_v3 = vpop.permute.xlu1 %2777  ;;  %v2784_v11 = vpop.permute.xlu0 %2783 }
 0x8a8   : > { %v2862_v28 = vmul.f32 %v2778_v3, %v6287_v5  ;;  %v2865_v8 = vmul.f32 %v2784_v11, %v6291_v20 }
 0x8aa   : > { %2937 = vrot.lane.b32.xlu1 %v2862_v28, %s4462_s8 }
 0x8ab   : > { %2943 = vrot.lane.b32.xlu0 %v2865_v8, %s4462_s8  ;;  %v2806_v34 = vpop.permute.xlu1 %2805  ;;  %v2812_v58 = vpop.permute.xlu0 %2811 }
 0x8ac   : > { %v2876_v37 = vmul.f32 %v2806_v34, %v6288_v52  ;;  %v2879_v21 = vmul.f32 %v2812_v58, %v6292_v38 }
 0x8ae   : > { %2965 = vrot.lane.b32.xlu1 %v2876_v37, %s4462_s8 }
 0x8af   : > { %2971 = vrot.lane.b32.xlu0 %v2879_v21, %s4462_s8  ;;  %v2782_v23 = vpop.permute.xlu1 %2781  ;;  %v2816_v63 = vpop.permute.xlu0 %2815 }
 0x8b0   : > { %v2864_v50 = vmul.f32 %v2782_v23, %v6289_v39  ;;  %v2881_v56 = vmul.f32 %v2816_v63, %v6293_v4 }
 0x8b2   : > { %2941 = vrot.lane.b32.xlu1 %v2864_v50, %s4462_s8 }
 0x8b3   : > { %2975 = vrot.lane.b32.xlu0 %v2881_v56, %s4462_s8  ;;  %v2810_v61 = vpop.permute.xlu1 %2809  ;;  %v2916_v10 = vpop.permute.xlu0 %2915 }
 0x8b4   : > { %v2878_v6 = vmul.f32 %v2810_v61, %v6290_v43  ;;  %v3011_v16 = vsel %vm741_vm1, %v2916_v10, 0.0 }
 0x8b6   : > { %2969 = vrot.lane.b32.xlu1 %v2878_v6, %s4462_s8 }
 0x8b7   : > { %v2786_v1 = vpop.permute.xlu1 %2785  ;;  %v2920_v33 = vpop.permute.xlu0 %2919 }
 0x8b8   : > { %v2866_v30 = vmul.f32 %v2786_v1, %v6291_v20  ;;  %v3017_v12 = vsel %vm741_vm1, %v2920_v33, 0.0 }
 0x8ba   : > { %2945 = vrot.lane.b32.xlu1 %v2866_v30, %s4462_s8 }
 0x8bb   : > { %v2814_v57 = vpop.permute.xlu1 %2813 }
 0x8bc   : > { %v2880_v26 = vmul.f32 %v2814_v57, %v6292_v38 }
 0x8be   : > { %2973 = vrot.lane.b32.xlu1 %v2880_v26, %s4462_s8 }
 0x8bf   : > { %v2818_v53 = vpop.permute.xlu1 %2817 }
 0x8c0   : > { %v2882_v40 = vmul.f32 %v2818_v53, %v6293_v4 }
 0x8c2   : > { %2977 = vrot.lane.b32.xlu1 %v2882_v40, %s4462_s8 }
 0x8d2   : > { %3012 = vadd.xlane.f32.xlu0 %v3011_v16 }
 0x8d6   : > { %3018 = vadd.xlane.f32.xlu0 %v3017_v12 }
 0x8f0   : > { %v2924_v36 = vpop.permute.xlu0 %2923 }
 0x8f1   : > { %v3023_v35 = vsel %vm741_vm1, %v2924_v36, 0.0 }
 0x8f4   : > { %v2948_v59 = vpop.permute.xlu0 %2947 }
 0x8f5   : > { %v3059_v48 = vsel %vm741_vm1, %v2948_v59, 0.0 }
 0x8f8   : > { %v2918_v0 = vpop.permute.xlu1 %2917  ;;  %v2952_v62 = vpop.permute.xlu0 %2951 }
 0x8f9   : > { %v3014_v45 = vsel %vm741_vm1, %v2918_v0, 0.0  ;;  %v3065_v5 = vsel %vm741_vm1, %v2952_v62, 0.0 }
 0x8fa   : > { %3015 = vadd.xlane.f32.xlu1 %v3014_v45 }
 0x8fc   : > { %v2922_v29 = vpop.permute.xlu1 %2921  ;;  %v2928_v55 = vpop.permute.xlu0 %2927 }
 0x8fd   : > { %v3020_v18 = vsel %vm741_vm1, %v2922_v29, 0.0  ;;  %v3029_v24 = vsel %vm741_vm1, %v2928_v55, 0.0 }
 0x8fe   : > { %3021 = vadd.xlane.f32.xlu0 %v3020_v18 }
 0x900   : > { %v2926_v31 = vpop.permute.xlu1 %2925 }
 0x901   : > { %v3026_v27 = vsel %vm741_vm1, %v2926_v31, 0.0  ;;  %v2956_v46 = vpop.permute.xlu0 %2955 }
 0x902   : > { %3027 = vadd.xlane.f32.xlu1 %v3026_v27  ;;  %3024 = vadd.xlane.f32.xlu0 %v3023_v35  ;;  %v3071_v13 = vsel %vm741_vm1, %v2956_v46, 0.0 }
 0x904   : > { %v2950_v2 = vpop.permute.xlu1 %2949 }
 0x905   : > { %v3062_v54 = vsel %vm741_vm1, %v2950_v2, 0.0  ;;  %v2932_v51 = vpop.permute.xlu0 %2931 }
 0x906   : > { %3063 = vadd.xlane.f32.xlu1 %v3062_v54  ;;  %3060 = vadd.xlane.f32.xlu0 %v3059_v48  ;;  %v3035_v41 = vsel %vm741_vm1, %v2932_v51, 0.0 }
 0x908   : > { %v2954_v25 = vpop.permute.xlu1 %2953 }
 0x909   : > { %v3068_v32 = vsel %vm741_vm1, %v2954_v25, 0.0  ;;  %v2960_v7 = vpop.permute.xlu0 %2959 }
 0x90a   : > { %3069 = vadd.xlane.f32.xlu1 %v3068_v32  ;;  %3066 = vadd.xlane.f32.xlu0 %v3065_v5  ;;  %v3077_v43 = vsel %vm741_vm1, %v2960_v7, 0.0 }
 0x90c   : > { %v2930_v15 = vpop.permute.xlu1 %2929 }
 0x90d   : > { %v3032_v52 = vsel %vm741_vm1, %v2930_v15, 0.0  ;;  %v2936_v14 = vpop.permute.xlu0 %2935 }
 0x90e   : > { %3033 = vadd.xlane.f32.xlu1 %v3032_v52  ;;  %3030 = vadd.xlane.f32.xlu0 %v3029_v24  ;;  %v3041_v28 = vsel %vm741_vm1, %v2936_v14, 0.0 }
 0x910   : > { %v2958_v9 = vpop.permute.xlu1 %2957 }
 0x911   : > { %v3074_v44 = vsel %vm741_vm1, %v2958_v9, 0.0  ;;  %v2964_v39 = vpop.permute.xlu0 %2963 }
 0x912   : > { %3075 = vadd.xlane.f32.xlu1 %v3074_v44  ;;  %3072 = vadd.xlane.f32.xlu0 %v3071_v13  ;;  %v3083_v58 = vsel %vm741_vm1, %v2964_v39, 0.0 }
 0x914   : > { %v2934_v47 = vpop.permute.xlu1 %2933 }
 0x915   : > { %v3038_v42 = vsel %vm741_vm1, %v2934_v47, 0.0  ;;  %v2940_v3 = vpop.permute.xlu0 %2939 }
 0x916   : > { %3039 = vadd.xlane.f32.xlu1 %v3038_v42  ;;  %3036 = vadd.xlane.f32.xlu0 %v3035_v41  ;;  %v3047_v21 = vsel %vm741_vm1, %v2940_v3, 0.0 }
 0x918   : > { %v2962_v49 = vpop.permute.xlu1 %2961 }
 0x919   : > { %v3080_v60 = vsel %vm741_vm1, %v2962_v49, 0.0  ;;  %v2968_v8 = vpop.permute.xlu0 %2967 }
 0x91a   : > { %3081 = vadd.xlane.f32.xlu1 %v3080_v60  ;;  %3078 = vadd.xlane.f32.xlu0 %v3077_v43  ;;  %v3089_v4 = vsel %vm741_vm1, %v2968_v8, 0.0 }
 0x91c   : > { %v2938_v11 = vpop.permute.xlu1 %2937 }
 0x91d   : > { %v3044_v20 = vsel %vm741_vm1, %v2938_v11, 0.0  ;;  %v2944_v63 = vpop.permute.xlu0 %2943 }
 0x91e   : > { %3045 = vadd.xlane.f32.xlu1 %v3044_v20  ;;  %3042 = vadd.xlane.f32.xlu0 %v3041_v28  ;;  %v3053_v1 = vsel %vm741_vm1, %v2944_v63, 0.0 }
 0x920   : > { %v2966_v34 = vpop.permute.xlu1 %2965 }
 0x921   : > { %v3086_v37 = vsel %vm741_vm1, %v2966_v34, 0.0  ;;  %v2972_v61 = vpop.permute.xlu0 %2971 }
 0x922   : > { %3087 = vadd.xlane.f32.xlu1 %v3086_v37  ;;  %3084 = vadd.xlane.f32.xlu0 %v3083_v58  ;;  %v3095_v26 = vsel %vm741_vm1, %v2972_v61, 0.0 }
 0x924   : > { %v2942_v38 = vpop.permute.xlu1 %2941 }
 0x925   : > { %v3050_v23 = vsel %vm741_vm1, %v2942_v38, 0.0  ;;  %v2976_v40 = vpop.permute.xlu0 %2975 }
 0x926   : > { %3051 = vadd.xlane.f32.xlu1 %v3050_v23  ;;  %3048 = vadd.xlane.f32.xlu0 %v3047_v21  ;;  %v3101_v16 = vsel %vm741_vm1, %v2976_v40, 0.0 }
 0x928   : > { %v2970_v50 = vpop.permute.xlu1 %2969 }
 0x929   : > { %v3092_v56 = vsel %vm741_vm1, %v2970_v50, 0.0 }
 0x92a   : > { %3093 = vadd.xlane.f32.xlu1 %v3092_v56  ;;  %3090 = vadd.xlane.f32.xlu0 %v3089_v4 }
 0x92c   : > { %v2946_v6 = vpop.permute.xlu1 %2945 }
 0x92d   : > { %v3056_v30 = vsel %vm741_vm1, %v2946_v6, 0.0 }
 0x92e   : > { %3057 = vadd.xlane.f32.xlu1 %v3056_v30  ;;  %3054 = vadd.xlane.f32.xlu0 %v3053_v1 }
 0x930   : > { %v2974_v57 = vpop.permute.xlu1 %2973 }
 0x931   : > { %v3098_v53 = vsel %vm741_vm1, %v2974_v57, 0.0 }
 0x932   : > { %3099 = vadd.xlane.f32.xlu1 %v3098_v53  ;;  %3096 = vadd.xlane.f32.xlu0 %v3095_v26 }
 0x934   : > { %v2978_v10 = vpop.permute.xlu1 %2977 }
 0x935   : > { %v3104_v33 = vsel %vm741_vm1, %v2978_v10, 0.0 }
 0x936   : > { %3105 = vadd.xlane.f32.xlu1 %v3104_v33  ;;  %3102 = vadd.xlane.f32.xlu0 %v3101_v16 }
 0x95f   : > { %v3013_v62 = vpop.xlane.xlu0 %3012 }
 0x960   : > { %v5933_v12 = vpop.f32.mrb[8].mxu1  ;;  %v3150_v28 = vrot.slane %v3013_v62, %v4749_v17 }
 0x961   : > { %v5935_v36 = vpop.f32.mrb[9].mxu1 }
 0x963   : > { %v3019_v45 = vpop.xlane.xlu0 %3018 }
 0x964   : > { %v3159_v47 = vrot.slane %v3019_v45, %v4749_v17 }
 0x968   : > { %v5937_v59 = vpop.f32.mrb[10].mxu1 }
 0x969   : > { %v5939_v0 = vpop.f32.mrb[11].mxu1 }
 0x987   : > { %v3016_v29 = vpop.xlane.xlu1 %3015 }
 0x988   : > { %v3154_v41 = vrot.slane %v3016_v29, %v4751_v19 }
 0x98a   : > { %v3155_v37 = vsel %vm881_vm3, %v3154_v41, %v3150_v28 }
 0x98b   : > { %v3022_v55 = vpop.xlane.xlu0 %3021 }
 0x98c   : > { %v3163_v13 = vrot.slane %v3022_v55, %v4751_v19 }
 0x98e   : > { %v3164_v20 = vsel %vm881_vm3, %v3163_v13, %v3159_v47 }
 0x98f   : > { %v3028_v18 = vpop.xlane.xlu1 %3027  ;;  %v3025_v31 = vpop.xlane.xlu0 %3024  ;;  %v3291_v4 = vsel %vm1018_vm4, %v3164_v20, %v3155_v37 }
 0x990   : > { %v3172_v44 = vrot.slane %v3028_v18, %v4751_v19  ;;  %v3168_v39 = vrot.slane %v3025_v31, %v4749_v17 }
 0x992   : > { %v3173_v8 = vsel %vm881_vm3, %v3172_v44, %v3168_v39 }
 0x993   : > { %v5941_v35 = vpop.xlane.xlu1 %3063  ;;  %v5943_v27 = vpop.xlane.xlu0 %3060  ;;  %v3292_v61 = vsel %vm1020_vm5, %v3173_v8, %v3291_v4 }
 0x994   : > { %v3226_v30 = vrot.slane %v5941_v35, %v4751_v19  ;;  %v3222_v57 = vrot.slane %v5943_v27, %v4749_v17 }
 0x997   : > { %v3070_v46 = vpop.xlane.xlu1 %3069  ;;  %v3067_v2 = vpop.xlane.xlu0 %3066 }
 0x998   : > { %v3235_v6 = vrot.slane %v3070_v46, %v4751_v19  ;;  %v3231_v1 = vrot.slane %v3067_v2, %v4749_v17 }
 0x99a   : > { %v3236_v35 = vsel %vm881_vm3, %v3235_v6, %v3231_v1  ;;  %v6295_v1 = vld [vmem:[#allocation44_spill] sm:$0xff] }
 0x99b   : > { %v3034_v48 = vpop.xlane.xlu1 %3033  ;;  %v3031_v54 = vpop.xlane.xlu0 %3030 }
 0x99c   : > { %v3181_v42 = vrot.slane %v3034_v48, %v4751_v19  ;;  %v3177_v49 = vrot.slane %v3031_v54, %v4749_v17 }
 0x99e   : > { %v3182_v38 = vsel %vm881_vm3, %v3181_v42, %v3177_v49 }
 0x99f   : > { %v3076_v51 = vpop.xlane.xlu1 %3075  ;;  %v3073_v25 = vpop.xlane.xlu0 %3072  ;;  %v3293_v26 = vsel %vm1022_vm6, %v3182_v38, %v3292_v61 }
 0x9a0   : > { %v3244_v40 = vrot.slane %v3076_v51, %v4751_v19  ;;  %v3240_v10 = vrot.slane %v3073_v25, %v4749_v17 }
 0x9a3   : > { %v3040_v5 = vpop.xlane.xlu1 %3039  ;;  %v3037_v32 = vpop.xlane.xlu0 %3036 }
 0x9a4   : > { %v3190_v3 = vrot.slane %v3040_v5, %v4751_v19  ;;  %v3186_v11 = vrot.slane %v3037_v32, %v4749_v17  ;;  %v3227_v5 = vsel %vm881_vm3, %v3226_v30, %v3222_v57  ;;  %v3245_v32 = vsel %vm881_vm3, %v3244_v40, %v3240_v10 }
 0x9a5   : > { %v3298_v44 = vsel %vm1018_vm4, %v3236_v35, %v3227_v5  ;;  %v3535_v35 = vld [vmem:[#allocation10 + $0x28] sm:$0xff] }
 0x9a6   : > { %v3191_v56 = vsel %vm881_vm3, %v3190_v3, %v3186_v11  ;;  %v3299_v47 = vsel %vm1020_vm5, %v3245_v32, %v3298_v44 }
 0x9a7   : > { %v3082_v7 = vpop.xlane.xlu1 %3081  ;;  %v3079_v15 = vpop.xlane.xlu0 %3078  ;;  %v3294_v16 = vsel %vm1024_vm7, %v3191_v56, %v3293_v26 }
 0x9a8   : > { %v3253_v29 = vrot.slane %v3082_v7, %v4751_v19  ;;  %v3249_v55 = vrot.slane %v3079_v15, %v4749_v17 }
 0x9ab   : > { %v3046_v24 = vpop.xlane.xlu1 %3045  ;;  %v3043_v52 = vpop.xlane.xlu0 %3042 }
 0x9ac   : > { %v3199_v34 = vrot.slane %v3046_v24, %v4751_v19  ;;  %v3195_v58 = vrot.slane %v3043_v52, %v4749_v17  ;;  %v3254_v52 = vsel %vm881_vm3, %v3253_v29, %v3249_v55  ;;  %v3533_v55 = vld [vmem:[#allocation10 + $0x18] sm:$0xff] }
 0x9ad   : > { %v3300_v49 = vsel %vm1022_vm6, %v3254_v52, %v3299_v47  ;;  %v6297_v52 = vld [vmem:[#allocation35_spill] sm:$0xff] }
 0x9ae   : > { %v3200_v53 = vsel %vm881_vm3, %v3199_v34, %v3195_v58 }
 0x9af   : > { %v5945_v14 = vpop.xlane.xlu1 %3087  ;;  %v3085_v9 = vpop.xlane.xlu0 %3084  ;;  %v3295_v27 = vsel %vm1026_vm8, %v3200_v53, %v3294_v16 }
 0x9b0   : > { %v3262_v46 = vrot.slane %v5945_v14, %v4751_v19  ;;  %v3258_v2 = vrot.slane %v3085_v9, %v4749_v17 }
 0x9b2   : > { %v3263_v39 = vsel %vm881_vm3, %v3262_v46, %v3258_v2  ;;  %v3536_v46 = vld [vmem:[#allocation10 + $0x30] sm:$0xff]  ;;  %v3537_v2 = vld [vmem:[#allocation10 + $0x38] sm:$0xff] }
 0x9b3   : > { %v3052_v43 = vpop.xlane.xlu1 %3051  ;;  %v3049_v60 = vpop.xlane.xlu0 %3048  ;;  %v3301_v11 = vsel %vm1024_vm7, %v3263_v39, %v3300_v49 }
 0x9b4   : > { %v3208_v21 = vrot.slane %v3052_v43, %v4751_v19  ;;  %v3204_v23 = vrot.slane %v3049_v60, %v4749_v17 }
 0x9b6   : > { %v3209_v33 = vsel %vm881_vm3, %v3208_v21, %v3204_v23 }
 0x9b7   : > { %v3094_v63 = vpop.xlane.xlu1 %3093  ;;  %v3091_v50 = vpop.xlane.xlu0 %3090  ;;  %v3296_v25 = vsel %vm1028_vm9, %v3209_v33, %v3295_v27 }
 0x9b8   : > { %v3271_v48 = vrot.slane %v3094_v63, %v4751_v19  ;;  %v3267_v54 = vrot.slane %v3091_v50, %v4749_v17 }
 0x9ba   : > { %v3272_v41 = vsel %vm881_vm3, %v3271_v48, %v3267_v54  ;;  %v4028_v48 = vpack.c.bf16 %v3537_v2, %v3536_v46 }
 0x9bb   : > { %v3058_v62 = vpop.xlane.xlu1 %3057  ;;  %v3055_v45 = vpop.xlane.xlu0 %3054  ;;  %v3302_v20 = vsel %vm1026_vm8, %v3272_v41, %v3301_v11 }
 0x9bc   : > { %v3217_v18 = vrot.slane %v3058_v62, %v4751_v19  ;;  %v3213_v31 = vrot.slane %v3055_v45, %v4749_v17  ;;  %v3530_v62 = vld [vmem:[#allocation10] sm:$0xff]  ;;  %v3532_v45 = vld [vmem:[#allocation10 + $0x10] sm:$0xff] }
 0x9be   : > { %v3218_v51 = vsel %vm881_vm3, %v3217_v18, %v3213_v31  ;;  %v4020_v18 = vpack.c.bf16 %v3533_v55, %v3532_v45  ;;  %v3534_v31 = vld [vmem:[#allocation10 + $0x20] sm:$0xff] }
 0x9bf   : > { %v3100_v7 = vpop.xlane.xlu1 %3099  ;;  %v3097_v15 = vpop.xlane.xlu0 %3096  ;;  %v3297_v24 = vsel %vm1030_vm10, %v3218_v51, %v3296_v25  ;;  %v4024_v27 = vpack.c.bf16 %v3535_v35, %v3534_v31 }
 0x9c0   : > { %v3280_v14 = vrot.slane %v3100_v7, %v4751_v19  ;;  %v3276_v9 = vrot.slane %v3097_v15, %v4749_v17  ;;  %v3382_v13 = vadd.f32 %v5939_v0, %v3297_v24  ;;  %v6296_v15 = vld [vmem:[#allocation36_spill] sm:$0xff] }
 0x9c2   : > { %v3390_v42 = vsel %vm741_vm1, %v3382_v13, -inf  ;;  %v3281_v43 = vsel %vm881_vm3, %v3280_v14, %v3276_v9 }
 0x9c3   : > { %v3106_v60 = vpop.xlane.xlu1 %3105  ;;  %v3103_v3 = vpop.xlane.xlu0 %3102  ;;  %3391 = vmax.xlane.f32.xlu0 %v3390_v42  ;;  %v3303_v34 = vsel %vm1028_vm9, %v3281_v43, %v3302_v20  ;;  %v3799_v42 = vld [vmem:[%s6098_s5] ss:$0 sm:$0xff] }
 0x9c4   : > { %v3289_v0 = vrot.slane %v3106_v60, %v4751_v19  ;;  %v3285_v28 = vrot.slane %v3103_v3, %v4749_v17 }
 0x9c6   : > { %v3290_v8 = vsel %vm881_vm3, %v3289_v0, %v3285_v28 }
 0x9c7   : > { %v3304_v58 = vsel %vm1030_vm10, %v3290_v8, %v3303_v34 }
 0x9c8   : > { %v3387_v37 = vadd.f32 %v5937_v59, %v3304_v58  ;;  %v6294_v59 = vld [vmem:[#allocation46_spill] sm:$0xff] }
 0x9ca   : > { %v3393_v38 = vsel %vm741_vm1, %v3387_v37, -inf }
 0x9cb   : > { %3394 = vmax.xlane.f32.xlu1 %v3393_v38 }
 0xa50   : > { %v3392_v21 = vpop.xlane.xlu0 %3391 }
 0xa51   : > { %v3396_v23 = vsub.f32 %v3382_v13, %v3392_v21 }
 0xa53   : > { %v3398_v63 = vmul.f32 1.442695, %v3396_v23 }
 0xa55   : > { %4190 = vpow2.f32 %v3398_v63 }
 0xa58   : > { %v3395_v19 = vpop.xlane.xlu1 %3394 }
 0xa59   : > { %v3397_v50 = vsub.f32 %v3387_v37, %v3395_v19 }
 0xa5b   : > { %v3400_v17 = vmul.f32 1.442695, %v3397_v50 }
 0xa5d   : > { %4192 = vpow2.f32 %v3400_v17 }
 0xa5f   : > { %v4191_v4 = vpop.eup %4190 }
 0xa60   : > { %v3402_v56 = vsel %vm741_vm1, %v4191_v4, 0.0 }
 0xa61   : > { %3403 = vadd.xlane.f32.xlu0 %v3402_v56 }
 0xa67   : > { %v4193_v61 = vpop.eup %4192 }
 0xa68   : > { %v3405_v6 = vsel %vm741_vm1, %v4193_v61, 0.0 }
 0xa69   : > { %3406 = vadd.xlane.f32.xlu1 %v3405_v6 }
 0xa77   : > { %4162 = vrot.lane.b32.xlu0 %v4874_v22, %s4458_s30 }
 0xa7a   : > { %3501 = vrot.lane.b32.xlu1 %v6294_v59, %s4458_s30 }
 0xa7b   : > { %3511 = vrot.lane.b32.xlu0 %v5933_v12, %s4461_s10 }
 0xa7e   : > { %3503 = vrot.lane.b32.xlu1 %v6295_v1, %s4458_s30  ;;  %s4372_s30 = scalar_lea.vmem %s6044_s19, 256 }
 0xa7f   : > { %p4373_p3 = scmp.ne.s32.totalorder %s6044_s19, %s4372_s30 }
 0xa81   : > { %p4374_p5 = pnand %p4373_p3, %p4672_p10 }
 0xa82   : > { %3509 = vrot.lane.b32.xlu1 %v5935_v36, %s4461_s10  ;;  %v3531_v36 = vld [vmem:[#allocation10 + $0x8] sm:$0xff] }
 0xa83   : > { %v4016_v29 = vpack.c.bf16 %v3531_v36, %v3530_v62  ;;  %p4375_p7 = pneg %p4374_p5 }
 0xaee   : > { %v3404_v30 = vpop.xlane.xlu0 %3403 }
 0xaef   : > { %4194 = vrcp.f32 %v3404_v30 }
 0xaf2   : > { %v4163_v57 = vpop.permute.xlu0 %4162 }
 0xaf3   : > { %v4165_v26 = vunpack.i.h.bf16 %v4163_v57  ;;  %v4164_v53 = vunpack.i.l.bf16 %v4163_v57 }
 0xaf5   : > { %v4012_v40 = vpack.c.bf16 %v4165_v26, %v4164_v53 }
 0xaf6   : > { %v3407_v10 = vpop.xlane.xlu1 %3406  ;;  %v3512_v32 = vpop.permute.xlu0 %3511 }
 0xaf7   : > { %4196 = vrcp.f32 %v3407_v10  ;;  %4013 = vmatprep.subr.bf16.mxu0 %v4012_v40 }
 0xaf8   : > { %4015 = vmatpush3.bf16.msra.mxu0 %v4012_v40 }
 0xaf9   : > { %v4195_v22 = vpop.eup %4194  ;;  %4017 = vmatprep.subr.bf16.mxu0 %v4016_v29 }
 0xafa   : > { %v3410_v16 = vmul.f32 %v4195_v22, %v4191_v4  ;;  %v3502_v25 = vpop.permute.xlu1 %3501 }
 0xafb   : > { %v3523_v14 = vsel %vm741_vm1, %v6297_v52, %v3502_v25 }
 0xafc   : > { %3938 = vmatprep.mubr.msk.f32.mxu0 %vm741_vm1, %v3410_v16 }
 0xafe   : > { %v3504_v5 = vpop.permute.xlu1 %3503 }
 0xaff   : > { %v3524_v24 = vsel %vm741_vm1, %v6296_v15, %v3504_v5 }
 0xb00   : > { %v3526_v39 = vsel %vm366_vm0, %v3524_v24, %v3512_v32 }
 0xb01   : > { %v4197_v12 = vpop.eup %4196 }
 0xb02   : > { %v3411_v33 = vmul.f32 %v4197_v12, %v4193_v61  ;;  %v3510_v7 = vpop.permute.xlu1 %3509 }
 0xb03   : > { %v3525_v13 = vsel %vm366_vm0, %v3523_v14, %v3510_v7 }
 0xb04   : > { %3939 = vmatmul.mubr.msk.f32.vlgmr.msra.gmra.mrb[6].mxu0 %vm741_vm1, %v3411_v33 }
 0xb05   : > { %4019 = vmatpush3.bf16.msra.mxu0 %v4016_v29 }
 0xb06   : > { %4021 = vmatprep.subr.bf16.mxu0 %v4020_v18 }
 0xb09   : > { %4023 = vmatpush3.bf16.msra.mxu0 %v4020_v18 }
 0xb0a   : > { %4025 = vmatprep.subr.bf16.mxu0 %v4024_v27 }
 0xb0d   : > { %4027 = vmatpush3.bf16.msra.mxu0 %v4024_v27 }
 0xb0e   : > { %4029 = vmatprep.subr.bf16.mxu0 %v4028_v48 }
 0xb11   : > { %4031 = vmatpush3.bf16.msra.mxu0 %v4028_v48 }
 0xbd7   : > { %v3940_v54 = vpop.f32.mrb[6].mxu0 }
 0xbd8   : > { %3519 = vrot.lane.b32.xlu0 %v3940_v54, %s4459_s9  ;;  %v3490_v51 = vpop.f32.mrb[7].mxu0 }
 0xbd9   : > { %3517 = vrot.lane.b32.xlu1 %v3490_v51, %s4459_s9  ;;  %s4376_s9 = sshll.u32 %s4463_s25, 4  ;;  %s4377_s9 = int_to_ptr.vmem [resolvable:$false] %s4376_s9 }
 0xbda   : > { %s4378_s7 = scalar_lea.vmem %s4377_s9, 512  ;;  %p4379_p12 = scmp.lt.s32.totalorder %s6044_s19, %s4377_s9 }
 0xbdb   : > { %p4380_p1 = scmp.lt.s32.totalorder %s4378_s7, %s4372_s30 }
 0xbdd   : > { %p4381_p2 = por %p4380_p1, %p4379_p12 }
 0xbdf   : > { %p4382_p13 = pnand %p4381_p2, %p4375_p7 }
 0xc4a   : > { %v3520_v9 = vpop.permute.xlu0 %3519 }
 0xc4b   : > { %v3518_v44 = vpop.permute.xlu1 %3517  ;;  %v3529_v41 = vsel %vm3527_vm11, %v3526_v39, %v3520_v9 }
 0xc4c   : > { %v3528_v47 = vsel %vm3527_vm11, %v3525_v13, %v3518_v44 }
 0xc4d   : > { %3957 = vmatprep.mubr.msk.f32.mxu0 %vm3545_vm12, %v3528_v47 }
 0xc4e   : > { %3958 = vmatmul.mubr.msk.f32.vlgmr.msra.gmra.mrb[8].mxu0 %vm3545_vm12, %v3529_v41 }
 0xd21   : > { %v3959_v49 = vpop.f32.mrb[8].mxu0 }
 0xd22   : > { %v3624_v43 = vadd.f32 %v3959_v49, %v3799_v42  ;;  %v3618_v60 = vpop.f32.mrb[9].mxu0 }
 0xd23   : > { %v3619_v3 = vadd.f32 %v3799_v42, %v3618_v60 }
 0xd24   : > { %3628 = vst [vmem:[%s327_s17 + $0x8] sm:$0xff] %v3624_v43 }
 0xd25   : > { %3627 = vst [vmem:[%s327_s17] sm:$0xff] %v3619_v3 }
 0xd26   : > { %4385 = shalt.err (!%p4382_p13)
}
 0xd27   : > { %s4386_s10 = scalar_lea.hbm %s6049_s29, 256  ;;  %s4390_s14 = scalar_lea.hbm %s6099_s6, 512 }
 0xd28   : > { %p4387_p9 = scmp.ne.s32.totalorder %s6049_s29, %s4386_s10  ;;  %p4391_p4 = scmp.lt.u32.totalorder %s6049_s29, %s6099_s6 }
 0xd29   : > { %p4392_p8 = scmp.lt.u32.totalorder %s4390_s14, %s4386_s10  ;;  %p4394_p3 = scmp.lt.u32.totalorder %s4386_s10, %s6049_s29 }
 0xd2a   : > { %p4388_p0 = pnand %p4387_p9, %p4672_p10 }
 0xd2b   : > { %p4393_p6 = por %p4392_p8, %p4391_p4 }
 0xd2c   : > { %p4389_p11 = pneg %p4388_p0 }
 0xd2d   : > { %p4395_p5 = por %p4394_p3, %p4393_p6 }
 0xd2f   : > { %p4396_p7 = pnand %p4395_p5, %p4389_p11 }
 0xd31   : > { %4399 = shalt.err (!%p4396_p7)
}
 0xd32   : > { %s4464_s11 = smov 128   ;;  %s4465_s27 = smov 8  }
 0xd33   : > { %4050 = dma.vmem_to_hbm [thread:$0]  (%p4672_p10), %s6044_s19, 256, %s6049_s29, %s3630_s20, %s4464_s11, %s4464_s11, %s4465_s27  }
 0xd34 PF: > { %s3658_s30 = sand.u32 1, %s4434_s21   ;;  %p6298_p12 = scmp.ne.s32.totalorder %s6177_s28, 0 }
 0xd35   : > { %p6299_p1 = scmp.ge.s32.totalorder %s4446_s24, 2  ;;  %s3659_s25 = scalar_lea.sflag [#allocation4], %s3658_s30 }
 0xd37   : > { %p4070_p2 = pnand %p6299_p1, %p6298_p12 }
 0xd39   : > { %4429 = dma.done.wait (!%p4070_p2), %s3659_s25, 256  }
 0xd3a   : > { %4431 = vsyncadd (!%p4070_p2), %s3659_s25, 4294967040  ;;  %p21_p13 = scmp.ge.s32.totalorder %s4662_s18, 4   ;;  %s6300_s21 = smov %s4438_s22 }
 0xd3b   : > { %s6301_s22 = smov %s4442_s23  ;;  %s6302_s23 = smov %s4678_s16 }
 0xd3c   : > { %s6303_s24 = smov %s4662_s18  ;;  %23 = sbr.rel (!%p21_p13) target bundleno = 7 (0x7), region = 105 }
 0xd43   :  { %3664 = vsyncpa [#allocation3], 1 }
 0xd44   :  { %3666 = vsyncpa [#allocation3 + $0x1], 1 }
 0xd45   :  { %3667 = vsyncpa [#allocation6], 1 }
 0xd46   :  { %3668 = vsyncpa [#allocation9], 1 }
 0xd47   :  { %3669 = vsyncpa [#allocation4], 1 }
 0xd48   :  { %3671 = vsyncpa [#allocation4 + $0x1], 1 }

</bundles_post_ra>
